<compile_context>
chip_gen: v7x
topology: tpu7x:2x2x1
jax: 0.10.0
libtpu: 0.0.40
codegen_flags: <defaults>
</compile_context>

<pallas_src>
import jax
import jax.numpy as jnp
from jax.experimental import pallas as pl
from jax.experimental.pallas import tpu as pltpu

LANE = 128  # TPU lane width; channel dims are padded to multiples of this.


def _double_conv_kernel(x_ref, xtop_ref, xbot_ref, w1_ref, w2_ref, b1_ref,
                        b2_ref, o_ref, xcat_ref, midcat_ref, acc1_ref,
                        acc2_ref):
    """Fused (conv3x3 -> folded-BN -> ReLU) x 2 on one (batch, H-tile) block.

    x_ref      : (1, TH, W, Ci)        current tile rows
    xtop_ref   : (1, 2,  W, Ci)        2 rows above the tile (clamped at border)
    xbot_ref   : (1, 2,  W, Ci)        2 rows below the tile (clamped at border)
    w1_ref     : (3, 3*Ci, Co)         conv1 weights, BN1 scale folded, dx merged
    w2_ref     : (3, 3*Co, Co)         conv2 weights, BN2 scale folded, dx merged
    b1_ref     : (1, Co)               folded BN1 bias
    b2_ref     : (1, Co)               folded BN2 bias
    o_ref      : (1, TH, W, Co)        output tile
    xcat_ref   : VMEM (TH+4, W, 3*Ci)  conv1 input, dx-unrolled:
                 xcat[r, w, dx*Ci:c] = x_padded(tile_start + r - 2, w + dx - 1)
    midcat_ref : VMEM (TH+2, W, 3*Co)  conv2 input, dx-unrolled (same layout)
    acc1_ref   : VMEM ((TH+2)*W, Co)   f32 conv1 accumulator
    acc2_ref   : VMEM (TH*W, Co)       f32 conv2 accumulator
    """
    t = pl.program_id(1)
    n_tiles = pl.num_programs(1)
    _, TH, W, Ci = x_ref.shape
    Co = o_ref.shape[-1]
    THp2 = TH + 2
    cdt = xcat_ref.dtype
    mdt = midcat_ref.dtype

    # ---- stage conv1 input directly in dx-unrolled layout (no padded copy,
    # ---- no concatenate; only borders are explicitly zeroed) ----------------
    # zero padding columns: dx=0 reads image col -1, dx=2 reads image col W
    xcat_ref[:, 0:1, 0:Ci] = jnp.zeros((TH + 4, 1, Ci), cdt)
    xcat_ref[:, W - 1:W, 2 * Ci:3 * Ci] = jnp.zeros((TH + 4, 1, Ci), cdt)

    xt = x_ref[0].astype(cdt)                              # (TH, W, Ci)
    xcat_ref[2:TH + 2, 1:W, 0:Ci] = xt[:, 0:W - 1, :]      # dx = 0 (col w-1)
    xcat_ref[2:TH + 2, :, Ci:2 * Ci] = xt                  # dx = 1 (col w)
    xcat_ref[2:TH + 2, 0:W - 1, 2 * Ci:3 * Ci] = xt[:, 1:W, :]  # dx = 2 (col w+1)

    @pl.when(t > 0)                       # real rows above this tile
    def _():
        ht = xtop_ref[0].astype(cdt)                       # (2, W, Ci)
        xcat_ref[0:2, 1:W, 0:Ci] = ht[:, 0:W - 1, :]
        xcat_ref[0:2, :, Ci:2 * Ci] = ht
        xcat_ref[0:2, 0:W - 1, 2 * Ci:3 * Ci] = ht[:, 1:W, :]

    @pl.when(t == 0)                      # image top border -> zeros
    def _():
        xcat_ref[0:2, :, :] = jnp.zeros((2, W, 3 * Ci), cdt)

    @pl.when(t < n_tiles - 1)             # real rows below this tile
    def _():
        hb = xbot_ref[0].astype(cdt)                       # (2, W, Ci)
        xcat_ref[TH + 2:TH + 4, 1:W, 0:Ci] = hb[:, 0:W - 1, :]
        xcat_ref[TH + 2:TH + 4, :, Ci:2 * Ci] = hb
        xcat_ref[TH + 2:TH + 4, 0:W - 1, 2 * Ci:3 * Ci] = hb[:, 1:W, :]

    @pl.when(t == n_tiles - 1)            # image bottom border -> zeros
    def _():
        xcat_ref[TH + 2:TH + 4, :, :] = jnp.zeros((2, W, 3 * Ci), cdt)

    # ---- conv1 + folded BN1 over TH+2 rows (1-row halo for conv2) -----------
    acc1_ref[...] = jnp.broadcast_to(b1_ref[...], acc1_ref.shape)   # bias init
    for dy in range(3):                   # 3 MXU matmuls, K = 3*Ci
        patch = xcat_ref[dy:dy + THp2].reshape(THp2 * W, 3 * Ci)
        acc1_ref[...] += jnp.dot(patch, w1_ref[dy],
                                 preferred_element_type=jnp.float32)

    # ---- ReLU + stage conv2 input directly in dx-unrolled layout ------------
    a1 = jnp.maximum(acc1_ref[...], 0.0).reshape(THp2, W, Co).astype(mdt)
    midcat_ref[:, 0:1, 0:Co] = jnp.zeros((THp2, 1, Co), mdt)         # col -1
    midcat_ref[:, W - 1:W, 2 * Co:3 * Co] = jnp.zeros((THp2, 1, Co), mdt)  # col W
    midcat_ref[:, 1:W, 0:Co] = a1[:, 0:W - 1, :]
    midcat_ref[:, :, Co:2 * Co] = a1
    midcat_ref[:, 0:W - 1, 2 * Co:3 * Co] = a1[:, 1:W, :]

    # Rows outside the image are conv2's zero padding, not conv1 output.
    @pl.when(t == 0)
    def _():
        midcat_ref[0:1, :, :] = jnp.zeros((1, W, 3 * Co), mdt)

    @pl.when(t == n_tiles - 1)
    def _():
        midcat_ref[THp2 - 1:THp2, :, :] = jnp.zeros((1, W, 3 * Co), mdt)

    # ---- conv2 + folded BN2 + ReLU -> output tile ----------------------------
    acc2_ref[...] = jnp.broadcast_to(b2_ref[...], acc2_ref.shape)   # bias init
    for dy in range(3):                   # 3 MXU matmuls, K = 3*Co
        patch = midcat_ref[dy:dy + TH].reshape(TH * W, 3 * Co)
        acc2_ref[...] += jnp.dot(patch, w2_ref[dy],
                                 preferred_element_type=jnp.float32)

    o_ref[...] = jnp.maximum(acc2_ref[...], 0.0).reshape(
        1, TH, W, Co).astype(o_ref.dtype)


def _round_up(v, m):
    return (v + m - 1) // m * m


def _pick_tile_h(H, cap=64):
    """Largest even divisor of H that is <= cap (falls back to H)."""
    for th in range(min(cap, H), 1, -1):
        if H % th == 0 and th % 2 == 0:
            return th
    return H


def fold_bn(gamma, beta, mean, var, eps=1e-5):
    scale = gamma / jnp.sqrt(var + eps)
    bias = beta - mean * scale
    return scale, bias


def double_conv(x_nchw, params, *, tile_h=None, mxu_dtype=jnp.float32,
                vmem_limit_bytes=None):
    """DoubleConv forward (eval-mode BN).  Input/output NCHW (PyTorch layout)."""
    w1, w2 = params["w1"], params["w2"]            # HWIO conv weights
    s1, b1 = params["s1"], params["b1"]            # folded BN1 scale / bias
    s2, b2 = params["s2"], params["b2"]            # folded BN2 scale / bias
    N, Cin, H, W = x_nchw.shape
    Cout = w1.shape[-1]
    assert w1.shape[:3] == (3, 3, Cin) and w2.shape == (3, 3, Cout, Cout)
    assert W >= 2

    if tile_h is None:
        tile_h = _pick_tile_h(H)
    TH = int(tile_h)
    assert H % TH == 0 and TH % 2 == 0, (
        "tile_h must be even and divide H (halo rows are fetched as 2-row blocks)")
    n_tiles = H // TH

    ci = _round_up(Cin, LANE)                      # lane-dense channels
    co = _round_up(Cout, LANE)

    # Fold BN scale into conv weights; merge dx taps into the contraction dim.
    w1f = (w1 * s1.reshape(1, 1, 1, -1)).astype(mxu_dtype)
    w2f = (w2 * s2.reshape(1, 1, 1, -1)).astype(mxu_dtype)
    w1p = jnp.zeros((3, 3, ci, co), mxu_dtype).at[:, :, :Cin, :Cout].set(w1f)
    w2p = jnp.zeros((3, 3, co, co), mxu_dtype).at[:, :, :Cout, :Cout].set(w2f)
    w1r = w1p.reshape(3, 3 * ci, co)               # (dy, dx*ci, co)
    w2r = w2p.reshape(3, 3 * co, co)
    b1p = jnp.zeros((1, co), jnp.float32).at[0, :Cout].set(b1)
    b2p = jnp.zeros((1, co), jnp.float32).at[0, :Cout].set(b2)

    # NCHW -> NHWC (+ channel pad to lane width).  NO spatial padding here:
    # the conv border is built in-kernel in the staging scratch.
    x = jnp.transpose(x_nchw, (0, 2, 3, 1))
    if ci != Cin:
        x = jnp.pad(x, ((0, 0), (0, 0), (0, 0), (0, ci - Cin)))

    half = TH // 2    # halo rows are addressed as blocks of 2 rows

    out = pl.pallas_call(
        _double_conv_kernel,
        out_shape=jax.ShapeDtypeStruct((N, H, W, co), x_nchw.dtype),
        grid=(N, n_tiles),
        in_specs=[
            # current tile rows
            pl.BlockSpec((1, TH, W, ci), lambda n, t: (n, t, 0, 0)),
            # 2 rows above / below (block index clamped at the image border;
            # the kernel zero-masks them there with pl.when)
            pl.BlockSpec((1, 2, W, ci),
                         lambda n, t: (n, jnp.maximum(t * half - 1, 0), 0, 0)),
            pl.BlockSpec((1, 2, W, ci),
                         lambda n, t: (n, jnp.minimum(t * half + half,
                                                      H // 2 - 1), 0, 0)),
            # weights / folded biases (constant index map -> resident in VMEM)
            pl.BlockSpec((3, 3 * ci, co), lambda n, t: (0, 0, 0)),
            pl.BlockSpec((3, 3 * co, co), lambda n, t: (0, 0, 0)),
            pl.BlockSpec((1, co), lambda n, t: (0, 0)),
            pl.BlockSpec((1, co), lambda n, t: (0, 0)),
        ],
        out_specs=pl.BlockSpec((1, TH, W, co), lambda n, t: (n, t, 0, 0)),
        scratch_shapes=[
            pltpu.VMEM((TH + 4, W, 3 * ci), mxu_dtype),      # conv1 input (dx-unrolled)
            pltpu.VMEM((TH + 2, W, 3 * co), mxu_dtype),      # conv2 input (dx-unrolled)
            pltpu.VMEM(((TH + 2) * W, co), jnp.float32),     # conv1 accumulator
            pltpu.VMEM((TH * W, co), jnp.float32),           # conv2 accumulator
        ],
        compiler_params=pltpu.CompilerParams(
            # batch and H-tile axes both parallel -> both v7x TensorCores busy
            dimension_semantics=("parallel", "parallel"),
            vmem_limit_bytes=vmem_limit_bytes),
    )(x, x, x, w1r, w2r, b1p, b2p)

    out = out[..., :Cout]                           # drop lane padding
    return jnp.transpose(out, (0, 3, 1, 2))         # NHWC -> NCHW


def make_params(key, in_channels, out_channels):
    ks = jax.random.split(key, 10)
    fan1 = in_channels * 9
    fan2 = out_channels * 9
    # Conv weights created directly in HWIO (== PyTorch OIHW permuted (2,3,1,0)).
    w1 = jax.random.normal(ks[0], (3, 3, in_channels, out_channels),
                           jnp.float32) * (1.0 / jnp.sqrt(fan1))
    w2 = jax.random.normal(ks[1], (3, 3, out_channels, out_channels),
                           jnp.float32) * (1.0 / jnp.sqrt(fan2))
    g1 = 1.0 + 0.1 * jax.random.normal(ks[2], (out_channels,), jnp.float32)
    be1 = 0.1 * jax.random.normal(ks[3], (out_channels,), jnp.float32)
    m1 = 0.1 * jax.random.normal(ks[4], (out_channels,), jnp.float32)
    v1 = jnp.abs(1.0 + 0.1 * jax.random.normal(ks[5], (out_channels,), jnp.float32))
    g2 = 1.0 + 0.1 * jax.random.normal(ks[6], (out_channels,), jnp.float32)
    be2 = 0.1 * jax.random.normal(ks[7], (out_channels,), jnp.float32)
    m2 = 0.1 * jax.random.normal(ks[8], (out_channels,), jnp.float32)
    v2 = jnp.abs(1.0 + 0.1 * jax.random.normal(ks[9], (out_channels,), jnp.float32))
    s1, b1 = fold_bn(g1, be1, m1, v1)
    s2, b2 = fold_bn(g2, be2, m2, v2)
    return dict(w1=w1, s1=s1, b1=b1, w2=w2, s2=s2, b2=b2)


def _reference(x_nchw, params):
    # Pure-JAX reference (lax conv) for the correctness check.
    def step(x, w, s, b):
        y = jax.lax.conv_general_dilated(
            x, w, window_strides=(1, 1), padding="SAME",
            dimension_numbers=("NHWC", "HWIO", "NHWC"))
        y = y * s.reshape(1, 1, 1, -1) + b.reshape(1, 1, 1, -1)
        return jnp.maximum(y, 0.0)
    x = jnp.transpose(x_nchw, (0, 2, 3, 1))
    y = step(x, params["w1"], params["s1"], params["b1"])
    y = step(y, params["w2"], params["s2"], params["b2"])
    return jnp.transpose(y, (0, 3, 1, 2))


if __name__ == "__main__":
    key = jax.random.PRNGKey(0)
    kx, kp = jax.random.split(key)

    N, Cin, Cout, H, W = 2, 4, 8, 16, 16
    x = jax.random.normal(kx, (N, Cin, H, W), jnp.float32)
    params = make_params(kp, Cin, Cout)

    ref = _reference(x, params)

    # Tiled path (2 H-tiles per image: exercises both the real-halo fetch and
    # the zero-masked border halos).
    out = double_conv(x, params, tile_h=8)
    out = jax.block_until_ready(out)
    assert out.shape == (N, Cout, H, W), out.shape
    assert jnp.allclose(out, ref, atol=1e-4, rtol=1e-4), "mismatch (tiled)"

    # Single-tile path (whole image per grid step).
    out1 = double_conv(x, params, tile_h=16)
    out1 = jax.block_until_ready(out1)
    assert jnp.allclose(out1, ref, atol=1e-4, rtol=1e-4), "mismatch (single tile)"

    # TODO(synk): training-mode BatchNorm (batch statistics + running-stat
    # update) is not implemented; the kernel matches nn.BatchNorm2d.eval().

    print("KERNEL_OK")
</pallas_src>

<mosaic_0001>
module attributes {stable_mosaic.version = 11 : i64} {
  func.func @_double_conv_kernel(%arg0: i32, %arg1: i32, %arg2: memref<1x8x16x128xf32, #tpu.memory_space<vmem>>, %arg3: memref<1x2x16x128xf32, #tpu.memory_space<vmem>>, %arg4: memref<1x2x16x128xf32, #tpu.memory_space<vmem>>, %arg5: memref<3x384x128xf32, #tpu.memory_space<vmem>>, %arg6: memref<3x384x128xf32, #tpu.memory_space<vmem>>, %arg7: memref<1x128xf32, #tpu.memory_space<vmem>>, %arg8: memref<1x128xf32, #tpu.memory_space<vmem>>, %arg9: memref<1x8x16x128xf32, #tpu.memory_space<vmem>>, %arg10: memref<12x16x384xf32, #tpu.memory_space<vmem>>, %arg11: memref<10x16x384xf32, #tpu.memory_space<vmem>>, %arg12: memref<160x128xf32, #tpu.memory_space<vmem>>, %arg13: memref<128x128xf32, #tpu.memory_space<vmem>>) attributes {dimension_semantics = [#tpu.dimension_semantics<parallel>, #tpu.dimension_semantics<parallel>], iteration_bounds = array<i64: 2, 2>, scalar_prefetch = 0 : i64, scratch_operands = 4 : i64, tpu.core_type = #tpu.core_type<tc>, window_params = [{transform_indices = @transform_0, window_bounds = array<i64: 1, 8, 16, 128>}, {transform_indices = @transform_1, window_bounds = array<i64: 1, 2, 16, 128>}, {transform_indices = @transform_2, window_bounds = array<i64: 1, 2, 16, 128>}, {pipeline_mode = #tpu.pipeline_mode<synchronous>, transform_indices = @transform_3, window_bounds = array<i64: 3, 384, 128>}, {pipeline_mode = #tpu.pipeline_mode<synchronous>, transform_indices = @transform_4, window_bounds = array<i64: 3, 384, 128>}, {pipeline_mode = #tpu.pipeline_mode<synchronous>, transform_indices = @transform_5, window_bounds = array<i64: 1, 128>}, {pipeline_mode = #tpu.pipeline_mode<synchronous>, transform_indices = @transform_6, window_bounds = array<i64: 1, 128>}, {transform_indices = @transform_7, window_bounds = array<i64: 1, 8, 16, 128>}]} {
    %cst = arith.constant 0.000000e+00 : f32
    %0 = vector.broadcast %cst : f32 to vector<12x1x128xf32>
    %c0 = arith.constant 0 : index
    %c0_0 = arith.constant 0 : index
    %c0_1 = arith.constant 0 : index
    %1 = vector.load %arg10[%c0, %c0_0, %c0_1] : memref<12x16x384xf32, #tpu.memory_space<vmem>>, vector<12x1x128xf32>
    tpu.vector_store %arg10[%c0, %c0_0, %c0_1], %0 {strides = array<i32>} : memref<12x16x384xf32, #tpu.memory_space<vmem>>, vector<12x1x128xf32>,
    %cst_2 = arith.constant 0.000000e+00 : f32
    %2 = vector.broadcast %cst_2 : f32 to vector<12x1x128xf32>
    %c0_3 = arith.constant 0 : index
    %c15 = arith.constant 15 : index
    %c256 = arith.constant 256 : index
    %3 = vector.load %arg10[%c0_3, %c15, %c256] : memref<12x16x384xf32, #tpu.memory_space<vmem>>, vector<12x1x128xf32>
    tpu.vector_store %arg10[%c0_3, %c15, %c256], %2 {strides = array<i32>} : memref<12x16x384xf32, #tpu.memory_space<vmem>>, vector<12x1x128xf32>,
    %c0_4 = arith.constant 0 : index
    %c0_5 = arith.constant 0 : index
    %c0_6 = arith.constant 0 : index
    %c0_7 = arith.constant 0 : index
    %4 = vector.load %arg2[%c0_4, %c0_5, %c0_6, %c0_7] : memref<1x8x16x128xf32, #tpu.memory_space<vmem>>, vector<1x8x16x128xf32>
    %5 = vector.shape_cast %4 : vector<1x8x16x128xf32> to vector<8x16x128xf32>
    %6 = vector.extract_strided_slice %5 {offsets = [0, 0, 0], sizes = [8, 15, 128], strides = [1, 1, 1]} : vector<8x16x128xf32> to vector<8x15x128xf32>
    %c2 = arith.constant 2 : index
    %c1 = arith.constant 1 : index
    %c0_8 = arith.constant 0 : index
    %7 = vector.load %arg10[%c2, %c1, %c0_8] : memref<12x16x384xf32, #tpu.memory_space<vmem>>, vector<8x15x128xf32>
    tpu.vector_store %arg10[%c2, %c1, %c0_8], %6 {strides = array<i32>} : memref<12x16x384xf32, #tpu.memory_space<vmem>>, vector<8x15x128xf32>,
    %c2_9 = arith.constant 2 : index
    %c0_10 = arith.constant 0 : index
    %c128 = arith.constant 128 : index
    %8 = vector.load %arg10[%c2_9, %c0_10, %c128] : memref<12x16x384xf32, #tpu.memory_space<vmem>>, vector<8x16x128xf32>
    tpu.vector_store %arg10[%c2_9, %c0_10, %c128], %5 {strides = array<i32>} : memref<12x16x384xf32, #tpu.memory_space<vmem>>, vector<8x16x128xf32>,
    %9 = vector.extract_strided_slice %5 {offsets = [0, 1, 0], sizes = [8, 15, 128], strides = [1, 1, 1]} : vector<8x16x128xf32> to vector<8x15x128xf32>
    %c2_11 = arith.constant 2 : index
    %c0_12 = arith.constant 0 : index
    %c256_13 = arith.constant 256 : index
    %10 = vector.load %arg10[%c2_11, %c0_12, %c256_13] : memref<12x16x384xf32, #tpu.memory_space<vmem>>, vector<8x15x128xf32>
    tpu.vector_store %arg10[%c2_11, %c0_12, %c256_13], %9 {strides = array<i32>} : memref<12x16x384xf32, #tpu.memory_space<vmem>>, vector<8x15x128xf32>,
    %c0_i32 = arith.constant 0 : i32
    %11 = arith.cmpi sgt, %arg1, %c0_i32 : i32
    %12 = arith.extui %11 : i1 to i32
    %c0_i32_14 = arith.constant 0 : i32
    %13 = arith.cmpi ne, %12, %c0_i32_14 : i32
    scf.if %13 {
      %c0_125 = arith.constant 0 : index
      %c0_126 = arith.constant 0 : index
      %c0_127 = arith.constant 0 : index
      %c0_128 = arith.constant 0 : index
      %103 = vector.load %arg3[%c0_125, %c0_126, %c0_127, %c0_128] : memref<1x2x16x128xf32, #tpu.memory_space<vmem>>, vector<1x2x16x128xf32>
      %104 = vector.shape_cast %103 : vector<1x2x16x128xf32> to vector<2x16x128xf32>
      %105 = vector.extract_strided_slice %104 {offsets = [0, 0, 0], sizes = [2, 15, 128], strides = [1, 1, 1]} : vector<2x16x128xf32> to vector<2x15x128xf32>
      %c0_129 = arith.constant 0 : index
      %c1_130 = arith.constant 1 : index
      %c0_131 = arith.constant 0 : index
      %106 = vector.load %arg10[%c0_129, %c1_130, %c0_131] : memref<12x16x384xf32, #tpu.memory_space<vmem>>, vector<2x15x128xf32>
      tpu.vector_store %arg10[%c0_129, %c1_130, %c0_131], %105 {strides = array<i32>} : memref<12x16x384xf32, #tpu.memory_space<vmem>>, vector<2x15x128xf32>,
      %c0_132 = arith.constant 0 : index
      %c0_133 = arith.constant 0 : index
      %c128_134 = arith.constant 128 : index
      %107 = vector.load %arg10[%c0_132, %c0_133, %c128_134] : memref<12x16x384xf32, #tpu.memory_space<vmem>>, vector<2x16x128xf32>
      tpu.vector_store %arg10[%c0_132, %c0_133, %c128_134], %104 {strides = array<i32>} : memref<12x16x384xf32, #tpu.memory_space<vmem>>, vector<2x16x128xf32>,
      %108 = vector.extract_strided_slice %104 {offsets = [0, 1, 0], sizes = [2, 15, 128], strides = [1, 1, 1]} : vector<2x16x128xf32> to vector<2x15x128xf32>
      %c0_135 = arith.constant 0 : index
      %c0_136 = arith.constant 0 : index
      %c256_137 = arith.constant 256 : index
      %109 = vector.load %arg10[%c0_135, %c0_136, %c256_137] : memref<12x16x384xf32, #tpu.memory_space<vmem>>, vector<2x15x128xf32>
      tpu.vector_store %arg10[%c0_135, %c0_136, %c256_137], %108 {strides = array<i32>} : memref<12x16x384xf32, #tpu.memory_space<vmem>>, vector<2x15x128xf32>,
    } else {
    }
    %c0_i32_15 = arith.constant 0 : i32
    %14 = arith.cmpi eq, %arg1, %c0_i32_15 : i32
    %15 = arith.extui %14 : i1 to i32
    %c0_i32_16 = arith.constant 0 : i32
    %16 = arith.cmpi ne, %15, %c0_i32_16 : i32
    scf.if %16 {
      %cst_125 = arith.constant 0.000000e+00 : f32
      %103 = vector.broadcast %cst_125 : f32 to vector<2x16x384xf32>
      %c0_126 = arith.constant 0 : index
      %c0_127 = arith.constant 0 : index
      %c0_128 = arith.constant 0 : index
      %104 = vector.load %arg10[%c0_126, %c0_127, %c0_128] : memref<12x16x384xf32, #tpu.memory_space<vmem>>, vector<2x16x384xf32>
      tpu.vector_store %arg10[%c0_126, %c0_127, %c0_128], %103 {strides = array<i32>} : memref<12x16x384xf32, #tpu.memory_space<vmem>>, vector<2x16x384xf32>,
    } else {
    }
    %c1_i32 = arith.constant 1 : i32
    %17 = arith.cmpi slt, %arg1, %c1_i32 : i32
    %18 = arith.extui %17 : i1 to i32
    %c0_i32_17 = arith.constant 0 : i32
    %19 = arith.cmpi ne, %18, %c0_i32_17 : i32
    scf.if %19 {
      %c0_125 = arith.constant 0 : index
      %c0_126 = arith.constant 0 : index
      %c0_127 = arith.constant 0 : index
      %c0_128 = arith.constant 0 : index
      %103 = vector.load %arg4[%c0_125, %c0_126, %c0_127, %c0_128] : memref<1x2x16x128xf32, #tpu.memory_space<vmem>>, vector<1x2x16x128xf32>
      %104 = vector.shape_cast %103 : vector<1x2x16x128xf32> to vector<2x16x128xf32>
      %105 = vector.extract_strided_slice %104 {offsets = [0, 0, 0], sizes = [2, 15, 128], strides = [1, 1, 1]} : vector<2x16x128xf32> to vector<2x15x128xf32>
      %c10 = arith.constant 10 : index
      %c1_129 = arith.constant 1 : index
      %c0_130 = arith.constant 0 : index
      %106 = vector.load %arg10[%c10, %c1_129, %c0_130] : memref<12x16x384xf32, #tpu.memory_space<vmem>>, vector<2x15x128xf32>
      tpu.vector_store %arg10[%c10, %c1_129, %c0_130], %105 {strides = array<i32>} : memref<12x16x384xf32, #tpu.memory_space<vmem>>, vector<2x15x128xf32>,
      %c10_131 = arith.constant 10 : index
      %c0_132 = arith.constant 0 : index
      %c128_133 = arith.constant 128 : index
      %107 = vector.load %arg10[%c10_131, %c0_132, %c128_133] : memref<12x16x384xf32, #tpu.memory_space<vmem>>, vector<2x16x128xf32>
      tpu.vector_store %arg10[%c10_131, %c0_132, %c128_133], %104 {strides = array<i32>} : memref<12x16x384xf32, #tpu.memory_space<vmem>>, vector<2x16x128xf32>,
      %108 = vector.extract_strided_slice %104 {offsets = [0, 1, 0], sizes = [2, 15, 128], strides = [1, 1, 1]} : vector<2x16x128xf32> to vector<2x15x128xf32>
      %c10_134 = arith.constant 10 : index
      %c0_135 = arith.constant 0 : index
      %c256_136 = arith.constant 256 : index
      %109 = vector.load %arg10[%c10_134, %c0_135, %c256_136] : memref<12x16x384xf32, #tpu.memory_space<vmem>>, vector<2x15x128xf32>
      tpu.vector_store %arg10[%c10_134, %c0_135, %c256_136], %108 {strides = array<i32>} : memref<12x16x384xf32, #tpu.memory_space<vmem>>, vector<2x15x128xf32>,
    } else {
    }
    %c1_i32_18 = arith.constant 1 : i32
    %20 = arith.cmpi eq, %arg1, %c1_i32_18 : i32
    %21 = arith.extui %20 : i1 to i32
    %c0_i32_19 = arith.constant 0 : i32
    %22 = arith.cmpi ne, %21, %c0_i32_19 : i32
    scf.if %22 {
      %cst_125 = arith.constant 0.000000e+00 : f32
      %103 = vector.broadcast %cst_125 : f32 to vector<2x16x384xf32>
      %c10 = arith.constant 10 : index
      %c0_126 = arith.constant 0 : index
      %c0_127 = arith.constant 0 : index
      %104 = vector.load %arg10[%c10, %c0_126, %c0_127] : memref<12x16x384xf32, #tpu.memory_space<vmem>>, vector<2x16x384xf32>
      tpu.vector_store %arg10[%c10, %c0_126, %c0_127], %103 {strides = array<i32>} : memref<12x16x384xf32, #tpu.memory_space<vmem>>, vector<2x16x384xf32>,
    } else {
    }
    %c0_20 = arith.constant 0 : index
    %c0_21 = arith.constant 0 : index
    %23 = vector.load %arg7[%c0_20, %c0_21] : memref<1x128xf32, #tpu.memory_space<vmem>>, vector<1x128xf32>
    %24 = vector.shape_cast %23 : vector<1x128xf32> to vector<1x128xf32>
    %25 = vector.broadcast %24 : vector<1x128xf32> to vector<160x128xf32>
    %c0_22 = arith.constant 0 : index
    %c0_23 = arith.constant 0 : index
    %26 = vector.load %arg12[%c0_22, %c0_23] : memref<160x128xf32, #tpu.memory_space<vmem>>, vector<160x128xf32>
    tpu.vector_store %arg12[%c0_22, %c0_23], %25 {strides = array<i32>} : memref<160x128xf32, #tpu.memory_space<vmem>>, vector<160x128xf32>,
    %c0_24 = arith.constant 0 : index
    %c0_25 = arith.constant 0 : index
    %c0_26 = arith.constant 0 : index
    %27 = vector.load %arg10[%c0_24, %c0_25, %c0_26] : memref<12x16x384xf32, #tpu.memory_space<vmem>>, vector<10x16x384xf32>
    %28 = vector.shape_cast %27 : vector<10x16x384xf32> to vector<160x384xf32>
    %c0_27 = arith.constant 0 : index
    %c0_28 = arith.constant 0 : index
    %29 = vector.load %arg12[%c0_27, %c0_28] : memref<160x128xf32, #tpu.memory_space<vmem>>, vector<160x128xf32>
    %c0_29 = arith.constant 0 : index
    %c0_30 = arith.constant 0 : index
    %c0_31 = arith.constant 0 : index
    %30 = vector.load %arg5[%c0_29, %c0_30, %c0_31] : memref<3x384x128xf32, #tpu.memory_space<vmem>>, vector<1x384x128xf32>
    %31 = vector.shape_cast %30 : vector<1x384x128xf32> to vector<384x128xf32>
    %cst_32 = arith.constant dense<0.000000e+00> : vector<160x128xf32>
    %32 = tpu.matmul %28, %31, %cst_32 {dimension_numbers = #tpu.dot_dimension_numbers<[1], [0], [0], [1], [0, 0, 1, 1], [], []>} : vector<160x384xf32>, vector<384x128xf32>, vector<160x128xf32> -> vector<160x128xf32>
    %33 = arith.addf %29, %32 : vector<160x128xf32>
    %c0_33 = arith.constant 0 : index
    %c0_34 = arith.constant 0 : index
    %34 = vector.load %arg12[%c0_33, %c0_34] : memref<160x128xf32, #tpu.memory_space<vmem>>, vector<160x128xf32>
    tpu.vector_store %arg12[%c0_33, %c0_34], %33 {strides = array<i32>} : memref<160x128xf32, #tpu.memory_space<vmem>>, vector<160x128xf32>,
    %c1_35 = arith.constant 1 : index
    %c0_36 = arith.constant 0 : index
    %c0_37 = arith.constant 0 : index
    %35 = vector.load %arg10[%c1_35, %c0_36, %c0_37] : memref<12x16x384xf32, #tpu.memory_space<vmem>>, vector<10x16x384xf32>
    %36 = vector.shape_cast %35 : vector<10x16x384xf32> to vector<160x384xf32>
    %c0_38 = arith.constant 0 : index
    %c0_39 = arith.constant 0 : index
    %37 = vector.load %arg12[%c0_38, %c0_39] : memref<160x128xf32, #tpu.memory_space<vmem>>, vector<160x128xf32>
    %c1_40 = arith.constant 1 : index
    %c0_41 = arith.constant 0 : index
    %c0_42 = arith.constant 0 : index
    %38 = vector.load %arg5[%c1_40, %c0_41, %c0_42] : memref<3x384x128xf32, #tpu.memory_space<vmem>>, vector<1x384x128xf32>
    %39 = vector.shape_cast %38 : vector<1x384x128xf32> to vector<384x128xf32>
    %cst_43 = arith.constant dense<0.000000e+00> : vector<160x128xf32>
    %40 = tpu.matmul %36, %39, %cst_43 {dimension_numbers = #tpu.dot_dimension_numbers<[1], [0], [0], [1], [0, 0, 1, 1], [], []>} : vector<160x384xf32>, vector<384x128xf32>, vector<160x128xf32> -> vector<160x128xf32>
    %41 = arith.addf %37, %40 : vector<160x128xf32>
    %c0_44 = arith.constant 0 : index
    %c0_45 = arith.constant 0 : index
    %42 = vector.load %arg12[%c0_44, %c0_45] : memref<160x128xf32, #tpu.memory_space<vmem>>, vector<160x128xf32>
    tpu.vector_store %arg12[%c0_44, %c0_45], %41 {strides = array<i32>} : memref<160x128xf32, #tpu.memory_space<vmem>>, vector<160x128xf32>,
    %c2_46 = arith.constant 2 : index
    %c0_47 = arith.constant 0 : index
    %c0_48 = arith.constant 0 : index
    %43 = vector.load %arg10[%c2_46, %c0_47, %c0_48] : memref<12x16x384xf32, #tpu.memory_space<vmem>>, vector<10x16x384xf32>
    %44 = vector.shape_cast %43 : vector<10x16x384xf32> to vector<160x384xf32>
    %c0_49 = arith.constant 0 : index
    %c0_50 = arith.constant 0 : index
    %45 = vector.load %arg12[%c0_49, %c0_50] : memref<160x128xf32, #tpu.memory_space<vmem>>, vector<160x128xf32>
    %c2_51 = arith.constant 2 : index
    %c0_52 = arith.constant 0 : index
    %c0_53 = arith.constant 0 : index
    %46 = vector.load %arg5[%c2_51, %c0_52, %c0_53] : memref<3x384x128xf32, #tpu.memory_space<vmem>>, vector<1x384x128xf32>
    %47 = vector.shape_cast %46 : vector<1x384x128xf32> to vector<384x128xf32>
    %cst_54 = arith.constant dense<0.000000e+00> : vector<160x128xf32>
    %48 = tpu.matmul %44, %47, %cst_54 {dimension_numbers = #tpu.dot_dimension_numbers<[1], [0], [0], [1], [0, 0, 1, 1], [], []>} : vector<160x384xf32>, vector<384x128xf32>, vector<160x128xf32> -> vector<160x128xf32>
    %49 = arith.addf %45, %48 : vector<160x128xf32>
    %c0_55 = arith.constant 0 : index
    %c0_56 = arith.constant 0 : index
    %50 = vector.load %arg12[%c0_55, %c0_56] : memref<160x128xf32, #tpu.memory_space<vmem>>, vector<160x128xf32>
    tpu.vector_store %arg12[%c0_55, %c0_56], %49 {strides = array<i32>} : memref<160x128xf32, #tpu.memory_space<vmem>>, vector<160x128xf32>,
    %c0_57 = arith.constant 0 : index
    %c0_58 = arith.constant 0 : index
    %51 = vector.load %arg12[%c0_57, %c0_58] : memref<160x128xf32, #tpu.memory_space<vmem>>, vector<160x128xf32>
    %cst_59 = arith.constant 0.000000e+00 : f32
    %52 = vector.broadcast %cst_59 : f32 to vector<160x128xf32>
    %53 = arith.maximumf %51, %52 : vector<160x128xf32>
    %54 = vector.shape_cast %53 : vector<160x128xf32> to vector<10x16x128xf32>
    %cst_60 = arith.constant 0.000000e+00 : f32
    %55 = vector.broadcast %cst_60 : f32 to vector<10x1x128xf32>
    %c0_61 = arith.constant 0 : index
    %c0_62 = arith.constant 0 : index
    %c0_63 = arith.constant 0 : index
    %56 = vector.load %arg11[%c0_61, %c0_62, %c0_63] : memref<10x16x384xf32, #tpu.memory_space<vmem>>, vector<10x1x128xf32>
    tpu.vector_store %arg11[%c0_61, %c0_62, %c0_63], %55 {strides = array<i32>} : memref<10x16x384xf32, #tpu.memory_space<vmem>>, vector<10x1x128xf32>,
    %cst_64 = arith.constant 0.000000e+00 : f32
    %57 = vector.broadcast %cst_64 : f32 to vector<10x1x128xf32>
    %c0_65 = arith.constant 0 : index
    %c15_66 = arith.constant 15 : index
    %c256_67 = arith.constant 256 : index
    %58 = vector.load %arg11[%c0_65, %c15_66, %c256_67] : memref<10x16x384xf32, #tpu.memory_space<vmem>>, vector<10x1x128xf32>
    tpu.vector_store %arg11[%c0_65, %c15_66, %c256_67], %57 {strides = array<i32>} : memref<10x16x384xf32, #tpu.memory_space<vmem>>, vector<10x1x128xf32>,
    %59 = vector.extract_strided_slice %54 {offsets = [0, 0, 0], sizes = [10, 15, 128], strides = [1, 1, 1]} : vector<10x16x128xf32> to vector<10x15x128xf32>
    %c0_68 = arith.constant 0 : index
    %c1_69 = arith.constant 1 : index
    %c0_70 = arith.constant 0 : index
    %60 = vector.load %arg11[%c0_68, %c1_69, %c0_70] : memref<10x16x384xf32, #tpu.memory_space<vmem>>, vector<10x15x128xf32>
    tpu.vector_store %arg11[%c0_68, %c1_69, %c0_70], %59 {strides = array<i32>} : memref<10x16x384xf32, #tpu.memory_space<vmem>>, vector<10x15x128xf32>,
    %c0_71 = arith.constant 0 : index
    %c0_72 = arith.constant 0 : index
    %c128_73 = arith.constant 128 : index
    %61 = vector.load %arg11[%c0_71, %c0_72, %c128_73] : memref<10x16x384xf32, #tpu.memory_space<vmem>>, vector<10x16x128xf32>
    tpu.vector_store %arg11[%c0_71, %c0_72, %c128_73], %54 {strides = array<i32>} : memref<10x16x384xf32, #tpu.memory_space<vmem>>, vector<10x16x128xf32>,
    %62 = vector.extract_strided_slice %54 {offsets = [0, 1, 0], sizes = [10, 15, 128], strides = [1, 1, 1]} : vector<10x16x128xf32> to vector<10x15x128xf32>
    %c0_74 = arith.constant 0 : index
    %c0_75 = arith.constant 0 : index
    %c256_76 = arith.constant 256 : index
    %63 = vector.load %arg11[%c0_74, %c0_75, %c256_76] : memref<10x16x384xf32, #tpu.memory_space<vmem>>, vector<10x15x128xf32>
    tpu.vector_store %arg11[%c0_74, %c0_75, %c256_76], %62 {strides = array<i32>} : memref<10x16x384xf32, #tpu.memory_space<vmem>>, vector<10x15x128xf32>,
    %c0_i32_77 = arith.constant 0 : i32
    %64 = arith.cmpi eq, %arg1, %c0_i32_77 : i32
    %65 = arith.extui %64 : i1 to i32
    %c0_i32_78 = arith.constant 0 : i32
    %66 = arith.cmpi ne, %65, %c0_i32_78 : i32
    scf.if %66 {
      %cst_125 = arith.constant 0.000000e+00 : f32
      %103 = vector.broadcast %cst_125 : f32 to vector<1x16x384xf32>
      %c0_126 = arith.constant 0 : index
      %c0_127 = arith.constant 0 : index
      %c0_128 = arith.constant 0 : index
      %104 = vector.load %arg11[%c0_126, %c0_127, %c0_128] : memref<10x16x384xf32, #tpu.memory_space<vmem>>, vector<1x16x384xf32>
      tpu.vector_store %arg11[%c0_126, %c0_127, %c0_128], %103 {strides = array<i32>} : memref<10x16x384xf32, #tpu.memory_space<vmem>>, vector<1x16x384xf32>,
    } else {
    }
    %c1_i32_79 = arith.constant 1 : i32
    %67 = arith.cmpi eq, %arg1, %c1_i32_79 : i32
    %68 = arith.extui %67 : i1 to i32
    %c0_i32_80 = arith.constant 0 : i32
    %69 = arith.cmpi ne, %68, %c0_i32_80 : i32
    scf.if %69 {
      %cst_125 = arith.constant 0.000000e+00 : f32
      %103 = vector.broadcast %cst_125 : f32 to vector<1x16x384xf32>
      %c9 = arith.constant 9 : index
      %c0_126 = arith.constant 0 : index
      %c0_127 = arith.constant 0 : index
      %104 = vector.load %arg11[%c9, %c0_126, %c0_127] : memref<10x16x384xf32, #tpu.memory_space<vmem>>, vector<1x16x384xf32>
      tpu.vector_store %arg11[%c9, %c0_126, %c0_127], %103 {strides = array<i32>} : memref<10x16x384xf32, #tpu.memory_space<vmem>>, vector<1x16x384xf32>,
    } else {
    }
    %c0_81 = arith.constant 0 : index
    %c0_82 = arith.constant 0 : index
    %70 = vector.load %arg8[%c0_81, %c0_82] : memref<1x128xf32, #tpu.memory_space<vmem>>, vector<1x128xf32>
    %71 = vector.shape_cast %70 : vector<1x128xf32> to vector<1x128xf32>
    %72 = vector.broadcast %71 : vector<1x128xf32> to vector<128x128xf32>
    %c0_83 = arith.constant 0 : index
    %c0_84 = arith.constant 0 : index
    %73 = vector.load %arg13[%c0_83, %c0_84] : memref<128x128xf32, #tpu.memory_space<vmem>>, vector<128x128xf32>
    tpu.vector_store %arg13[%c0_83, %c0_84], %72 {strides = array<i32>} : memref<128x128xf32, #tpu.memory_space<vmem>>, vector<128x128xf32>,
    %c0_85 = arith.constant 0 : index
    %c0_86 = arith.constant 0 : index
    %c0_87 = arith.constant 0 : index
    %74 = vector.load %arg11[%c0_85, %c0_86, %c0_87] : memref<10x16x384xf32, #tpu.memory_space<vmem>>, vector<8x16x384xf32>
    %75 = vector.shape_cast %74 : vector<8x16x384xf32> to vector<128x384xf32>
    %c0_88 = arith.constant 0 : index
    %c0_89 = arith.constant 0 : index
    %76 = vector.load %arg13[%c0_88, %c0_89] : memref<128x128xf32, #tpu.memory_space<vmem>>, vector<128x128xf32>
    %c0_90 = arith.constant 0 : index
    %c0_91 = arith.constant 0 : index
    %c0_92 = arith.constant 0 : index
    %77 = vector.load %arg6[%c0_90, %c0_91, %c0_92] : memref<3x384x128xf32, #tpu.memory_space<vmem>>, vector<1x384x128xf32>
    %78 = vector.shape_cast %77 : vector<1x384x128xf32> to vector<384x128xf32>
    %cst_93 = arith.constant dense<0.000000e+00> : vector<128x128xf32>
    %79 = tpu.matmul %75, %78, %cst_93 {dimension_numbers = #tpu.dot_dimension_numbers<[1], [0], [0], [1], [0, 0, 1, 1], [], []>} : vector<128x384xf32>, vector<384x128xf32>, vector<128x128xf32> -> vector<128x128xf32>
    %80 = arith.addf %76, %79 : vector<128x128xf32>
    %c0_94 = arith.constant 0 : index
    %c0_95 = arith.constant 0 : index
    %81 = vector.load %arg13[%c0_94, %c0_95] : memref<128x128xf32, #tpu.memory_space<vmem>>, vector<128x128xf32>
    tpu.vector_store %arg13[%c0_94, %c0_95], %80 {strides = array<i32>} : memref<128x128xf32, #tpu.memory_space<vmem>>, vector<128x128xf32>,
    %c1_96 = arith.constant 1 : index
    %c0_97 = arith.constant 0 : index
    %c0_98 = arith.constant 0 : index
    %82 = vector.load %arg11[%c1_96, %c0_97, %c0_98] : memref<10x16x384xf32, #tpu.memory_space<vmem>>, vector<8x16x384xf32>
    %83 = vector.shape_cast %82 : vector<8x16x384xf32> to vector<128x384xf32>
    %c0_99 = arith.constant 0 : index
    %c0_100 = arith.constant 0 : index
    %84 = vector.load %arg13[%c0_99, %c0_100] : memref<128x128xf32, #tpu.memory_space<vmem>>, vector<128x128xf32>
    %c1_101 = arith.constant 1 : index
    %c0_102 = arith.constant 0 : index
    %c0_103 = arith.constant 0 : index
    %85 = vector.load %arg6[%c1_101, %c0_102, %c0_103] : memref<3x384x128xf32, #tpu.memory_space<vmem>>, vector<1x384x128xf32>
    %86 = vector.shape_cast %85 : vector<1x384x128xf32> to vector<384x128xf32>
    %cst_104 = arith.constant dense<0.000000e+00> : vector<128x128xf32>
    %87 = tpu.matmul %83, %86, %cst_104 {dimension_numbers = #tpu.dot_dimension_numbers<[1], [0], [0], [1], [0, 0, 1, 1], [], []>} : vector<128x384xf32>, vector<384x128xf32>, vector<128x128xf32> -> vector<128x128xf32>
    %88 = arith.addf %84, %87 : vector<128x128xf32>
    %c0_105 = arith.constant 0 : index
    %c0_106 = arith.constant 0 : index
    %89 = vector.load %arg13[%c0_105, %c0_106] : memref<128x128xf32, #tpu.memory_space<vmem>>, vector<128x128xf32>
    tpu.vector_store %arg13[%c0_105, %c0_106], %88 {strides = array<i32>} : memref<128x128xf32, #tpu.memory_space<vmem>>, vector<128x128xf32>,
    %c2_107 = arith.constant 2 : index
    %c0_108 = arith.constant 0 : index
    %c0_109 = arith.constant 0 : index
    %90 = vector.load %arg11[%c2_107, %c0_108, %c0_109] : memref<10x16x384xf32, #tpu.memory_space<vmem>>, vector<8x16x384xf32>
    %91 = vector.shape_cast %90 : vector<8x16x384xf32> to vector<128x384xf32>
    %c0_110 = arith.constant 0 : index
    %c0_111 = arith.constant 0 : index
    %92 = vector.load %arg13[%c0_110, %c0_111] : memref<128x128xf32, #tpu.memory_space<vmem>>, vector<128x128xf32>
    %c2_112 = arith.constant 2 : index
    %c0_113 = arith.constant 0 : index
    %c0_114 = arith.constant 0 : index
    %93 = vector.load %arg6[%c2_112, %c0_113, %c0_114] : memref<3x384x128xf32, #tpu.memory_space<vmem>>, vector<1x384x128xf32>
    %94 = vector.shape_cast %93 : vector<1x384x128xf32> to vector<384x128xf32>
    %cst_115 = arith.constant dense<0.000000e+00> : vector<128x128xf32>
    %95 = tpu.matmul %91, %94, %cst_115 {dimension_numbers = #tpu.dot_dimension_numbers<[1], [0], [0], [1], [0, 0, 1, 1], [], []>} : vector<128x384xf32>, vector<384x128xf32>, vector<128x128xf32> -> vector<128x128xf32>
    %96 = arith.addf %92, %95 : vector<128x128xf32>
    %c0_116 = arith.constant 0 : index
    %c0_117 = arith.constant 0 : index
    %97 = vector.load %arg13[%c0_116, %c0_117] : memref<128x128xf32, #tpu.memory_space<vmem>>, vector<128x128xf32>
    tpu.vector_store %arg13[%c0_116, %c0_117], %96 {strides = array<i32>} : memref<128x128xf32, #tpu.memory_space<vmem>>, vector<128x128xf32>,
    %c0_118 = arith.constant 0 : index
    %c0_119 = arith.constant 0 : index
    %98 = vector.load %arg13[%c0_118, %c0_119] : memref<128x128xf32, #tpu.memory_space<vmem>>, vector<128x128xf32>
    %cst_120 = arith.constant 0.000000e+00 : f32
    %99 = vector.broadcast %cst_120 : f32 to vector<128x128xf32>
    %100 = arith.maximumf %98, %99 : vector<128x128xf32>
    %101 = vector.shape_cast %100 : vector<128x128xf32> to vector<1x8x16x128xf32>
    %c0_121 = arith.constant 0 : index
    %c0_122 = arith.constant 0 : index
    %c0_123 = arith.constant 0 : index
    %c0_124 = arith.constant 0 : index
    %102 = vector.load %arg9[%c0_121, %c0_122, %c0_123, %c0_124] : memref<1x8x16x128xf32, #tpu.memory_space<vmem>>, vector<1x8x16x128xf32>
    tpu.vector_store %arg9[%c0_121, %c0_122, %c0_123, %c0_124], %101 {strides = array<i32>} : memref<1x8x16x128xf32, #tpu.memory_space<vmem>>, vector<1x8x16x128xf32>,
    return
  }
  func.func @transform_0(%arg0: i32, %arg1: i32) -> (i32, i32, i32, i32) {
    %c0_i32 = arith.constant 0 : i32
    %c0_i32_0 = arith.constant 0 : i32
    %c0_i32_1 = arith.constant 0 : i32
    return %arg0, %arg1, %c0_i32, %c0_i32_0 : i32, i32, i32, i32
  }
  func.func @transform_1(%arg0: i32, %arg1: i32) -> (i32, i32, i32, i32) {
    %c4_i32 = arith.constant 4 : i32
    %0 = arith.muli %arg1, %c4_i32 : i32
    %c1_i32 = arith.constant 1 : i32
    %1 = arith.subi %0, %c1_i32 : i32
    %c0_i32 = arith.constant 0 : i32
    %2 = arith.maxsi %1, %c0_i32 : i32
    %c0_i32_0 = arith.constant 0 : i32
    %c0_i32_1 = arith.constant 0 : i32
    %c0_i32_2 = arith.constant 0 : i32
    return %arg0, %2, %c0_i32_0, %c0_i32_1 : i32, i32, i32, i32
  }
  func.func @transform_2(%arg0: i32, %arg1: i32) -> (i32, i32, i32, i32) {
    %c4_i32 = arith.constant 4 : i32
    %0 = arith.muli %arg1, %c4_i32 : i32
    %c4_i32_0 = arith.constant 4 : i32
    %1 = arith.addi %0, %c4_i32_0 : i32
    %c7_i32 = arith.constant 7 : i32
    %2 = arith.minsi %1, %c7_i32 : i32
    %c0_i32 = arith.constant 0 : i32
    %c0_i32_1 = arith.constant 0 : i32
    %c0_i32_2 = arith.constant 0 : i32
    return %arg0, %2, %c0_i32, %c0_i32_1 : i32, i32, i32, i32
  }
  func.func @transform_3(%arg0: i32, %arg1: i32) -> (i32, i32, i32) {
    %c0_i32 = arith.constant 0 : i32
    %c0_i32_0 = arith.constant 0 : i32
    %c0_i32_1 = arith.constant 0 : i32
    %c0_i32_2 = arith.constant 0 : i32
    return %c0_i32, %c0_i32_0, %c0_i32_1 : i32, i32, i32
  }
  func.func @transform_4(%arg0: i32, %arg1: i32) -> (i32, i32, i32) {
    %c0_i32 = arith.constant 0 : i32
    %c0_i32_0 = arith.constant 0 : i32
    %c0_i32_1 = arith.constant 0 : i32
    %c0_i32_2 = arith.constant 0 : i32
    return %c0_i32, %c0_i32_0, %c0_i32_1 : i32, i32, i32
  }
  func.func @transform_5(%arg0: i32, %arg1: i32) -> (i32, i32) {
    %c0_i32 = arith.constant 0 : i32
    %c0_i32_0 = arith.constant 0 : i32
    %c0_i32_1 = arith.constant 0 : i32
    return %c0_i32, %c0_i32_0 : i32, i32
  }
  func.func @transform_6(%arg0: i32, %arg1: i32) -> (i32, i32) {
    %c0_i32 = arith.constant 0 : i32
    %c0_i32_0 = arith.constant 0 : i32
    %c0_i32_1 = arith.constant 0 : i32
    return %c0_i32, %c0_i32_0 : i32, i32
  }
  func.func @transform_7(%arg0: i32, %arg1: i32) -> (i32, i32, i32, i32) {
    %c0_i32 = arith.constant 0 : i32
    %c0_i32_0 = arith.constant 0 : i32
    %c0_i32_1 = arith.constant 0 : i32
    return %arg0, %arg1, %c0_i32, %c0_i32_0 : i32, i32, i32, i32
  }
}

</mosaic_0001>

<bundles_post_ra>
// kernel: tpu_custom_call.1
= control target key start
LH: loop header
LB: loop body
LE: loop exit
PB: predicated region body
PF: predicated region fallthrough
CT: control target
= control target key end

     0   :  { %s7696_s0 = inlined_call_operand.hbm [shape: f32[2,16,16,128], index: 0, kind: input, shape index: {}]   ;;  %s7697_s1 = inlined_call_operand.hbm [shape: f32[2,16,16,128], index: 1, kind: input, shape index: {}]   ;;  %s7698_s2 = inlined_call_operand.hbm [shape: f32[2,16,16,128], index: 2, kind: input, shape index: {}]   ;;  %s7699_s3 = inlined_call_operand.hbm [shape: f32[3,384,128], index: 3, kind: input, shape index: {}]   ;;  %s7700_s4 = inlined_call_operand.hbm [shape: f32[3,384,128], index: 4, kind: input, shape index: {}]   ;;  %s7701_s5 = inlined_call_operand.vmem [shape: f32[1,128], index: 5, kind: input, shape index: {}]   ;;  %s7702_s6 = inlined_call_operand.vmem [shape: f32[1,128], index: 6, kind: input, shape index: {}]   ;;  %s7703_s7 = inlined_call_operand.hbm [shape: f32[2,16,16,128], index: 7, kind: output, shape index: {}]  }
   0x1   :  { %7731 = sst [smem:[#allocation34_spill]] %s7696_s0 }
   0x2   :  { %7732 = sst [smem:[#allocation35_spill]] %s7697_s1 }
   0x3   :  { %7733 = sst [smem:[#allocation36_spill]] %s7698_s2 }
   0x4   :  { %7734 = sst [smem:[#allocation37_spill]] %s7699_s3 }
   0x5   :  { %7735 = sst [smem:[#allocation38_spill]] %s7700_s4 }
   0x6   :  { %7736 = sst [smem:[#allocation39_spill]] %s7701_s5 }
   0x7   :  { %7737 = sst [smem:[#allocation40_spill]] %s7702_s6 }
   0x8   :  { %7738 = sst [smem:[#allocation41_spill]] %s7703_s7 }
   0x9   :  { %12 = vsyncpa [#allocation7], 0 }
   0xa   :  { %14 = vsyncpa [#allocation7 + $0x1], 0 }
   0xb   :  { %15 = vsyncpa [#allocation10], 0 }
   0xc   :  { %17 = vsyncpa [#allocation10 + $0x1], 0 }
   0xd   :  { %18 = vsyncpa [#allocation13], 0 }
   0xe   :  { %19 = vsyncpa [#allocation8], 0 }
   0xf   :  { %21 = vsyncpa [#allocation8 + $0x1], 0  ;;  %s6023_s24 = smov 0   ;;  %s6025_s25 = smov 0  }
  0x10   :  { %s6027_s26 = smov 0   ;;  %s6029_s27 = smov 0  }
  0x11   :  { %s6031_s28 = smov 0   ;;  %s6033_s29 = smov 0  }
  0x12   :  { %s6035_s30 = smov 0   ;;  %s6037_s8 = smov 0  }
  0x13   :  { %s6039_s9 = smov 0   ;;  %s6041_s10 = smov 0  }
  0x14   :  { %s6043_s11 = smov 0   ;;  %s6045_s12 = smov 0  }
  0x15   :  { %s6047_s13 = smov 0   ;;  %s6049_s14 = smov 0  }
  0x16 LB: > { %7739 = sst [smem:[#allocation21_spill]] %s5913_s24  ;;  %s6094_s15 = sadd.s32 4294967295, %s5965_s14   ;;  %s5965_s14 = sphi %s6049_s14, %s27_s14   ;;  %s5961_s13 = sphi %s6047_s13, %s7820_s13   ;;  %s5957_s12 = sphi %s6045_s12, %s7819_s12   ;;  %s5953_s11 = sphi %s6043_s11, %s7818_s11   ;;  %s5949_s10 = sphi %s6041_s10, %s7817_s10   ;;  %s5945_s9 = sphi %s6039_s9, %s7828_s9   ;;  %s5941_s8 = sphi %s6037_s8, %s7827_s8   ;;  %s5937_s30 = sphi %s6035_s30, %s7826_s30   ;;  %s5933_s29 = sphi %s6033_s29, %s7825_s29   ;;  %s5929_s28 = sphi %s6031_s28, %s7824_s28   ;;  %s5925_s27 = sphi %s6029_s27, %s7823_s27   ;;  %s5921_s26 = sphi %s6027_s26, %s7822_s26   ;;  %s5917_s25 = sphi %s6025_s25, %s7814_s25   ;;  %s5913_s24 = sphi %s6023_s24, %s7813_s24  }
  0x17   : > { %7740 = sst [smem:[#allocation22_spill]] %s5917_s25  ;;  %p4120_p0 = scmp.ge.s32.totalorder %s5965_s14, 1 }
  0x18   : > { %7741 = sst [smem:[#allocation23_spill]] %s5921_s26  ;;  %p7705_p1 = scmp.eq.s32.totalorder %s6094_s15, 0 }
  0x19   : > { %7742 = sst [smem:[#allocation24_spill]] %s5929_s28  ;;  %p256_p3 = scmp.lt.s32.totalorder %s5965_s14, 5 }
  0x1a   : > { %7743 = sst [smem:[#allocation25_spill]] %s5949_s10  ;;  %s5967_s17 = smov [#allocation12]  }
  0x1b   : > { %7744 = sst [smem:[#allocation26_spill]] %s5953_s11  ;;  %p6100_p4 = pnand %p4120_p0, %p256_p3 }
  0x1c   : > { %7745 = sst [smem:[#allocation27_spill]] %s5957_s12  ;;  %s268_s18 = sshll.u32 %s5967_s17, 4  ;;  %s269_s18 = int_to_ptr.vmem [resolvable:$true] %s268_s18 }
  0x1d   : > { %7746 = sst [smem:[#allocation28_spill]] %s5961_s13  ;;  %p5510_p5 = pneg %p6100_p4 }
  0x1e   : > { %s7747_s16 = scalar_select %p6100_p4, 1, 0 }
  0x1f   : > { %p6108_p6 = pnand %p5510_p5, %p7705_p1  ;;  %s7750_s3 = sld [smem:[#allocation37_spill]] }
  0x20   : > { %7748 = sst [smem:[#allocation29_spill]] %s7747_s16 }
  0x21   : > { %p7725_p8 = pneg %p6108_p6 }
  0x25   : > { %s5661_s22 = scalar_lea.hbm %s7750_s3, 18432 }
  0x26   : > { %p5662_p7 = scmp.ne.s32.totalorder %s7750_s3, %s5661_s22  ;;  %p5668_p11 = scmp.lt.u32.totalorder %s5661_s22, %s7750_s3 }
  0x28   : > { %p5664_p9 = pnand %p7725_p8, %p5662_p7 }
  0x2a   : > { %p5665_p10 = pneg %p5664_p9 }
  0x2c   : > { %p5670_p12 = pnand %p5668_p11, %p5665_p10 }
  0x2e   : > { %5673 = shalt.err (!%p5670_p12)
}
  0x2f   : > { %s5674_s20 = scalar_lea.vmem %s269_s18, 18432  ;;  %p5682_p5 = scmp.lt.s32.totalorder %s269_s18, %s269_s18 }
  0x30   : > { %p5675_p13 = scmp.ne.s32.totalorder %s269_s18, %s5674_s20  ;;  %p5683_p2 = scmp.lt.s32.totalorder %s5674_s20, %s5674_s20 }
  0x32   : > { %p5677_p0 = pnand %p5675_p13, %p7725_p8  ;;  %p5684_p1 = por %p5683_p2, %p5682_p5 }
  0x34   : > { %p5678_p3 = pneg %p5677_p0 }
  0x36   : > { %p5685_p4 = pnand %p5684_p1, %p5678_p3 }
  0x38   : > { %5688 = shalt.err (!%p5685_p4)
}
  0x39   : > { %s7709_s7 = smov 128   ;;  %s7711_s11 = smov 8  }
  0x3a   : > { %5513 = dma.hbm_to_vmem [thread:$0]  (!%p6108_p6), %s7750_s3, 18432, %s269_s18, [#allocation13], %s7709_s7, %s7709_s7, %s7711_s11  }
  0x3b   : > { %s36_s23 = sadd.s32 1, %s5957_s12  ;;  %s39_s17 = sadd.s32 1, %s5961_s13 }
  0x3c   : > { %p37_p1 = scmp.ge.s32.totalorder %s36_s23, 2  ;;  %p7724_p2 = scmp.eq.s32.totalorder %s5965_s14, 0 }
  0x3d   : > { %s4114_s20 = sshll.u32 %s5957_s12, 2  ;;  %s84_s6 = sadd.s32 1, %s5933_s29 }
  0x3e   : > { %s7830_s23 = smov (%p37_p1, %s36_s23), 0  ;;  %s7832_s17 = smov (!%p37_p1, %s39_s17), %s5961_s13 }
  0x3f   : > { %7751 = sst [smem:[#allocation30_spill]] %s7830_s23  ;;  %s44_s5 = ssub.s32 %s5957_s12, %s7830_s23 }
  0x40   : > { %s4115_s10 = sadd.s32 4294967295, %s4114_s20  ;;  %p41_p4 = scmp.ge.s32.totalorder %s7832_s17, 2 }
  0x41   : > { %p73_p7 = scmp.gt.s32.totalorder %s4115_s10, 0  ;;  %s4116_s18 = sshll.u32 %s7830_s23, 2 }
  0x42   : > { %p91_p9 = scmp.ne.s32.totalorder %s5933_s29, %s5929_s28  ;;  %s7834_s17 = smov (%p41_p4, %s7832_s17), 0 }
  0x43   : > { %7752 = sst [smem:[#allocation31_spill]] %s7834_s17  ;;  %s7836_s10 = smov (!%p73_p7, %s4115_s10), 0 }
  0x44   : > { %s6154_s21 = ssub.s32 %s5961_s13, %s7834_s17  ;;  %s4117_s22 = sadd.s32 4294967295, %s4116_s18 }
  0x45   : > { %7753 = sst [smem:[#allocation32_spill]] %s6154_s21  ;;  %s6157_s7 = sor.u32 %s44_s5, %s6154_s21 }
  0x46   : > { %p77_p10 = scmp.gt.s32.totalorder %s4117_s22, 0  ;;  %p6162_p12 = por %p91_p9, %p7724_p2 }
  0x47   : > { %p97_p13 = scmp.ne.s32.totalorder %s5929_s28, %s5925_s27  ;;  %s6168_s3 = sadd.s32 4, %s4114_s20 }
  0x48   : > { %s7838_s22 = smov (!%p77_p10, %s4117_s22), 0  ;;  %p7755_p3 = scmp.eq.s32.totalorder %s6094_s15, 0 }
  0x49   : > { %s80_s17 = ssub.s32 %s7836_s10, %s7838_s22  ;;  %s6178_s16 = sadd.s32 4, %s4116_s18 }
  0x4a   : > { %s81_s5 = sor.u32 %s80_s17, %s6154_s21  ;;  %p6174_p5 = por %p97_p13, %p7755_p3 }
  0x4b   : > { %p82_p1 = scmp.eq.s32.totalorder %s81_s5, 0  ;;  %p7723_p7 = scmp.lt.s32.totalorder %s5965_s14, 4 }
  0x4c   : > { %s7756_s23 = scalar_select %p6174_p5, 1, 0 }
  0x4d   : > { %s6183_s27 = scalar_select %p82_p1, %s5933_s29, %s84_s6  }
  0x4e   : > { %7757 = sst [smem:[#allocation33_spill]] %s7756_s23  ;;  %s6186_s20 = sshll.u32 %s5961_s13, 5 }
  0x4f   : > { %s325_s22 = sand.u32 1, %s5965_s14   ;;  %s327_s17 = sand.u32 1, %s5933_s29  }
  0x50   : > { %s4129_s28 = sshll.u32 %s327_s17, 5  ;;  %s4165_s2 = sshll.u32 %s7836_s10, 2 }
  0x51   : > { %s340_s21 = sadd.s32 %s4165_s2, %s6186_s20  ;;  %s329_s23 = scalar_lea.vmem [#allocation9], %s4129_s28 }
  0x52   : > { %s4135_s24 = sshll.u32 %s340_s21, 7  ;;  %s343_s5 = sshll.u32 %s329_s23, 4  ;;  %s6196_s5 = int_to_ptr.vmem [resolvable:$true] %s343_s5 }
  0x53   : > { %s7758_s1 = sld [smem:[#allocation35_spill]]  ;;  %p6202_p9 = pnand %p7723_p7, %p6162_p12 }
  0x54   : > { %s5970_s2 = smov [#allocation14]  }
  0x55   : > { %s281_s28 = sshll.u32 %s5970_s2, 4  ;;  %p5691_p13 = pneg %p6202_p9  ;;  %s6206_s28 = int_to_ptr.vmem [resolvable:$true] %s281_s28 }
  0x59   : > { %s6194_s18 = scalar_lea.hbm %s7758_s1, %s4135_s24  ;;  %s6208_s24 = scalar_lea.sflag [#allocation10], %s325_s22 }
  0x5a   : > { %s5689_s25 = scalar_lea.hbm %s6194_s18, 512  ;;  %s5694_s11 = scalar_lea.hbm %s7758_s1, 8192 }
  0x5b   : > { %p5690_p10 = scmp.ne.s32.totalorder %s6194_s18, %s5689_s25  ;;  %p5695_p12 = scmp.lt.u32.totalorder %s6194_s18, %s7758_s1 }
  0x5c   : > { %p5696_p4 = scmp.lt.u32.totalorder %s5694_s11, %s5689_s25  ;;  %p5698_p7 = scmp.lt.u32.totalorder %s5689_s25, %s6194_s18 }
  0x5d   : > { %p5692_p3 = pnand %p5691_p13, %p5690_p10 }
  0x5e   : > { %p5697_p0 = por %p5696_p4, %p5695_p12 }
  0x5f   : > { %p5693_p1 = pneg %p5692_p3 }
  0x60   : > { %p5699_p2 = por %p5698_p7, %p5697_p0 }
  0x62   : > { %p5700_p11 = pnand %p5699_p2, %p5693_p1 }
  0x64   : > { %5703 = shalt.err (!%p5700_p11)
}
  0x65   : > { %s5704_s22 = scalar_lea.vmem %s6196_s5, 512  ;;  %s5971_s17 = smov [#allocation9]  }
  0x66   : > { %p5705_p10 = scmp.ne.s32.totalorder %s6196_s5, %s5704_s22  ;;  %s5709_s2 = sshll.u32 %s5971_s17, 4  ;;  %s5710_s2 = int_to_ptr.vmem [resolvable:$false] %s5709_s2 }
  0x67   : > { %s5711_s26 = scalar_lea.vmem %s5710_s2, 1024  ;;  %p5712_p5 = scmp.lt.s32.totalorder %s6196_s5, %s5710_s2 }
  0x68   : > { %p5707_p3 = pnand %p5705_p10, %p5691_p13  ;;  %p5713_p4 = scmp.lt.s32.totalorder %s5711_s26, %s5704_s22 }
  0x6a   : > { %p5708_p8 = pneg %p5707_p3  ;;  %p5714_p12 = por %p5713_p4, %p5712_p5 }
  0x6c   : > { %p5715_p0 = pnand %p5714_p12, %p5708_p8 }
  0x6e   : > { %5718 = shalt.err (!%p5715_p0)
}
  0x6f   : > { %s7760_s25 = smov 8   ;;  %s7761_s10 = smov 128  }
  0x70   : > { %5523 = dma.hbm_to_vmem [thread:$0]  (!%p6202_p9), %s6194_s18, 512, %s6196_s5, %s6208_s24, %s7761_s10, %s7761_s10, %s7760_s25  }
  0x71   : > { %s7762_s4 = sld [smem:[#allocation38_spill]]  ;;  %p7763_p8 = pneg %p6108_p6 }
  0x77   : > { %s5719_s21 = scalar_lea.hbm %s7762_s4, 18432 }
  0x78   : > { %p5720_p2 = scmp.ne.s32.totalorder %s7762_s4, %s5719_s21  ;;  %p5726_p7 = scmp.lt.u32.totalorder %s5719_s21, %s7762_s4 }
  0x7a   : > { %p5722_p11 = pnand %p5720_p2, %p7763_p8 }
  0x7c   : > { %p5723_p5 = pneg %p5722_p11 }
  0x7e   : > { %p5728_p13 = pnand %p5726_p7, %p5723_p5 }
  0x80   : > { %5731 = shalt.err (!%p5728_p13)
}
  0x81   : > { %s5732_s5 = scalar_lea.vmem %s6206_s28, 18432  ;;  %p7764_p1 = pmov %p7763_p8 }
  0x82   : > { %p5733_p9 = scmp.ne.s32.totalorder %s6206_s28, %s5732_s5  ;;  %p5740_p4 = scmp.lt.s32.totalorder %s6206_s28, %s6206_s28 }
  0x83   : > { %p5741_p12 = scmp.lt.s32.totalorder %s5732_s5, %s5732_s5 }
  0x84   : > { %p5735_p10 = pnand %p5733_p9, %p7764_p1 }
  0x85   : > { %p5742_p0 = por %p5741_p12, %p5740_p4 }
  0x86   : > { %p5736_p3 = pneg %p5735_p10 }
  0x88   : > { %p5743_p2 = pnand %p5742_p0, %p5736_p3 }
  0x8a   : > { %5746 = shalt.err (!%p5743_p2)
}
  0x8b   : > { %5516 = dma.hbm_to_vmem [thread:$0]  (!%p6108_p6), %s7762_s4, 18432, %s6206_s28, [#allocation13], %s7761_s10, %s7761_s10, %s7760_s25  }
  0x8c   : > { %s4113_s19 = sadd.s32 4294967294, %s5965_s14   ;;  %s48_s11 = sadd.s32 1, %s5945_s9 }
  0x8d   : > { %p55_p8 = scmp.ne.s32.totalorder %s5945_s9, %s5941_s8  ;;  %p7765_p11 = scmp.eq.s32.totalorder %s6157_s7, 0 }
  0x8e   : > { %p7766_p5 = scmp.eq.s32.totalorder %s5965_s14, 0  ;;  %p61_p13 = scmp.ne.s32.totalorder %s5941_s8, %s5937_s30 }
  0x8f   : > { %s6274_s23 = scalar_select %p7765_p11, %s5945_s9, %s48_s11  }
  0x90   : > { %p6278_p7 = por %p7766_p5, %p55_p8  ;;  %p7768_p9 = scmp.eq.s32.totalorder %s6094_s15, 3 }
  0x91   : > { %p249_p6 = scmp.eq.s32.totalorder %s4113_s19, 3  ;;  %p7770_p10 = scmp.eq.s32.totalorder %s6094_s15, 0 }
  0x92   : > { %p6286_p1 = por %p7768_p9, %p55_p8  ;;  %s301_s7 = sand.u32 1, %s5945_s9  }
  0x93   : > { %p6292_p3 = por %p7770_p10, %p61_p13  ;;  %p6297_p4 = por %p249_p6, %p61_p13 }
  0x94   : > { %s7769_s17 = scalar_select %p6286_p1, 1, 0 }
  0x95   : > { %s7772_s2 = scalar_select %p6297_p4, 1, 0 }
  0x96   : > { %s4124_s6 = sshll.u32 %s301_s7, 7  ;;  %s4164_s22 = sshll.u32 %s5957_s12, 4 }
  0x97   : > { %s312_s5 = sadd.s32 %s4164_s22, %s6186_s20  ;;  %s305_s26 = scalar_lea.vmem [#allocation6], %s4124_s6 }
  0x98   : > { %s4128_s18 = sshll.u32 %s312_s5, 7  ;;  %s315_s11 = sshll.u32 %s305_s26, 4  ;;  %s6308_s11 = int_to_ptr.vmem [resolvable:$true] %s315_s11 }
  0x99   : > { %s7773_s0 = sld [smem:[#allocation34_spill]]  ;;  %p7774_p12 = scmp.lt.s32.totalorder %s5965_s14, 4 }
  0x9a   : > { %s6318_s6 = scalar_lea.sflag [#allocation7], %s301_s7 }
  0x9b   : > { %p6314_p0 = pnand %p7774_p12, %p6278_p7 }
  0x9d   : > { %p5749_p8 = pneg %p6314_p0 }
  0x9f   : > { %s6306_s19 = scalar_lea.hbm %s7773_s0, %s4128_s18  ;;  %s5752_s21 = scalar_lea.hbm %s7773_s0, 8192 }
  0xa0   : > { %s5747_s22 = scalar_lea.hbm %s6306_s19, 2048  ;;  %p5753_p7 = scmp.lt.u32.totalorder %s6306_s19, %s7773_s0 }
  0xa1   : > { %p5748_p2 = scmp.ne.s32.totalorder %s6306_s19, %s5747_s22  ;;  %p5754_p13 = scmp.lt.u32.totalorder %s5752_s21, %s5747_s22 }
  0xa2   : > { %p5756_p6 = scmp.lt.u32.totalorder %s5747_s22, %s6306_s19 }
  0xa3   : > { %p5750_p11 = pnand %p5749_p8, %p5748_p2  ;;  %p5755_p9 = por %p5754_p13, %p5753_p7 }
  0xa5   : > { %p5751_p5 = pneg %p5750_p11  ;;  %p5757_p10 = por %p5756_p6, %p5755_p9 }
  0xa7   : > { %p5758_p12 = pnand %p5757_p10, %p5751_p5 }
  0xa9   : > { %5761 = shalt.err (!%p5758_p12)
}
  0xaa   : > { %s5762_s7 = scalar_lea.vmem %s6308_s11, 2048  ;;  %s5972_s26 = smov [#allocation6]  }
  0xab   : > { %p5763_p2 = scmp.ne.s32.totalorder %s6308_s11, %s5762_s7  ;;  %s5767_s1 = sshll.u32 %s5972_s26, 4  ;;  %s5768_s1 = int_to_ptr.vmem [resolvable:$false] %s5767_s1 }
  0xac   : > { %s5769_s4 = scalar_lea.vmem %s5768_s1, 4096  ;;  %p5770_p1 = scmp.lt.s32.totalorder %s6308_s11, %s5768_s1 }
  0xad   : > { %p5765_p11 = pnand %p5763_p2, %p5749_p8  ;;  %p5771_p7 = scmp.lt.s32.totalorder %s5769_s4, %s5762_s7 }
  0xaf   : > { %p5766_p4 = pneg %p5765_p11  ;;  %p5772_p13 = por %p5771_p7, %p5770_p1 }
  0xb1   : > { %p5773_p9 = pnand %p5772_p13, %p5766_p4 }
  0xb3   : > { %5776 = shalt.err (!%p5773_p9)
}
  0xb4   : > { %s7776_s22 = sld [smem:[#allocation23_spill]]  ;;  %s7777_s21 = sld [smem:[#allocation22_spill]] }
  0xb5   : > { %s7778_s5 = sld [smem:[#allocation21_spill]]  ;;  %s7779_s18 = sld [smem:[#allocation32_spill]] }
  0xb6   : > { %5520 = dma.hbm_to_vmem [thread:$0]  (!%p6314_p0), %s6306_s19, 2048, %s6308_s11, %s6318_s6, %s7761_s10, %s7761_s10, %s7760_s25  }
  0xb7   : > { %p7780_p1 = scmp.lt.s32.totalorder %s6168_s3, 7  ;;  %p7781_p4 = scmp.lt.s32.totalorder %s6178_s16, 7 }
  0xb8   : > { %p7782_p6 = scmp.eq.s32.totalorder %s5965_s14, 0  ;;  %p7784_p2 = scmp.eq.s32.totalorder %s6094_s15, 0 }
  0xb9   : > { %s7840_s3 = smov (!%p7780_p1, %s6168_s3), 7  ;;  %s7842_s16 = smov (!%p7781_p4, %s6178_s16), 7 }
  0xba   : > { %s120_s13 = sadd.s32 1, %s7776_s22  ;;  %p127_p8 = scmp.ne.s32.totalorder %s7776_s22, %s7777_s21 }
  0xbb   : > { %s116_s7 = ssub.s32 %s7840_s3, %s7842_s16  ;;  %p133_p5 = scmp.ne.s32.totalorder %s7777_s21, %s7778_s5 }
  0xbc   : > { %s117_s26 = sor.u32 %s116_s7, %s7779_s18  ;;  %p6363_p10 = por %p127_p8, %p7782_p6 }
  0xbd   : > { %p118_p12 = scmp.eq.s32.totalorder %s117_s26, 0  ;;  %p6369_p11 = por %p133_p5, %p7784_p2 }
  0xbe   : > { %s355_s19 = sand.u32 1, %s7776_s22   ;;  %s4166_s6 = sshll.u32 %s7840_s3, 2 }
  0xbf   : > { %s7785_s11 = scalar_select %p6369_p11, 1, 0 }
  0xc0   : > { %s7844_s22 = smov (!%p118_p12, %s7776_s22), %s120_s13  ;;  %s4136_s16 = sshll.u32 %s355_s19, 5 }
  0xc1   : > { %s368_s4 = sadd.s32 %s4166_s6, %s6186_s20  ;;  %s7786_s7 = sld [smem:[#allocation36_spill]] }
  0xc2   : > { %s4141_s21 = sshll.u32 %s368_s4, 7  ;;  %s357_s26 = scalar_lea.vmem [#allocation11], %s4136_s16 }
  0xc3   : > { %s371_s12 = sshll.u32 %s357_s26, 4  ;;  %p7787_p0 = scmp.lt.s32.totalorder %s5965_s14, 4  ;;  %s6383_s12 = int_to_ptr.vmem [resolvable:$true] %s371_s12 }
  0xc5   : > { %p6389_p7 = pnand %p7787_p0, %p6363_p10 }
  0xc7   : > { %s6381_s0 = scalar_lea.hbm %s7786_s7, %s4141_s21  ;;  %p5779_p9 = pneg %p6389_p7 }
  0xc8   : > { %s5777_s20 = scalar_lea.hbm %s6381_s0, 512  ;;  %s5782_s6 = scalar_lea.hbm %s7786_s7, 8192 }
  0xc9   : > { %p5778_p13 = scmp.ne.s32.totalorder %s6381_s0, %s5777_s20  ;;  %p5783_p8 = scmp.lt.u32.totalorder %s6381_s0, %s7786_s7 }
  0xca   : > { %p5784_p5 = scmp.lt.u32.totalorder %s5782_s6, %s5777_s20  ;;  %p5786_p10 = scmp.lt.u32.totalorder %s5777_s20, %s6381_s0 }
  0xcb   : > { %p5780_p1 = pnand %p5779_p9, %p5778_p13 }
  0xcc   : > { %p5785_p6 = por %p5784_p5, %p5783_p8 }
  0xcd   : > { %p5781_p4 = pneg %p5780_p1 }
  0xce   : > { %p5787_p12 = por %p5786_p10, %p5785_p6 }
  0xd0   : > { %p5788_p2 = pnand %p5787_p12, %p5781_p4 }
  0xd2   : > { %5791 = shalt.err (!%p5788_p2)
}
  0xd3   : > { %s5792_s4 = scalar_lea.vmem %s6383_s12, 512  ;;  %s5973_s21 = smov [#allocation11]  }
  0xd4   : > { %p5793_p0 = scmp.ne.s32.totalorder %s6383_s12, %s5792_s4  ;;  %s5797_s5 = sshll.u32 %s5973_s21, 4  ;;  %s5798_s5 = int_to_ptr.vmem [resolvable:$false] %s5797_s5 }
  0xd5   : > { %s5799_s18 = scalar_lea.vmem %s5798_s5, 1024  ;;  %p5800_p11 = scmp.lt.s32.totalorder %s6383_s12, %s5798_s5 }
  0xd6   : > { %p5795_p13 = pnand %p5793_p0, %p5779_p9  ;;  %p5801_p8 = scmp.lt.s32.totalorder %s5799_s18, %s5792_s4 }
  0xd8   : > { %p5796_p1 = pneg %p5795_p13  ;;  %p5802_p5 = por %p5801_p8, %p5800_p11 }
  0xda   : > { %p5803_p6 = pnand %p5802_p5, %p5796_p1 }
  0xdc   : > { %5806 = shalt.err (!%p5803_p6)
}
  0xdd   : > { %5526 = dma.hbm_to_vmem [thread:$0]  (!%p6389_p7), %s6381_s0, 512, %s6383_s12, %s6208_s24, %s7761_s10, %s7761_s10, %s7760_s25  }
  0xde   : > { %s7789_s26 = sld [smem:[#allocation29_spill]] }
  0xe4   : > { %p7790_p9 = scmp.ne.s32.totalorder %s7789_s26, 0 }
  0xe5   : > { %s6425_s20 = sand.u32 (!%p7790_p9), 1, %s5941_s8  }
  0xe6   : > { %383 = sbr.rel (%p7790_p9) target bundleno = 1266 (0x4f2), region = 48  ;;  %s4143_s13 = sshll.u32 (!%p7790_p9), %s6425_s20, 7 }
  0xe7   : > { %s386_s19 = scalar_lea.sflag (!%p7790_p9), [#allocation7], %s6425_s20  ;;  %s6431_s3 = scalar_lea.vmem (!%p7790_p9), [#allocation6], %s4143_s13 }
  0xed   : > { %5892 = dma.done.wait (%p6292_p3), %s386_s19, 2048  }
  0xee   : > { %5894 = vsyncadd (%p6292_p3), %s386_s19, 4294965248  ;;  %s7791_s0 = sld [smem:[#allocation24_spill]]  ;;  %s7792_s12 = sld [smem:[#allocation33_spill]] }
  0xef   : > { %s394_s24 = sand.u32 1, %s6094_s15  }
  0xf0   : > { %s395_s6 = scalar_lea.sflag [#allocation10], %s394_s24 }
  0xf4   : > { %s396_s25 = sand.u32 1, %s7791_s0   ;;  %p7793_p11 = scmp.ne.s32.totalorder %s7792_s12, 0 }
  0xf5   : > { %s4144_s10 = sshll.u32 %s396_s25, 5 }
  0xf6   : > { %s6439_s1 = scalar_lea.vmem [#allocation9], %s4144_s10 }
  0xf7   : > { %5896 = dma.done.wait (%p7793_p11), %s395_s6, 512  }
  0xf8   : > { %5898 = vsyncadd (%p7793_p11), %s395_s6, 4294966784  ;;  %s7794_s16 = sld [smem:[#allocation22_spill]]  ;;  %p7795_p3 = scmp.ne.s32.totalorder %s7785_s11, 0 }
  0xfe   : > { %s405_s4 = sand.u32 1, %s7794_s16  }
  0xff   : > { %s4145_s21 = sshll.u32 %s405_s4, 5 }
 0x100   : > { %s6446_s28 = scalar_lea.vmem [#allocation11], %s4145_s21 }
 0x101   : > { %5900 = dma.done.wait (%p7795_p3), %s395_s6, 512  }
 0x102   : > { %5902 = vsyncadd (%p7795_p3), %s395_s6, 4294966784  ;;  %p7796_p7 = scmp.eq.s32.totalorder %s6094_s15, 0 }
 0x104   : > { %5904 = dma.done.wait (%p7796_p7), [#allocation13], 36864   ;;  %p7797_p4 = pmov %p7796_p7 }
 0x105   : > { %v5974_v0 = vmov 0.0   ;;  %v6481_v1 = vld [vmem:[%s6431_s3] sm:$0xff]  ;;  %v6484_v2 = vld [vmem:[%s6431_s3 + $0x8] sm:$0xff]  ;;  %vm524_vm0 = vcmask 1040384   ;;  %v6487_v3 = vld [vmem:[%s6431_s3 + $0x10] sm:$0xff]  ;;  %vm598_vm1 = vcmask 1046528  }
 0x106   : > { %5906 = vsyncadd (%p7797_p4), [#allocation13], 4294930432  ;;  %468 = vst [vmem:[#allocation2] sm:$0x1] %v5974_v0  ;;  %v525_v4 = vrot.slane %v6481_v1, 7  ;;  %v526_v5 = vrot.slane %v6484_v2, 7 }
 0x107   : > { %469 = vst [vmem:[#allocation2 + $0x30] sm:$0x1] %v5974_v0  ;;  %470 = vst [vmem:[#allocation2 + $0x60] sm:$0x1] %v5974_v0  ;;  %v528_v6 = vrot.slane %v6487_v3, 7  ;;  %v6496_v7 = vld [vmem:[%s6431_s3 + $0x18] sm:$0xff] }
 0x108   : > { %471 = vst [vmem:[#allocation2 + $0x90] sm:$0x1] %v5974_v0  ;;  %472 = vst [vmem:[#allocation2 + $0xc0] sm:$0x1] %v5974_v0  ;;  %v6499_v8 = vld [vmem:[%s6431_s3 + $0x20] sm:$0xff]  ;;  %v6502_v9 = vld [vmem:[%s6431_s3 + $0x28] sm:$0xff]  ;;  %v527_v16 = vsel %vm524_vm0, %v525_v4, %v526_v5 }
 0x109   : > { %473 = vst [vmem:[#allocation2 + $0xf0] sm:$0x1] %v5974_v0  ;;  %474 = vst [vmem:[#allocation2 + $0x120] sm:$0x1] %v5974_v0  ;;  %v529_v10 = vrot.slane %v6496_v7, 7  ;;  %v531_v11 = vrot.slane %v6499_v8, 7 }
 0x10a   : > { %475 = vst [vmem:[#allocation2 + $0x150] sm:$0x1] %v5974_v0  ;;  %476 = vst [vmem:[#allocation2 + $0x180] sm:$0x1] %v5974_v0  ;;  %v532_v12 = vrot.slane %v6502_v9, 7  ;;  %v6511_v13 = vld [vmem:[%s6431_s3 + $0x30] sm:$0xff] }
 0x10b   : > { %477 = vst [vmem:[#allocation2 + $0x1b0] sm:$0x1] %v5974_v0  ;;  %478 = vst [vmem:[#allocation2 + $0x1e0] sm:$0x1] %v5974_v0  ;;  %v6514_v14 = vld [vmem:[%s6431_s3 + $0x38] sm:$0xff]  ;;  %v6517_v15 = vld [vmem:[%s6431_s3 + $0x40] sm:$0xff]  ;;  %v530_v23 = vsel %vm524_vm0, %v528_v6, %v529_v10 }
 0x10c   : > { %479 = vst [vmem:[#allocation2 + $0x210] sm:$0x1] %v5974_v0  ;;  %480 = vst [vmem:[#allocation2 + $0x2f] sm:$0x1] %v5974_v0  ;;  %v534_v17 = vrot.slane %v6511_v13, 7  ;;  %v535_v18 = vrot.slane %v6514_v14, 7  ;;  %v533_v24 = vsel %vm524_vm0, %v531_v11, %v532_v12 }
 0x10d   : > { %481 = vst [vmem:[#allocation2 + $0x5f] sm:$0x1] %v5974_v0  ;;  %482 = vst [vmem:[#allocation2 + $0x8f] sm:$0x1] %v5974_v0  ;;  %v537_v19 = vrot.slane %v6517_v15, 7  ;;  %v6527_v20 = vld [vmem:[%s6431_s3 + $0x48] sm:$0xff] }
 0x10e   : > { %483 = vst [vmem:[#allocation2 + $0xbf] sm:$0x1] %v5974_v0  ;;  %484 = vst [vmem:[#allocation2 + $0xef] sm:$0x1] %v5974_v0  ;;  %v6530_v21 = vld [vmem:[%s6431_s3 + $0x50] sm:$0xff]  ;;  %v6533_v22 = vld [vmem:[%s6431_s3 + $0x58] sm:$0xff]  ;;  %v536_v30 = vsel %vm524_vm0, %v534_v17, %v535_v18 }
 0x10f   : > { %485 = vst [vmem:[#allocation2 + $0x11f] sm:$0x1] %v5974_v0  ;;  %486 = vst [vmem:[#allocation2 + $0x14f] sm:$0x1] %v5974_v0  ;;  %v538_v25 = vrot.slane %v6527_v20, 7  ;;  %v540_v26 = vrot.slane %v6530_v21, 7 }
 0x110   : > { %487 = vst [vmem:[#allocation2 + $0x17f] sm:$0x1] %v5974_v0  ;;  %488 = vst [vmem:[#allocation2 + $0x1af] sm:$0x1] %v5974_v0  ;;  %v6543_v27 = vld [vmem:[%s6431_s3 + $0x60] sm:$0xff]  ;;  %v6546_v28 = vld [vmem:[%s6431_s3 + $0x68] sm:$0xff] }
 0x111   : > { %489 = vst [vmem:[#allocation2 + $0x1df] sm:$0x1] %v5974_v0  ;;  %490 = vst [vmem:[#allocation2 + $0x20f] sm:$0x1] %v5974_v0  ;;  %v6549_v29 = vld [vmem:[%s6431_s3 + $0x70] sm:$0xff]  ;;  %v541_v31 = vrot.slane %v6533_v22, 7  ;;  %v539_v35 = vsel %vm524_vm0, %v537_v19, %v538_v25 }
 0x112   : > { %491 = vst [vmem:[#allocation2 + $0x23f] sm:$0x1] %v5974_v0  ;;  %582 = vst [vmem:[#allocation2 + $0x68] sm:$0xff] %v6481_v1  ;;  %v543_v32 = vrot.slane %v6543_v27, 7  ;;  %v544_v33 = vrot.slane %v6546_v28, 7  ;;  %v507_v34 = vld [vmem:[%s6431_s3 + $0x78] sm:$0xff] }
 0x113   : > { %583 = vst [vmem:[#allocation2 + $0x80] sm:$0xff] %v6484_v2  ;;  %584 = vst [vmem:[#allocation2 + $0x98] sm:$0xff] %v6487_v3  ;;  %v546_v36 = vrot.slane %v6549_v29, 7  ;;  %v547_v37 = vrot.slane %v507_v34, 7  ;;  %v599_v38 = vrot.slane %v6481_v1, 1  ;;  %v542_v39 = vsel %vm524_vm0, %v540_v26, %v541_v31  ;;  %s6589_s15 = scalar_lea.vmem [#allocation15], %s4143_s13 }
 0x114   : > { %585 = vst [vmem:[#allocation2 + $0xb0] sm:$0xff] %v6496_v7  ;;  %586 = vst [vmem:[#allocation2 + $0xc8] sm:$0xff] %v6499_v8  ;;  %v545_v40 = vsel %vm524_vm0, %v543_v32, %v544_v33  ;;  %v600_v41 = vrot.slane %v6484_v2, 1  ;;  %v602_v42 = vrot.slane %v6487_v3, 1  ;;  %v603_v44 = vrot.slane %v6496_v7, 1  ;;  %s7798_s11 = sld [smem:[#allocation25_spill]] }
 0x115   : > { %587 = vst [vmem:[#allocation2 + $0xe0] sm:$0xff] %v6502_v9  ;;  %566 = vst [vmem:[#allocation2 + $0x60] sm:$0xfe] %v525_v4  ;;  %v548_v43 = vsel %vm524_vm0, %v546_v36, %v547_v37  ;;  %v605_v45 = vrot.slane %v6499_v8, 1  ;;  %v606_v46 = vrot.slane %v6502_v9, 1  ;;  %v608_v48 = vrot.slane %v6511_v13, 1 }
 0x116   : > { %568 = vst [vmem:[#allocation2 + $0x90] sm:$0xfe] %v528_v6  ;;  %588 = vst [vmem:[#allocation2 + $0xf8] sm:$0xff] %v6511_v13  ;;  %v601_v47 = vsel %vm598_vm1, %v599_v38, %v600_v41  ;;  %v609_v49 = vrot.slane %v6514_v14, 1  ;;  %v611_v50 = vrot.slane %v6517_v15, 1  ;;  %v604_v51 = vsel %vm598_vm1, %v602_v42, %v603_v44 }
 0x117   : > { %589 = vst [vmem:[#allocation2 + $0x110] sm:$0xff] %v6514_v14  ;;  %590 = vst [vmem:[#allocation2 + $0x128] sm:$0xff] %v6517_v15  ;;  %v607_v52 = vsel %vm598_vm1, %v605_v45, %v606_v46  ;;  %v612_v53 = vrot.slane %v6527_v20, 1  ;;  %v614_v54 = vrot.slane %v6530_v21, 1  ;;  %v615_v56 = vrot.slane %v6533_v22, 1 }
 0x118   : > { %567 = vst [vmem:[#allocation2 + $0x78] sm:$0xff] %v527_v16  ;;  %570 = vst [vmem:[#allocation2 + $0xc0] sm:$0xfe] %v531_v11  ;;  %v610_v55 = vsel %vm598_vm1, %v608_v48, %v609_v49  ;;  %v617_v57 = vrot.slane %v6543_v27, 1  ;;  %v618_v58 = vrot.slane %v6546_v28, 1  ;;  %v620_v60 = vrot.slane %v6549_v29, 1 }
 0x119   : > { %591 = vst [vmem:[#allocation2 + $0x140] sm:$0xff] %v6527_v20  ;;  %592 = vst [vmem:[#allocation2 + $0x158] sm:$0xff] %v6530_v21  ;;  %v613_v59 = vsel %vm598_vm1, %v611_v50, %v612_v53  ;;  %v621_v61 = vrot.slane %v507_v34, 1  ;;  %v616_v62 = vsel %vm598_vm1, %v614_v54, %v615_v56 }
 0x11a   : > { %593 = vst [vmem:[#allocation2 + $0x170] sm:$0xff] %v6533_v22  ;;  %569 = vst [vmem:[#allocation2 + $0xa8] sm:$0xff] %v530_v23  ;;  %v619_v63 = vsel %vm598_vm1, %v617_v57, %v618_v58  ;;  %p4149_p10 = scmp.le.s32.totalorder %s7798_s11, 0 }
 0x11b   : > { %571 = vst [vmem:[#allocation2 + $0xd8] sm:$0xff] %v533_v24  ;;  %572 = vst [vmem:[#allocation2 + $0xf0] sm:$0xfe] %v534_v17  ;;  %v622_v1 = vsel %vm598_vm1, %v620_v60, %v621_v61  ;;  %v659_v2 = vld [vmem:[%s6439_s1] sm:$0xff] (!%p4149_p10)  ;;  %v660_v3 = vld [vmem:[%s6439_s1 + $0x8] sm:$0xff] (!%p4149_p10) }
 0x11c   : > { %574 = vst [vmem:[#allocation2 + $0x120] sm:$0xfe] %v537_v19  ;;  %594 = vst [vmem:[#allocation2 + $0x188] sm:$0xff] %v6543_v27  ;;  %v661_v4 = vld [vmem:[%s6439_s1 + $0x10] sm:$0xff] (!%p4149_p10)  ;;  %v667_v5 = vrot.slane (!%p4149_p10), %v659_v2, 7  ;;  %v668_v6 = vrot.slane (!%p4149_p10), %v660_v3, 7 }
 0x11d   : > { %595 = vst [vmem:[#allocation2 + $0x1a0] sm:$0xff] %v6546_v28  ;;  %596 = vst [vmem:[#allocation2 + $0x1b8] sm:$0xff] %v6549_v29  ;;  %v670_v7 = vrot.slane (!%p4149_p10), %v661_v4, 7  ;;  %v662_v8 = vld [vmem:[%s6439_s1 + $0x18] sm:$0xff] (!%p4149_p10)  ;;  %v685_v9 = vrot.slane (!%p4149_p10), %v659_v2, 1  ;;  %v686_v11 = vrot.slane (!%p4149_p10), %v660_v3, 1 }
 0x11e   : > { %573 = vst [vmem:[#allocation2 + $0x108] sm:$0xff] %v536_v30  ;;  %576 = vst [vmem:[#allocation2 + $0x150] sm:$0xfe] %v540_v26  ;;  %v671_v10 = vrot.slane (!%p4149_p10), %v662_v8, 7  ;;  %v688_v12 = vrot.slane (!%p4149_p10), %v661_v4, 1  ;;  %v689_v13 = vrot.slane (!%p4149_p10), %v662_v8, 1  ;;  %v669_v14 = vsel (!%p4149_p10), %vm524_vm0, %v667_v5, %v668_v6 }
 0x11f   : > { %597 = vst [vmem:[#allocation2 + $0x1d0] sm:$0xff] %v507_v34  ;;  %575 = vst [vmem:[#allocation2 + $0x138] sm:$0xff] %v539_v35  ;;  %v687_v16 = vsel (!%p4149_p10), %vm598_vm1, %v685_v9, %v686_v11 }
 0x120   : > { %578 = vst [vmem:[#allocation2 + $0x180] sm:$0xfe] %v543_v32  ;;  %577 = vst [vmem:[#allocation2 + $0x168] sm:$0xff] %v542_v39  ;;  %v672_v15 = vsel (!%p4149_p10), %vm524_vm0, %v670_v7, %v671_v10  ;;  %v690_v17 = vsel (!%p4149_p10), %vm598_vm1, %v688_v12, %v689_v13 }
 0x121   : > { %579 = vst [vmem:[#allocation2 + $0x198] sm:$0xff] %v545_v40  ;;  %580 = vst [vmem:[#allocation2 + $0x1b0] sm:$0xfe] %v546_v36 }
 0x122   : > { %581 = vst [vmem:[#allocation2 + $0x1c8] sm:$0xff] %v548_v43  ;;  %640 = vst [vmem:[#allocation2 + $0x88] sm:$0x7f] %v600_v41 }
 0x123   : > { %639 = vst [vmem:[#allocation2 + $0x70] sm:$0xff] %v601_v47  ;;  %642 = vst [vmem:[#allocation2 + $0xb8] sm:$0x7f] %v603_v44 }
 0x124   : > { %644 = vst [vmem:[#allocation2 + $0xe8] sm:$0x7f] %v606_v46  ;;  %641 = vst [vmem:[#allocation2 + $0xa0] sm:$0xff] %v604_v51  ;;  %658 = sbr.rel (%p4149_p10) target bundleno = 305 (0x131), region = 72 }
 0x125   : > { %643 = vst [vmem:[#allocation2 + $0xd0] sm:$0xff] %v607_v52  ;;  %646 = vst [vmem:[#allocation2 + $0x118] sm:$0x7f] %v609_v49 }
 0x126   : > { %645 = vst [vmem:[#allocation2 + $0x100] sm:$0xff] %v610_v55  ;;  %648 = vst [vmem:[#allocation2 + $0x148] sm:$0x7f] %v612_v53 }
 0x127   : > { %647 = vst [vmem:[#allocation2 + $0x130] sm:$0xff] %v613_v59  ;;  %650 = vst [vmem:[#allocation2 + $0x178] sm:$0x7f] %v615_v56 }
 0x128   : > { %652 = vst [vmem:[#allocation2 + $0x1a8] sm:$0x7f] %v618_v58  ;;  %649 = vst [vmem:[#allocation2 + $0x160] sm:$0xff] %v616_v62 }
 0x129   : > { %651 = vst [vmem:[#allocation2 + $0x190] sm:$0xff] %v619_v63  ;;  %654 = vst [vmem:[#allocation2 + $0x1d8] sm:$0x7f] %v621_v61 }
 0x12a   : > { %653 = vst [vmem:[#allocation2 + $0x1c0] sm:$0xff] %v622_v1  ;;  %681 = vst [vmem:[#allocation2 + $0x8] sm:$0xff] (!%p4149_p10), %v659_v2 }
 0x12b   : > { %682 = vst [vmem:[#allocation2 + $0x20] sm:$0xff] %v660_v3  ;;  %683 = vst [vmem:[#allocation2 + $0x38] sm:$0xff] %v661_v4 }
 0x12c   : > { %684 = vst [vmem:[#allocation2 + $0x50] sm:$0xff] %v662_v8  ;;  %677 = vst [vmem:[#allocation2] sm:$0xfe] %v667_v5 }
 0x12d   : > { %679 = vst [vmem:[#allocation2 + $0x30] sm:$0xfe] %v670_v7  ;;  %678 = vst [vmem:[#allocation2 + $0x18] sm:$0xff] %v669_v14 }
 0x12e   : > { %696 = vst [vmem:[#allocation2 + $0x28] sm:$0x7f] %v686_v11  ;;  %698 = vst [vmem:[#allocation2 + $0x58] sm:$0x7f] %v689_v13 }
 0x12f   : > { %680 = vst [vmem:[#allocation2 + $0x48] sm:$0xff] %v672_v15  ;;  %695 = vst [vmem:[#allocation2 + $0x10] sm:$0xff] %v687_v16 }
 0x130   : > { %697 = vst [vmem:[#allocation2 + $0x40] sm:$0xff] %v690_v17 }
 0x131 PF: > { %s7799_s5 = sld [smem:[#allocation25_spill]] }
 0x137   : > { %p4150_p12 = scmp.ne.s32.totalorder %s7799_s5, 0 }
 0x138   : > { %v5975_v18 = vmov (!%p4150_p12), 0.0  }
 0x139   : > { %702 = sbr.rel (%p4150_p12) target bundleno = 320 (0x140), region = 76  ;;  %703 = vst [vmem:[#allocation2] sm:$0xff] (!%p4150_p12), %v5975_v18  ;;  %704 = vst [vmem:[#allocation2 + $0x8] sm:$0xff] (!%p4150_p12), %v5975_v18 }
 0x13a   : > { %705 = vst [vmem:[#allocation2 + $0x10] sm:$0xff] (!%p4150_p12), %v5975_v18  ;;  %706 = vst [vmem:[#allocation2 + $0x18] sm:$0xff] (!%p4150_p12), %v5975_v18 }
 0x13b   : > { %707 = vst [vmem:[#allocation2 + $0x20] sm:$0xff] (!%p4150_p12), %v5975_v18  ;;  %708 = vst [vmem:[#allocation2 + $0x28] sm:$0xff] (!%p4150_p12), %v5975_v18 }
 0x13c   : > { %709 = vst [vmem:[#allocation2 + $0x30] sm:$0xff] (!%p4150_p12), %v5975_v18  ;;  %710 = vst [vmem:[#allocation2 + $0x38] sm:$0xff] (!%p4150_p12), %v5975_v18 }
 0x13d   : > { %711 = vst [vmem:[#allocation2 + $0x40] sm:$0xff] (!%p4150_p12), %v5975_v18  ;;  %712 = vst [vmem:[#allocation2 + $0x48] sm:$0xff] (!%p4150_p12), %v5975_v18 }
 0x13e   : > { %713 = vst [vmem:[#allocation2 + $0x50] sm:$0xff] (!%p4150_p12), %v5975_v18  ;;  %714 = vst [vmem:[#allocation2 + $0x58] sm:$0xff] (!%p4150_p12), %v5975_v18 }
 0x140 PF: > { %s7800_s18 = sld [smem:[#allocation25_spill]] }
 0x146   : > { %p4151_p2 = scmp.ge.s32.totalorder %s7800_s18, 1 }
 0x147   : > { %v719_v19 = vld [vmem:[%s6446_s28] sm:$0xff] (!%p4151_p2)  ;;  %v720_v20 = vld [vmem:[%s6446_s28 + $0x8] sm:$0xff] (!%p4151_p2)  ;;  %v721_v21 = vld [vmem:[%s6446_s28 + $0x10] sm:$0xff] (!%p4151_p2) }
 0x148   : > { %718 = sbr.rel (%p4151_p2) target bundleno = 335 (0x14f), region = 80  ;;  %v727_v22 = vrot.slane (!%p4151_p2), %v719_v19, 7  ;;  %742 = vst [vmem:[#allocation2 + $0x1e8] sm:$0xff] (!%p4151_p2), %v719_v19  ;;  %v728_v23 = vrot.slane (!%p4151_p2), %v720_v20, 7  ;;  %743 = vst [vmem:[#allocation2 + $0x200] sm:$0xff] (!%p4151_p2), %v720_v20  ;;  %v730_v24 = vrot.slane (!%p4151_p2), %v721_v21, 7 }
 0x149   : > { %744 = vst [vmem:[#allocation2 + $0x218] sm:$0xff] (!%p4151_p2), %v721_v21  ;;  %v722_v25 = vld [vmem:[%s6446_s28 + $0x18] sm:$0xff] (!%p4151_p2)  ;;  %v746_v26 = vrot.slane (!%p4151_p2), %v719_v19, 1  ;;  %v747_v28 = vrot.slane (!%p4151_p2), %v720_v20, 1  ;;  %v749_v29 = vrot.slane (!%p4151_p2), %v721_v21, 1 }
 0x14a   : > { %v731_v27 = vrot.slane (!%p4151_p2), %v722_v25, 7  ;;  %745 = vst [vmem:[#allocation2 + $0x230] sm:$0xff] (!%p4151_p2), %v722_v25  ;;  %v750_v30 = vrot.slane (!%p4151_p2), %v722_v25, 1  ;;  %738 = vst [vmem:[#allocation2 + $0x1e0] sm:$0xfe] (!%p4151_p2), %v727_v22  ;;  %v729_v31 = vsel (!%p4151_p2), %vm524_vm0, %v727_v22, %v728_v23 }
 0x14b   : > { %740 = vst [vmem:[#allocation2 + $0x210] sm:$0xfe] (!%p4151_p2), %v730_v24  ;;  %739 = vst [vmem:[#allocation2 + $0x1f8] sm:$0xff] (!%p4151_p2), %v729_v31  ;;  %v748_v33 = vsel (!%p4151_p2), %vm598_vm1, %v746_v26, %v747_v28 }
 0x14c   : > { %v732_v32 = vsel (!%p4151_p2), %vm524_vm0, %v730_v24, %v731_v27  ;;  %757 = vst [vmem:[#allocation2 + $0x208] sm:$0x7f] (!%p4151_p2), %v747_v28  ;;  %v751_v34 = vsel (!%p4151_p2), %vm598_vm1, %v749_v29, %v750_v30  ;;  %759 = vst [vmem:[#allocation2 + $0x238] sm:$0x7f] (!%p4151_p2), %v750_v30 }
 0x14d   : > { %741 = vst [vmem:[#allocation2 + $0x228] sm:$0xff] (!%p4151_p2), %v732_v32  ;;  %756 = vst [vmem:[#allocation2 + $0x1f0] sm:$0xff] (!%p4151_p2), %v748_v33 }
 0x14e   : > { %758 = vst [vmem:[#allocation2 + $0x220] sm:$0xff] (!%p4151_p2), %v751_v34 }
 0x14f PF: > { %s7801_s26 = sld [smem:[#allocation25_spill]] }
 0x155   : > { %p4152_p0 = scmp.ne.s32.totalorder %s7801_s26, 1 }
 0x156   : > { %v5976_v35 = vmov (!%p4152_p0), 0.0  }
 0x157   : > { %763 = sbr.rel (%p4152_p0) target bundleno = 350 (0x15e), region = 84  ;;  %765 = vst [vmem:[#allocation2 + $0x1e0] sm:$0xff] (!%p4152_p0), %v5976_v35  ;;  %766 = vst [vmem:[#allocation2 + $0x1e8] sm:$0xff] (!%p4152_p0), %v5976_v35 }
 0x158   : > { %767 = vst [vmem:[#allocation2 + $0x1f0] sm:$0xff] (!%p4152_p0), %v5976_v35  ;;  %768 = vst [vmem:[#allocation2 + $0x1f8] sm:$0xff] (!%p4152_p0), %v5976_v35 }
 0x159   : > { %769 = vst [vmem:[#allocation2 + $0x200] sm:$0xff] (!%p4152_p0), %v5976_v35  ;;  %770 = vst [vmem:[#allocation2 + $0x208] sm:$0xff] (!%p4152_p0), %v5976_v35 }
 0x15a   : > { %771 = vst [vmem:[#allocation2 + $0x210] sm:$0xff] (!%p4152_p0), %v5976_v35  ;;  %772 = vst [vmem:[#allocation2 + $0x218] sm:$0xff] (!%p4152_p0), %v5976_v35 }
 0x15b   : > { %773 = vst [vmem:[#allocation2 + $0x220] sm:$0xff] (!%p4152_p0), %v5976_v35  ;;  %774 = vst [vmem:[#allocation2 + $0x228] sm:$0xff] (!%p4152_p0), %v5976_v35 }
 0x15c   : > { %775 = vst [vmem:[#allocation2 + $0x230] sm:$0xff] (!%p4152_p0), %v5976_v35  ;;  %776 = vst [vmem:[#allocation2 + $0x238] sm:$0xff] (!%p4152_p0), %v5976_v35 }
 0x15e PF: > { %v884_v36 = vld [vmem:[#allocation12] sm:$0xff]  ;;  %v885_v37 = vld [vmem:[#allocation12 + $0x8] sm:$0xff]  ;;  %2341 = vst [vmem:[#allocation3] sm:$0x1] %v5974_v0  ;;  %2342 = vst [vmem:[#allocation3 + $0x30] sm:$0x1] %v5974_v0 }
 0x15f   : > { %v916_v38 = vld [vmem:[#allocation12 + $0x100] sm:$0xff]  ;;  %2343 = vst [vmem:[#allocation3 + $0x60] sm:$0x1] %v5974_v0  ;;  %2344 = vst [vmem:[#allocation3 + $0x90] sm:$0x1] %v5974_v0  ;;  %v5977_v39 = vmov 0.0|0.0   ;;  %v4967_v40 = vpack.c.bf16 %v885_v37, %v884_v36 }
 0x160   : > { %2345 = vst [vmem:[#allocation3 + $0xc0] sm:$0x1] %v5974_v0  ;;  %2346 = vst [vmem:[#allocation3 + $0xf0] sm:$0x1] %v5974_v0  ;;  %4966 = vmatprep.subr.bf16.mxu0 %v5977_v39  ;;  %v917_v41 = vld [vmem:[#allocation12 + $0x108] sm:$0xff]  ;;  %v886_v42 = vld [vmem:[#allocation12 + $0x10] sm:$0xff] }
 0x161   : > { %2347 = vst [vmem:[#allocation3 + $0x120] sm:$0x1] %v5974_v0  ;;  %2348 = vst [vmem:[#allocation3 + $0x150] sm:$0x1] %v5974_v0  ;;  %v887_v43 = vld [vmem:[#allocation12 + $0x18] sm:$0xff]  ;;  %v5014_v44 = vpack.c.bf16 %v917_v41, %v916_v38  ;;  %v918_v45 = vld [vmem:[#allocation12 + $0x110] sm:$0xff]  ;;  %4968 = vmatpush1.bf16.msra.mxu0 %v4967_v40 }
 0x162   : > { %2349 = vst [vmem:[#allocation3 + $0x180] sm:$0x1] %v5974_v0  ;;  %2350 = vst [vmem:[#allocation3 + $0x1b0] sm:$0x1] %v5974_v0  ;;  %v919_v46 = vld [vmem:[#allocation12 + $0x118] sm:$0xff]  ;;  %v4970_v47 = vpack.c.bf16 %v887_v43, %v886_v42  ;;  %v920_v49 = vld [vmem:[#allocation12 + $0x120] sm:$0xff]  ;;  %4969 = vmatprep.subr.bf16.mxu0 %v5977_v39 }
 0x163   : > { %2351 = vst [vmem:[#allocation3 + $0x2f] sm:$0x1] %v5974_v0  ;;  %2352 = vst [vmem:[#allocation3 + $0x5f] sm:$0x1] %v5974_v0  ;;  %v5018_v48 = vpack.c.bf16 %v919_v46, %v918_v45  ;;  %v921_v50 = vld [vmem:[#allocation12 + $0x128] sm:$0xff]  ;;  %5015 = vmatprep.subr.bf16.mxu1 %v5014_v44  ;;  %v888_v51 = vld [vmem:[#allocation12 + $0x20] sm:$0xff] }
 0x164   : > { %2353 = vst [vmem:[#allocation3 + $0x8f] sm:$0x1] %v5974_v0  ;;  %2354 = vst [vmem:[#allocation3 + $0xbf] sm:$0x1] %v5974_v0  ;;  %5017 = vmatpush3.bf16.msra.mxu1 %v5014_v44  ;;  %v5022_v52 = vpack.c.bf16 %v921_v50, %v920_v49  ;;  %v922_v54 = vld [vmem:[#allocation12 + $0x130] sm:$0xff]  ;;  %v923_v55 = vld [vmem:[#allocation12 + $0x138] sm:$0xff] }
 0x165   : > { %2355 = vst [vmem:[#allocation3 + $0xef] sm:$0x1] %v5974_v0  ;;  %2356 = vst [vmem:[#allocation3 + $0x11f] sm:$0x1] %v5974_v0  ;;  %5019 = vmatprep.subr.bf16.mxu1 %v5018_v48  ;;  %4971 = vmatpush1.bf16.msra.mxu0 %v4970_v47  ;;  %v890_v56 = vld [vmem:[#allocation12 + $0x30] sm:$0xff]  ;;  %v891_v57 = vld [vmem:[#allocation12 + $0x38] sm:$0xff]  ;;  %v5026_v58 = vpack.c.bf16 %v923_v55, %v922_v54 }
 0x166   : > { %2357 = vst [vmem:[#allocation3 + $0x14f] sm:$0x1] %v5974_v0  ;;  %2358 = vst [vmem:[#allocation3 + $0x17f] sm:$0x1] %v5974_v0  ;;  %4972 = vmatprep.subr.bf16.mxu0 %v5977_v39  ;;  %v806_v59 = vld [vmem:[#allocation2 + $0x10] sm:$0xff]  ;;  %v4976_v60 = vpack.c.bf16 %v891_v57, %v890_v56  ;;  %v924_v61 = vld [vmem:[#allocation12 + $0x140] sm:$0xff] }
 0x167   : > { %2359 = vst [vmem:[#allocation3 + $0x1af] sm:$0x1] %v5974_v0  ;;  %2360 = vst [vmem:[#allocation3 + $0x1df] sm:$0x1] %v5974_v0  ;;  %v889_v0 = vld [vmem:[#allocation12 + $0x28] sm:$0xff]  ;;  %4644 = vmatprep.mubr.f32.mxu1 %v806_v59  ;;  %v892_v63 = vld [vmem:[#allocation12 + $0x40] sm:$0xff] }
 0x168   : > { %v4973_v53 = vpack.c.bf16 %v889_v0, %v888_v51  ;;  %5021 = vmatpush3.bf16.msra.mxu1 %v5018_v48  ;;  %v925_v62 = vld [vmem:[#allocation12 + $0x148] sm:$0xff]  ;;  %v926_v4 = vld [vmem:[#allocation12 + $0x150] sm:$0xff]  ;;  %v927_v5 = vld [vmem:[#allocation12 + $0x158] sm:$0xff]  ;;  %s7802_s3 = sld [smem:[#allocation39_spill]] }
 0x169   : > { %5023 = vmatprep.subr.bf16.mxu1 %v5022_v52  ;;  %v893_v1 = vld [vmem:[#allocation12 + $0x48] sm:$0xff]  ;;  %v5030_v2 = vpack.c.bf16 %v925_v62, %v924_v61  ;;  %v894_v6 = vld [vmem:[#allocation12 + $0x50] sm:$0xff]  ;;  %v895_v7 = vld [vmem:[#allocation12 + $0x58] sm:$0xff]  ;;  %v5034_v8 = vpack.c.bf16 %v927_v5, %v926_v4 }
 0x16a   : > { %4974 = vmatpush1.bf16.msra.mxu0 %v4973_v53  ;;  %v4979_v3 = vpack.c.bf16 %v893_v1, %v892_v63  ;;  %v4982_v9 = vpack.c.bf16 %v895_v7, %v894_v6  ;;  %v928_v10 = vld [vmem:[#allocation12 + $0x160] sm:$0xff]  ;;  %v929_v11 = vld [vmem:[#allocation12 + $0x168] sm:$0xff]  ;;  %v930_v17 = vld [vmem:[#allocation12 + $0x170] sm:$0xff] }
 0x16b   : > { %4975 = vmatprep.subr.bf16.mxu0 %v5977_v39  ;;  %v896_v12 = vld [vmem:[#allocation12 + $0x60] sm:$0xff]  ;;  %v897_v13 = vld [vmem:[#allocation12 + $0x68] sm:$0xff]  ;;  %v5038_v14 = vpack.c.bf16 %v929_v11, %v928_v10  ;;  %v931_v18 = vld [vmem:[#allocation12 + $0x178] sm:$0xff] }
 0x16c   : > { %5025 = vmatpush3.bf16.msra.mxu1 %v5022_v52  ;;  %v805_v15 = vld [vmem:[#allocation2 + $0x8] sm:$0xff]  ;;  %v4985_v16 = vpack.c.bf16 %v897_v13, %v896_v12  ;;  %v898_v19 = vld [vmem:[#allocation12 + $0x70] sm:$0xff]  ;;  %v899_v20 = vld [vmem:[#allocation12 + $0x78] sm:$0xff]  ;;  %v5042_v21 = vpack.c.bf16 %v931_v18, %v930_v17 }
 0x16d   : > { %5027 = vmatprep.subr.bf16.mxu1 %v5026_v58  ;;  %996 = vmatprep.mubr.f32.mxu0 %v805_v15  ;;  %v4988_v22 = vpack.c.bf16 %v899_v20, %v898_v19  ;;  %v900_v23 = vld [vmem:[#allocation12 + $0x80] sm:$0xff]  ;;  %v901_v24 = vld [vmem:[#allocation12 + $0x88] sm:$0xff]  ;;  %v902_v28 = vld [vmem:[#allocation12 + $0x90] sm:$0xff] }
 0x16e   : > { %4977 = vmatpush1.bf16.msra.mxu0 %v4976_v60  ;;  %v1384_v25 = vld [vmem:[#allocation12 + $0x180] sm:$0xff]  ;;  %v1385_v26 = vld [vmem:[#allocation12 + $0x188] sm:$0xff]  ;;  %v4991_v27 = vpack.c.bf16 %v901_v24, %v900_v23  ;;  %v903_v29 = vld [vmem:[#allocation12 + $0x98] sm:$0xff] }
 0x16f   : > { %4978 = vmatprep.subr.bf16.mxu0 %v5977_v39  ;;  %v809_v30 = vld [vmem:[#allocation2 + $0x28] sm:$0xff]  ;;  %v5047_v31 = vpack.c.bf16 %v1385_v26, %v1384_v25  ;;  %v1386_v32 = vld [vmem:[#allocation12 + $0x190] sm:$0xff]  ;;  %v1387_v33 = vld [vmem:[#allocation12 + $0x198] sm:$0xff]  ;;  %v4994_v35 = vpack.c.bf16 %v903_v29, %v902_v28 }
 0x170   : > { %5029 = vmatpush3.bf16.msra.mxu1 %v5026_v58  ;;  %v6645_v34 = vld [vmem:[#allocation2 + $0x40] sm:$0xff]  ;;  %v905_v37 = vld [vmem:[#allocation12 + $0xa8] sm:$0xff]  ;;  %v5050_v38 = vpack.c.bf16 %v1387_v33, %v1386_v32  ;;  %v6649_v40 = vld [vmem:[#allocation2 + $0x58] sm:$0xff] }
 0x171   : > { %5031 = vmatprep.subr.bf16.mxu1 %v5030_v2  ;;  %v904_v36 = vld [vmem:[#allocation12 + $0xa0] sm:$0xff]  ;;  %v1389_v42 = vld [vmem:[#allocation12 + $0x1a8] sm:$0xff]  ;;  %v6652_v43 = vld [vmem:[#allocation2 + $0x70] sm:$0xff] }
 0x172   : > { %4980 = vmatpush1.bf16.msra.mxu0 %v4979_v3  ;;  %v1388_v41 = vld [vmem:[#allocation12 + $0x1a0] sm:$0xff]  ;;  %v4997_v44 = vpack.c.bf16 %v905_v37, %v904_v36  ;;  %v906_v45 = vld [vmem:[#allocation12 + $0xb0] sm:$0xff]  ;;  %v907_v46 = vld [vmem:[#allocation12 + $0xb8] sm:$0xff] }
 0x173   : > { %4981 = vmatprep.subr.bf16.mxu0 %v5977_v39  ;;  %v5053_v47 = vpack.c.bf16 %v1389_v42, %v1388_v41  ;;  %v6657_v48 = vld [vmem:[#allocation2 + $0x88] sm:$0xff]  ;;  %v1390_v49 = vld [vmem:[#allocation12 + $0x1b0] sm:$0xff]  ;;  %v1391_v50 = vld [vmem:[#allocation12 + $0x1b8] sm:$0xff]  ;;  %v5000_v0 = vpack.c.bf16 %v907_v46, %v906_v45 }
 0x174   : > { %5033 = vmatpush3.bf16.msra.mxu1 %v5030_v2  ;;  %v6660_v51 = vld [vmem:[#allocation2 + $0xa0] sm:$0xff]  ;;  %v909_v53 = vld [vmem:[#allocation12 + $0xc8] sm:$0xff]  ;;  %v5056_v54 = vpack.c.bf16 %v1391_v50, %v1390_v49  ;;  %v6665_v55 = vld [vmem:[#allocation2 + $0xb8] sm:$0xff] }
 0x175   : > { %5035 = vmatprep.subr.bf16.mxu1 %v5034_v8  ;;  %v908_v52 = vld [vmem:[#allocation12 + $0xc0] sm:$0xff]  ;;  %v1393_v57 = vld [vmem:[#allocation12 + $0x1c8] sm:$0xff]  ;;  %v6668_v58 = vld [vmem:[#allocation2 + $0xd0] sm:$0xff] }
 0x176   : > { %4983 = vmatpush1.bf16.msra.mxu0 %v4982_v9  ;;  %v1392_v56 = vld [vmem:[#allocation12 + $0x1c0] sm:$0xff]  ;;  %v5003_v59 = vpack.c.bf16 %v909_v53, %v908_v52  ;;  %v910_v60 = vld [vmem:[#allocation12 + $0xd0] sm:$0xff]  ;;  %v911_v61 = vld [vmem:[#allocation12 + $0xd8] sm:$0xff] }
 0x177   : > { %4984 = vmatprep.subr.bf16.mxu0 %v5977_v39  ;;  %v5059_v62 = vpack.c.bf16 %v1393_v57, %v1392_v56  ;;  %v6673_v63 = vld [vmem:[#allocation2 + $0xe8] sm:$0xff]  ;;  %v1394_v1 = vld [vmem:[#allocation12 + $0x1d0] sm:$0xff]  ;;  %v1395_v2 = vld [vmem:[#allocation12 + $0x1d8] sm:$0xff]  ;;  %v5006_v4 = vpack.c.bf16 %v911_v61, %v910_v60 }
 0x178   : > { %5037 = vmatpush3.bf16.msra.mxu1 %v5034_v8  ;;  %v6676_v3 = vld [vmem:[#allocation2 + $0x100] sm:$0xff]  ;;  %v913_v6 = vld [vmem:[#allocation12 + $0xe8] sm:$0xff]  ;;  %v5062_v7 = vpack.c.bf16 %v1395_v2, %v1394_v1  ;;  %v6681_v8 = vld [vmem:[#allocation2 + $0x118] sm:$0xff] }
 0x179   : > { %5039 = vmatprep.subr.bf16.mxu1 %v5038_v14  ;;  %v912_v5 = vld [vmem:[#allocation12 + $0xe0] sm:$0xff]  ;;  %v1397_v10 = vld [vmem:[#allocation12 + $0x1e8] sm:$0xff]  ;;  %v6684_v11 = vld [vmem:[#allocation2 + $0x130] sm:$0xff] }
 0x17a   : > { %4986 = vmatpush1.bf16.msra.mxu0 %v4985_v16  ;;  %v1396_v9 = vld [vmem:[#allocation12 + $0x1e0] sm:$0xff]  ;;  %v5009_v12 = vpack.c.bf16 %v913_v6, %v912_v5  ;;  %v914_v13 = vld [vmem:[#allocation12 + $0xf0] sm:$0xff]  ;;  %v6689_v16 = vld [vmem:[#allocation2 + $0x148] sm:$0xff] }
 0x17b   : > { %4987 = vmatprep.subr.bf16.mxu0 %v5977_v39  ;;  %v5065_v15 = vpack.c.bf16 %v1397_v10, %v1396_v9  ;;  %v1416_v17 = vld [vmem:[#allocation12 + $0x280] sm:$0xff]  ;;  %v1417_v18 = vld [vmem:[#allocation12 + $0x288] sm:$0xff]  ;;  %v1398_v19 = vld [vmem:[#allocation12 + $0x1f0] sm:$0xff] }
 0x17c   : > { %5041 = vmatpush3.bf16.msra.mxu1 %v5038_v14  ;;  %v915_v14 = vld [vmem:[#allocation12 + $0xf8] sm:$0xff]  ;;  %v5094_v23 = vpack.c.bf16 %v1417_v18, %v1416_v17  ;;  %v1418_v26 = vld [vmem:[#allocation12 + $0x290] sm:$0xff]  ;;  %v1400_v28 = vld [vmem:[#allocation12 + $0x200] sm:$0xff] }
 0x17d   : > { %5043 = vmatprep.subr.bf16.mxu1 %v5042_v21  ;;  %v1399_v20 = vld [vmem:[#allocation12 + $0x1f8] sm:$0xff]  ;;  %v1401_v29 = vld [vmem:[#allocation12 + $0x208] sm:$0xff]  ;;  %v808_v32 = vld [vmem:[#allocation2 + $0x20] sm:$0xff] }
 0x17e   : > { %4989 = vmatpush1.bf16.msra.mxu0 %v4988_v22  ;;  %v5012_v22 = vpack.c.bf16 %v915_v14, %v914_v13  ;;  %v5068_v24 = vpack.c.bf16 %v1399_v20, %v1398_v19  ;;  %v6697_v25 = vld [vmem:[#allocation2 + $0x178] sm:$0xff]  ;;  %v6704_v36 = vld [vmem:[#allocation2 + $0x1a8] sm:$0xff]  ;;  %v1420_v37 = vld [vmem:[#allocation12 + $0x2a0] sm:$0xff] }
 0x17f   : > { %4990 = vmatprep.subr.bf16.mxu0 %v5977_v39  ;;  %v1402_v41 = vld [vmem:[#allocation12 + $0x210] sm:$0xff]  ;;  %v1403_v42 = vld [vmem:[#allocation12 + $0x218] sm:$0xff]  ;;  %v1404_v53 = vld [vmem:[#allocation12 + $0x220] sm:$0xff] }
 0x180   : > { %5045 = vmatpush3.bf16.msra.mxu1 %v5042_v21  ;;  %v6692_v21 = vld [vmem:[#allocation2 + $0x160] sm:$0xff]  ;;  %v807_v45 = vld [vmem:[#allocation2 + $0x18] sm:$0xff]  ;;  %v5074_v49 = vpack.c.bf16 %v1403_v42, %v1402_v41  ;;  %v6714_v56 = vld [vmem:[#allocation2 + $0x30] sm:$0xff] }
 0x181   : > { %5046 = vmatprep.subr.bf16.mxu1 %v5977_v39  ;;  %v811_v46 = vld [vmem:[#allocation2 + $0x38] sm:$0xff]  ;;  %v6716_v57 = vld [vmem:[#allocation2 + $0x50] sm:$0xff]  ;;  %v1424_v61 = vld [vmem:[#allocation12 + $0x2c0] sm:$0xff] }
 0x182   : > { %4992 = vmatpush1.bf16.msra.mxu0 %v4991_v27  ;;  %v1419_v27 = vld [vmem:[#allocation12 + $0x298] sm:$0xff]  ;;  %v1406_v1 = vld [vmem:[#allocation12 + $0x230] sm:$0xff]  ;;  %v6724_v5 = vld [vmem:[#allocation2 + $0x68] sm:$0xff] }
 0x183   : > { %4645 = vmatmul.mubr.f32.vlgmr.msra.gmra.mrb[0].mxu1 %v809_v30  ;;  %4993 = vmatprep.subr.bf16.mxu0 %v5977_v39  ;;  %v6700_v30 = vld [vmem:[#allocation2 + $0x190] sm:$0xff]  ;;  %v5098_v33 = vpack.c.bf16 %v1419_v27, %v1418_v26  ;;  %v6711_v50 = vld [vmem:[#allocation2 + $0x1d8] sm:$0xff]  ;;  %v1409_v13 = vld [vmem:[#allocation12 + $0x248] sm:$0xff] }
 0x184   : > { %5048 = vmatpush1.bf16.msra.mxu1 %v5047_v31  ;;  %4647 = vmatprep.mubr.f32.mxu1 %v6645_v34  ;;  %v804_v31 = vld [vmem:[#allocation2] sm:$0xff]  ;;  %v1423_v52 = vld [vmem:[#allocation12 + $0x2b8] sm:$0xff]  ;;  %v1426_v9 = vld [vmem:[#allocation12 + $0x2d0] sm:$0xff] }
 0x185   : > { %5049 = vmatprep.subr.bf16.mxu1 %v5977_v39  ;;  %v1407_v2 = vld [vmem:[#allocation12 + $0x238] sm:$0xff]  ;;  %v6729_v14 = vld [vmem:[#allocation2 + $0x60] sm:$0xff]  ;;  %v1429_v20 = vld [vmem:[#allocation12 + $0x2e8] sm:$0xff] }
 0x186   : > { %4995 = vmatpush1.bf16.msra.mxu0 %v4994_v35  ;;  %v5071_v35 = vpack.c.bf16 %v1401_v29, %v1400_v28  ;;  %v1427_v10 = vld [vmem:[#allocation12 + $0x2d8] sm:$0xff]  ;;  %v1428_v19 = vld [vmem:[#allocation12 + $0x2e0] sm:$0xff]  ;;  %v1430_v29 = vld [vmem:[#allocation12 + $0x2f0] sm:$0xff] }
 0x187   : > { %4996 = vmatprep.subr.bf16.mxu0 %v5977_v39  ;;  %4648 = vmatmul.mubr.f32.gmra.mrb[2].mxu1 %v6649_v40  ;;  %v5114_v17 = vpack.c.bf16 %v1427_v10, %v1426_v9  ;;  %v6738_v26 = vld [vmem:[#allocation2 + $0x98] sm:$0xff]  ;;  %v5118_v27 = vpack.c.bf16 %v1429_v20, %v1428_v19  ;;  %v1915_v42 = vld [vmem:[#allocation12 + $0x400] sm:$0xff]  ;;  %v6785_v19 = vld [vmem:[#allocation2 + $0x108] sm:$0xff] }
 0x188   : > { %5051 = vmatpush1.bf16.msra.mxu1 %v5050_v38  ;;  %4650 = vmatprep.mubr.f32.mxu1 %v6652_v43  ;;  %v1421_v38 = vld [vmem:[#allocation12 + $0x2a8] sm:$0xff]  ;;  %v1887_v10 = vld [vmem:[#allocation12 + $0x320] sm:$0xff] }
 0x189   : > { %5052 = vmatprep.subr.bf16.mxu1 %v5977_v39  ;;  %v6788_v20 = vld [vmem:[#allocation2 + $0x128] sm:$0xff] }
 0x18a   : > { %4998 = vmatpush1.bf16.msra.mxu0 %v4997_v44  ;;  %v6707_v44 = vld [vmem:[#allocation2 + $0x1c0] sm:$0xff] }
 0x18b   : > { %4999 = vmatprep.subr.bf16.mxu0 %v5977_v39  ;;  %4651 = vmatmul.mubr.f32.gmra.mrb[4].mxu1 %v6657_v48 }
 0x18c   : > { %5054 = vmatpush1.bf16.msra.mxu1 %v5053_v47  ;;  %4653 = vmatprep.mubr.f32.mxu1 %v6660_v51  ;;  %v5102_v47 = vpack.c.bf16 %v1421_v38, %v1420_v37  ;;  %v6745_v37 = vld [vmem:[#allocation2 + $0xb0] sm:$0xff] }
 0x18d   : > { %5055 = vmatprep.subr.bf16.mxu1 %v5977_v39 }
 0x18e   : > { %5001 = vmatpush1.bf16.msra.mxu0 %v5000_v0  ;;  %v1422_v0 = vld [vmem:[#allocation12 + $0x2b0] sm:$0xff] }
 0x18f   : > { %5002 = vmatprep.subr.bf16.mxu0 %v5977_v39  ;;  %4654 = vmatmul.mubr.f32.gmra.mrb[6].mxu1 %v6665_v55 }
 0x190   : > { %5057 = vmatpush1.bf16.msra.mxu1 %v5056_v54  ;;  %4656 = vmatprep.mubr.f32.mxu1 %v6668_v58  ;;  %v1405_v54 = vld [vmem:[#allocation12 + $0x228] sm:$0xff] }
 0x191   : > { %5058 = vmatprep.subr.bf16.mxu1 %v5977_v39  ;;  %v5077_v60 = vpack.c.bf16 %v1405_v54, %v1404_v53  ;;  %v1883_v54 = vld [vmem:[#allocation12 + $0x300] sm:$0xff] }
 0x192   : > { %5004 = vmatpush1.bf16.msra.mxu0 %v5003_v59  ;;  %v5106_v59 = vpack.c.bf16 %v1423_v52, %v1422_v0  ;;  %v6752_v0 = vld [vmem:[#allocation2 + $0xc8] sm:$0xff] }
 0x193   : > { %5005 = vmatprep.subr.bf16.mxu0 %v5977_v39  ;;  %4657 = vmatmul.mubr.f32.gmra.mrb[8].mxu1 %v6673_v63 }
 0x194   : > { %5060 = vmatpush1.bf16.msra.mxu1 %v5059_v62  ;;  %4659 = vmatprep.mubr.f32.mxu1 %v6676_v3  ;;  %v1425_v62 = vld [vmem:[#allocation12 + $0x2c8] sm:$0xff] }
 0x195   : > { %5061 = vmatprep.subr.bf16.mxu1 %v5977_v39  ;;  %v5110_v6 = vpack.c.bf16 %v1425_v62, %v1424_v61  ;;  %v6761_v61 = vld [vmem:[#allocation2 + $0xe0] sm:$0xff] }
 0x196   : > { %5007 = vmatpush1.bf16.msra.mxu0 %v5006_v4  ;;  %v6722_v4 = vld [vmem:[#allocation2 + $0x48] sm:$0xff] }
 0x197   : > { %5008 = vmatprep.subr.bf16.mxu0 %v5977_v39  ;;  %4660 = vmatmul.mubr.f32.gmra.mrb[10].mxu1 %v6681_v8 }
 0x198   : > { %5063 = vmatpush1.bf16.msra.mxu1 %v5062_v7  ;;  %4662 = vmatprep.mubr.f32.mxu1 %v6684_v11  ;;  %v5080_v7 = vpack.c.bf16 %v1407_v2, %v1406_v1  ;;  %v1885_v1 = vld [vmem:[#allocation12 + $0x310] sm:$0xff]  ;;  %v1886_v2 = vld [vmem:[#allocation12 + $0x318] sm:$0xff] }
 0x199   : > { %5064 = vmatprep.subr.bf16.mxu1 %v5977_v39  ;;  %v5130_v9 = vpack.c.bf16 %v1886_v2, %v1885_v1  ;;  %v6824_v1 = vld [vmem:[#allocation2 + $0x188] sm:$0xff] }
 0x19a   : > { %5010 = vmatpush1.bf16.msra.mxu0 %v5009_v12  ;;  %v1408_v12 = vld [vmem:[#allocation12 + $0x240] sm:$0xff] }
 0x19b   : > { %5011 = vmatprep.subr.bf16.mxu0 %v5977_v39  ;;  %4663 = vmatmul.mubr.f32.gmra.mrb[12].mxu1 %v6689_v16  ;;  %v5083_v18 = vpack.c.bf16 %v1409_v13, %v1408_v12  ;;  %v1888_v12 = vld [vmem:[#allocation12 + $0x328] sm:$0xff]  ;;  %v6776_v13 = vld [vmem:[#allocation2 + $0xf0] sm:$0xff] }
 0x19c   : > { %5066 = vmatpush1.bf16.msra.mxu1 %v5065_v15  ;;  %4665 = vmatprep.mubr.f32.mxu1 %v6692_v21  ;;  %v6731_v15 = vld [vmem:[#allocation2 + $0x80] sm:$0xff] }
 0x19d   : > { %5067 = vmatprep.subr.bf16.mxu1 %v5977_v39 }
 0x19e   : > { %5013 = vmatpush1.bf16.msra.mxu0 %v5012_v22  ;;  %v1410_v22 = vld [vmem:[#allocation12 + $0x250] sm:$0xff] }
 0x19f   : > { %4666 = vmatmul.mubr.f32.gmra.mrb[14].mxu1 %v6697_v25  ;;  %5095 = vmatprep.subr.bf16.mxu0 %v5094_v23 }
 0x1a0   : > { %5069 = vmatpush1.bf16.msra.mxu1 %v5068_v24  ;;  %4668 = vmatprep.mubr.f32.mxu1 %v6700_v30  ;;  %v6736_v24 = vld [vmem:[#allocation2 + $0x78] sm:$0xff] }
 0x1a1   : > { %997 = vmatmul.mubr.f32.vlgmr.msra.gmra.mrb[0].mxu0 %v804_v31  ;;  %5070 = vmatprep.subr.bf16.mxu1 %v5977_v39  ;;  %v1431_v31 = vld [vmem:[#allocation12 + $0x2f8] sm:$0xff] }
 0x1a2   : > { %1001 = vmatprep.mubr.f32.mxu0 %v808_v32  ;;  %5097 = vmatpush3.bf16.msra.mxu0 %v5094_v23  ;;  %v1411_v23 = vld [vmem:[#allocation12 + $0x258] sm:$0xff]  ;;  %v1412_v32 = vld [vmem:[#allocation12 + $0x260] sm:$0xff]  ;;  %v5122_v38 = vpack.c.bf16 %v1431_v31, %v1430_v29  ;;  %v1893_v31 = vld [vmem:[#allocation12 + $0x350] sm:$0xff] }
 0x1a3   : > { %4669 = vmatmul.mubr.f32.gmra.mrb[16].mxu1 %v6704_v36  ;;  %5099 = vmatprep.subr.bf16.mxu0 %v5098_v33  ;;  %v5086_v28 = vpack.c.bf16 %v1411_v23, %v1410_v22  ;;  %v1891_v22 = vld [vmem:[#allocation12 + $0x340] sm:$0xff]  ;;  %v1892_v23 = vld [vmem:[#allocation12 + $0x348] sm:$0xff] }
 0x1a4   : > { %5072 = vmatpush1.bf16.msra.mxu1 %v5071_v35  ;;  %4671 = vmatprep.mubr.f32.mxu1 %v6707_v44  ;;  %v6743_v35 = vld [vmem:[#allocation2 + $0x90] sm:$0xff]  ;;  %v5139_v29 = vpack.c.bf16 %v1892_v23, %v1891_v22  ;;  %v6839_v22 = vld [vmem:[#allocation2 + $0x198] sm:$0xff] }
 0x1a5   : > { %1002 = vmatmul.mubr.f32.gmra.mrb[2].mxu0 %v807_v45  ;;  %5073 = vmatprep.subr.bf16.mxu1 %v5977_v39  ;;  %v1916_v45 = vld [vmem:[#allocation12 + $0x408] sm:$0xff]  ;;  %v6842_v23 = vld [vmem:[#allocation2 + $0x1b8] sm:$0xff] }
 0x1a6   : > { %1006 = vmatprep.mubr.f32.mxu0 %v811_v46  ;;  %5101 = vmatpush3.bf16.msra.mxu0 %v5098_v33  ;;  %v1413_v33 = vld [vmem:[#allocation12 + $0x268] sm:$0xff]  ;;  %v6754_v52 = vpack.c.bf16 %v1916_v45, %v1915_v42  ;;  %v1895_v42 = vld [vmem:[#allocation12 + $0x360] sm:$0xff] }
 0x1a7   : > { %4672 = vmatmul.mubr.f32.gmra.mrb[18].mxu1 %v6711_v50  ;;  %5103 = vmatprep.subr.bf16.mxu0 %v5102_v47  ;;  %v5089_v41 = vpack.c.bf16 %v1413_v33, %v1412_v32  ;;  %v1894_v32 = vld [vmem:[#allocation12 + $0x358] sm:$0xff]  ;;  %v1896_v45 = vld [vmem:[#allocation12 + $0x368] sm:$0xff] }
 0x1a8   : > { %5075 = vmatpush1.bf16.msra.mxu1 %v5074_v49  ;;  %1496 = vmatprep.mubr.f32.mxu1 %v811_v46  ;;  %v1414_v46 = vld [vmem:[#allocation12 + $0x270] sm:$0xff]  ;;  %v6750_v49 = vld [vmem:[#allocation2 + $0xa8] sm:$0xff]  ;;  %v6803_v33 = vld [vmem:[#allocation2 + $0x138] sm:$0xff] }
 0x1a9   : > { %1007 = vmatmul.mubr.f32.gmra.mrb[4].mxu0 %v6714_v56  ;;  %5076 = vmatprep.subr.bf16.mxu1 %v5977_v39 }
 0x1aa   : > { %1011 = vmatprep.mubr.f32.mxu0 %v6716_v57  ;;  %5105 = vmatpush3.bf16.msra.mxu0 %v5102_v47  ;;  %v1415_v47 = vld [vmem:[#allocation12 + $0x278] sm:$0xff] }
 0x1ab   : > { %5107 = vmatprep.subr.bf16.mxu0 %v5106_v59  ;;  %v5092_v53 = vpack.c.bf16 %v1415_v47, %v1414_v46  ;;  %v6812_v46 = vld [vmem:[#allocation2 + $0x150] sm:$0xff] }
 0x1ac   : > { %5078 = vmatpush1.bf16.msra.mxu1 %v5077_v60  ;;  %v6759_v60 = vld [vmem:[#allocation2 + $0xc0] sm:$0xff]  ;;  %v6815_v47 = vld [vmem:[#allocation2 + $0x170] sm:$0xff] }
 0x1ad   : > { %1012 = vmatmul.mubr.f32.gmra.mrb[6].mxu0 %v6722_v4  ;;  %5079 = vmatprep.subr.bf16.mxu1 %v5977_v39 }
 0x1ae   : > { %1016 = vmatprep.mubr.f32.mxu0 %v6724_v5  ;;  %5109 = vmatpush3.bf16.msra.mxu0 %v5106_v59  ;;  %v1884_v59 = vld [vmem:[#allocation12 + $0x308] sm:$0xff] }
 0x1af   : > { %5111 = vmatprep.subr.bf16.mxu0 %v5110_v6  ;;  %v5127_v62 = vpack.c.bf16 %v1884_v59, %v1883_v54  ;;  %v1897_v54 = vld [vmem:[#allocation12 + $0x370] sm:$0xff]  ;;  %v1898_v59 = vld [vmem:[#allocation12 + $0x378] sm:$0xff] }
 0x1b0   : > { %5081 = vmatpush1.bf16.msra.mxu1 %v5080_v7  ;;  %v6770_v7 = vld [vmem:[#allocation2 + $0xf8] sm:$0xff]  ;;  %v5148_v2 = vpack.c.bf16 %v1898_v59, %v1897_v54  ;;  %v6857_v59 = vld [vmem:[#allocation2 + $0x1c8] sm:$0xff] }
 0x1b1   : > { %1017 = vmatmul.mubr.f32.gmra.mrb[8].mxu0 %v6729_v14  ;;  %5082 = vmatprep.subr.bf16.mxu1 %v5977_v39  ;;  %v1906_v54 = vld [vmem:[#allocation12 + $0x3b8] sm:$0xff] }
 0x1b2   : > { %1021 = vmatprep.mubr.f32.mxu0 %v6731_v15  ;;  %5113 = vmatpush3.bf16.msra.mxu0 %v5110_v6  ;;  %v6767_v6 = vld [vmem:[#allocation2 + $0xd8] sm:$0xff] }
 0x1b3   : > { %5115 = vmatprep.subr.bf16.mxu0 %v5114_v17 }
 0x1b4   : > { %5084 = vmatpush1.bf16.msra.mxu1 %v5083_v18  ;;  %v1890_v18 = vld [vmem:[#allocation12 + $0x338] sm:$0xff] }
 0x1b5   : > { %1022 = vmatmul.mubr.f32.gmra.mrb[10].mxu0 %v6736_v24  ;;  %5085 = vmatprep.subr.bf16.mxu1 %v5977_v39 }
 0x1b6   : > { %1026 = vmatprep.mubr.f32.mxu0 %v6738_v26  ;;  %5117 = vmatpush3.bf16.msra.mxu0 %v5114_v17  ;;  %v6779_v17 = vld [vmem:[#allocation2 + $0x110] sm:$0xff] }
 0x1b7   : > { %5119 = vmatprep.subr.bf16.mxu0 %v5118_v27 }
 0x1b8   : > { %5087 = vmatpush1.bf16.msra.mxu1 %v5086_v28  ;;  %v6797_v28 = vld [vmem:[#allocation2 + $0x140] sm:$0xff] }
 0x1b9   : > { %1027 = vmatmul.mubr.f32.gmra.mrb[12].mxu0 %v6743_v35  ;;  %5088 = vmatprep.subr.bf16.mxu1 %v5977_v39 }
 0x1ba   : > { %1031 = vmatprep.mubr.f32.mxu0 %v6745_v37  ;;  %5121 = vmatpush3.bf16.msra.mxu0 %v5118_v27  ;;  %v6794_v27 = vld [vmem:[#allocation2 + $0x120] sm:$0xff] }
 0x1bb   : > { %5123 = vmatprep.subr.bf16.mxu0 %v5122_v38 }
 0x1bc   : > { %5090 = vmatpush1.bf16.msra.mxu1 %v5089_v41  ;;  %v5142_v41 = vpack.c.bf16 %v1894_v32, %v1893_v31  ;;  %v1903_v31 = vld [vmem:[#allocation12 + $0x3a0] sm:$0xff]  ;;  %v1904_v32 = vld [vmem:[#allocation12 + $0x3a8] sm:$0xff] }
 0x1bd   : > { %1032 = vmatmul.mubr.f32.gmra.mrb[14].mxu0 %v6750_v49  ;;  %5091 = vmatprep.subr.bf16.mxu1 %v5977_v39 }
 0x1be   : > { %1036 = vmatprep.mubr.f32.mxu0 %v6752_v0  ;;  %5125 = vmatpush3.bf16.msra.mxu0 %v5122_v38  ;;  %v6806_v38 = vld [vmem:[#allocation2 + $0x158] sm:$0xff] }
 0x1bf   : > { %5175 = vmatprep.subr.bf16.mxu0 %v6754_v52 }
 0x1c0   : > { %5093 = vmatpush1.bf16.msra.mxu1 %v5092_v53  ;;  %v5145_v53 = vpack.c.bf16 %v1896_v45, %v1895_v42  ;;  %v6851_v42 = vld [vmem:[#allocation2 + $0x1d0] sm:$0xff]  ;;  %v5157_v45 = vpack.c.bf16 %v1904_v32, %v1903_v31  ;;  %v1919_v31 = vld [vmem:[#allocation12 + $0x420] sm:$0xff]  ;;  %v1920_v32 = vld [vmem:[#allocation12 + $0x428] sm:$0xff] }
 0x1c1   : > { %1037 = vmatmul.mubr.f32.gmra.mrb[16].mxu0 %v6759_v60  ;;  %5126 = vmatprep.subr.bf16.mxu1 %v5977_v39 }
 0x1c2   : > { %1041 = vmatprep.mubr.f32.mxu0 %v6761_v61 }
 0x1c3   : > { %1497 = vmatmul.mubr.f32.vlgmr.msra.gmra.mrb[20].mxu1 %v6714_v56  ;;  %v5133_v56 = vpack.c.bf16 %v1888_v12, %v1887_v10  ;;  %v1900_v10 = vld [vmem:[#allocation12 + $0x388] sm:$0xff]  ;;  %v6830_v12 = vld [vmem:[#allocation2 + $0x180] sm:$0xff] }
 0x1c4   : > { %5128 = vmatpush1.bf16.msra.mxu1 %v5127_v62  ;;  %1501 = vmatprep.mubr.f32.mxu1 %v6716_v57  ;;  %v1889_v57 = vld [vmem:[#allocation12 + $0x330] sm:$0xff]  ;;  %v6821_v62 = vld [vmem:[#allocation2 + $0x168] sm:$0xff] }
 0x1c5   : > { %1042 = vmatmul.mubr.f32.gmra.mrb[18].mxu0 %v6767_v6  ;;  %5129 = vmatprep.subr.bf16.mxu1 %v5977_v39 }
 0x1c6   : > { %1046 = vmatprep.mubr.f32.mxu0 %v6770_v7 }
 0x1c7   : > { %1502 = vmatmul.mubr.f32.gmra.mrb[22].mxu1 %v6722_v4  ;;  %v5136_v4 = vpack.c.bf16 %v1890_v18, %v1889_v57  ;;  %v1901_v18 = vld [vmem:[#allocation12 + $0x390] sm:$0xff] }
 0x1c8   : > { %5131 = vmatpush1.bf16.msra.mxu1 %v5130_v9  ;;  %1506 = vmatprep.mubr.f32.mxu1 %v6724_v5  ;;  %v1899_v9 = vld [vmem:[#allocation12 + $0x380] sm:$0xff] }
 0x1c9   : > { %1047 = vmatmul.mubr.f32.gmra.mrb[20].mxu0 %v6776_v13  ;;  %5132 = vmatprep.subr.bf16.mxu1 %v5977_v39  ;;  %v5151_v57 = vpack.c.bf16 %v1900_v10, %v1899_v9  ;;  %v1917_v9 = vld [vmem:[#allocation12 + $0x410] sm:$0xff]  ;;  %v1918_v10 = vld [vmem:[#allocation12 + $0x418] sm:$0xff] }
 0x1ca   : > { %1051 = vmatprep.mubr.f32.mxu0 %v6779_v17 }
 0x1cb   : > { %1507 = vmatmul.mubr.f32.gmra.mrb[24].mxu1 %v6729_v14 }
 0x1cc   : > { %1511 = vmatprep.mubr.f32.mxu1 %v6731_v15  ;;  %5134 = vmatpush1.bf16.msra.mxu1 %v5133_v56  ;;  %v6833_v56 = vld [vmem:[#allocation2 + $0x1a0] sm:$0xff] }
 0x1cd   : > { %1052 = vmatmul.mubr.f32.gmra.mrb[22].mxu0 %v6785_v19  ;;  %5135 = vmatprep.subr.bf16.mxu1 %v5977_v39 }
 0x1ce   : > { %1056 = vmatprep.mubr.f32.mxu0 %v6788_v20 }
 0x1cf   : > { %1512 = vmatmul.mubr.f32.gmra.mrb[26].mxu1 %v6736_v24 }
 0x1d0   : > { %1516 = vmatprep.mubr.f32.mxu1 %v6738_v26  ;;  %5137 = vmatpush1.bf16.msra.mxu1 %v5136_v4  ;;  %v1902_v4 = vld [vmem:[#allocation12 + $0x398] sm:$0xff] }
 0x1d1   : > { %1057 = vmatmul.mubr.f32.gmra.mrb[24].mxu0 %v6794_v27  ;;  %5138 = vmatprep.subr.bf16.mxu1 %v5977_v39 }
 0x1d2   : > { %1061 = vmatprep.mubr.f32.mxu0 %v6797_v28 }
 0x1d3   : > { %1517 = vmatmul.mubr.f32.gmra.mrb[28].mxu1 %v6743_v35 }
 0x1d4   : > { %1521 = vmatprep.mubr.f32.mxu1 %v6745_v37  ;;  %5140 = vmatpush1.bf16.msra.mxu1 %v5139_v29  ;;  %v5154_v29 = vpack.c.bf16 %v1902_v4, %v1901_v18  ;;  %v1908_v18 = vld [vmem:[#allocation12 + $0x3c8] sm:$0xff]  ;;  %v5178_v4 = vpack.c.bf16 %v1918_v10, %v1917_v9  ;;  %v1922_v9 = vld [vmem:[#allocation12 + $0x438] sm:$0xff] }
 0x1d5   : > { %1062 = vmatmul.mubr.f32.gmra.mrb[26].mxu0 %v6803_v33  ;;  %5141 = vmatprep.subr.bf16.mxu1 %v5977_v39  ;;  %v1912_v10 = vld [vmem:[#allocation12 + $0x3e8] sm:$0xff] }
 0x1d6   : > { %1066 = vmatprep.mubr.f32.mxu0 %v6806_v38 }
 0x1d7   : > { %1522 = vmatmul.mubr.f32.gmra.mrb[30].mxu1 %v6750_v49 }
 0x1d8   : > { %1526 = vmatprep.mubr.f32.mxu1 %v6752_v0  ;;  %5143 = vmatpush1.bf16.msra.mxu1 %v5142_v41  ;;  %v6848_v41 = vld [vmem:[#allocation2 + $0x1b0] sm:$0xff] }
 0x1d9   : > { %1067 = vmatmul.mubr.f32.gmra.mrb[28].mxu0 %v6812_v46  ;;  %5144 = vmatprep.subr.bf16.mxu1 %v5977_v39 }
 0x1da   : > { %1071 = vmatprep.mubr.f32.mxu0 %v6815_v47 }
 0x1db   : > { %1527 = vmatmul.mubr.f32.gmra.mrb[32].mxu1 %v6759_v60 }
 0x1dc   : > { %1531 = vmatprep.mubr.f32.mxu1 %v6761_v61  ;;  %5146 = vmatpush1.bf16.msra.mxu1 %v5145_v53  ;;  %v1905_v53 = vld [vmem:[#allocation12 + $0x3b0] sm:$0xff] }
 0x1dd   : > { %1072 = vmatmul.mubr.f32.gmra.mrb[30].mxu0 %v6821_v62  ;;  %5147 = vmatprep.subr.bf16.mxu1 %v5977_v39 }
 0x1de   : > { %1076 = vmatprep.mubr.f32.mxu0 %v6824_v1 }
 0x1df   : > { %1532 = vmatmul.mubr.f32.gmra.mrb[34].mxu1 %v6767_v6 }
 0x1e0   : > { %1536 = vmatprep.mubr.f32.mxu1 %v6770_v7  ;;  %5149 = vmatpush1.bf16.msra.mxu1 %v5148_v2  ;;  %v5160_v2 = vpack.c.bf16 %v1906_v54, %v1905_v53  ;;  %v1910_v53 = vld [vmem:[#allocation12 + $0x3d8] sm:$0xff] }
 0x1e1   : > { %1077 = vmatmul.mubr.f32.gmra.mrb[32].mxu0 %v6830_v12  ;;  %5150 = vmatprep.subr.bf16.mxu1 %v5977_v39 }
 0x1e2   : > { %1081 = vmatprep.mubr.f32.mxu0 %v6833_v56 }
 0x1e3   : > { %1537 = vmatmul.mubr.f32.gmra.mrb[36].mxu1 %v6776_v13 }
 0x1e4   : > { %1541 = vmatprep.mubr.f32.mxu1 %v6779_v17  ;;  %5152 = vmatpush1.bf16.msra.mxu1 %v5151_v57  ;;  %v1907_v57 = vld [vmem:[#allocation12 + $0x3c0] sm:$0xff] }
 0x1e5   : > { %1082 = vmatmul.mubr.f32.gmra.mrb[34].mxu0 %v6839_v22  ;;  %5153 = vmatprep.subr.bf16.mxu1 %v5977_v39 }
 0x1e6   : > { %1086 = vmatprep.mubr.f32.mxu0 %v6842_v23 }
 0x1e7   : > { %1542 = vmatmul.mubr.f32.gmra.mrb[38].mxu1 %v6785_v19 }
 0x1e8   : > { %1546 = vmatprep.mubr.f32.mxu1 %v6788_v20  ;;  %5155 = vmatpush1.bf16.msra.mxu1 %v5154_v29  ;;  %v5163_v29 = vpack.c.bf16 %v1908_v18, %v1907_v57  ;;  %v1923_v18 = vld [vmem:[#allocation12 + $0x440] sm:$0xff] }
 0x1e9   : > { %1087 = vmatmul.mubr.f32.gmra.mrb[36].mxu0 %v6848_v41  ;;  %5156 = vmatprep.subr.bf16.mxu1 %v5977_v39 }
 0x1ea   : > { %1091 = vmatprep.mubr.f32.mxu0 %v6851_v42 }
 0x1eb   : > { %1547 = vmatmul.mubr.f32.gmra.mrb[40].mxu1 %v6794_v27 }
 0x1ec   : > { %1551 = vmatprep.mubr.f32.mxu1 %v6797_v28  ;;  %5158 = vmatpush1.bf16.msra.mxu1 %v5157_v45  ;;  %v1909_v45 = vld [vmem:[#allocation12 + $0x3d0] sm:$0xff] }
 0x1ed   : > { %1092 = vmatmul.mubr.f32.gmra.mrb[38].mxu0 %v6857_v59  ;;  %5159 = vmatprep.subr.bf16.mxu1 %v5977_v39  ;;  %v5166_v54 = vpack.c.bf16 %v1910_v53, %v1909_v45  ;;  %v1925_v45 = vld [vmem:[#allocation12 + $0x450] sm:$0xff]  ;;  %v1926_v53 = vld [vmem:[#allocation12 + $0x458] sm:$0xff] }
 0x1ee   : > { %4706 = vmatprep.mubr.f32.mxu0 %v6645_v34  ;;  %v5182_v34 = vpack.c.bf16 %v1920_v32, %v1919_v31  ;;  %v1913_v31 = vld [vmem:[#allocation12 + $0x3f0] sm:$0xff]  ;;  %v1914_v32 = vld [vmem:[#allocation12 + $0x3f8] sm:$0xff] }
 0x1ef   : > { %1552 = vmatmul.mubr.f32.gmra.mrb[42].mxu1 %v6803_v33 }
 0x1f0   : > { %1556 = vmatprep.mubr.f32.mxu1 %v6806_v38  ;;  %5161 = vmatpush1.bf16.msra.mxu1 %v5160_v2  ;;  %v1921_v2 = vld [vmem:[#allocation12 + $0x430] sm:$0xff] }
 0x1f1   : > { %4707 = vmatmul.mubr.f32.vlgmr.msra.gmra.mrb[40].mxu0 %v6649_v40  ;;  %5162 = vmatprep.subr.bf16.mxu1 %v5977_v39  ;;  %v1911_v40 = vld [vmem:[#allocation12 + $0x3e0] sm:$0xff] }
 0x1f2   : > { %4709 = vmatprep.mubr.f32.mxu0 %v6652_v43  ;;  %5177 = vmatpush3.bf16.msra.mxu0 %v6754_v52  ;;  %v5186_v52 = vpack.c.bf16 %v1922_v9, %v1921_v2  ;;  %v5169_v57 = vpack.c.bf16 %v1912_v10, %v1911_v40  ;;  %v1927_v2 = vld [vmem:[#allocation12 + $0x460] sm:$0xff]  ;;  %v1928_v9 = vld [vmem:[#allocation12 + $0x468] sm:$0xff]  ;;  %v1929_v40 = vld [vmem:[#allocation12 + $0x470] sm:$0xff] }
 0x1f3   : > { %1557 = vmatmul.mubr.f32.gmra.mrb[44].mxu1 %v6812_v46  ;;  %5179 = vmatprep.subr.bf16.mxu0 %v5178_v4  ;;  %v1930_v10 = vld [vmem:[#allocation12 + $0x478] sm:$0xff] }
 0x1f4   : > { %1561 = vmatprep.mubr.f32.mxu1 %v6815_v47  ;;  %5164 = vmatpush1.bf16.msra.mxu1 %v5163_v29  ;;  %v1924_v29 = vld [vmem:[#allocation12 + $0x448] sm:$0xff] }
 0x1f5   : > { %4710 = vmatmul.mubr.f32.gmra.mrb[42].mxu0 %v6657_v48  ;;  %5165 = vmatprep.subr.bf16.mxu1 %v5977_v39 }
 0x1f6   : > { %4712 = vmatprep.mubr.f32.mxu0 %v6660_v51  ;;  %5181 = vmatpush3.bf16.msra.mxu0 %v5178_v4  ;;  %v5190_v4 = vpack.c.bf16 %v1924_v29, %v1923_v18  ;;  %v6897_v18 = vld [vmem:[#allocation2 + $0x1e0] sm:$0xff] }
 0x1f7   : > { %1562 = vmatmul.mubr.f32.gmra.mrb[46].mxu1 %v6821_v62  ;;  %5183 = vmatprep.subr.bf16.mxu0 %v5182_v34  ;;  %v6900_v29 = vld [vmem:[#allocation2 + $0x200] sm:$0xff] }
 0x1f8   : > { %1566 = vmatprep.mubr.f32.mxu1 %v6824_v1  ;;  %5167 = vmatpush1.bf16.msra.mxu1 %v5166_v54  ;;  %v5172_v54 = vpack.c.bf16 %v1914_v32, %v1913_v31  ;;  %v6905_v31 = vld [vmem:[#allocation2 + $0x1f8] sm:$0xff]  ;;  %v1359_v32 = vld [vmem:[#allocation2 + $0x1f0] sm:$0xff] }
 0x1f9   : > { %4713 = vmatmul.mubr.f32.gmra.mrb[44].mxu0 %v6665_v55  ;;  %5168 = vmatprep.subr.bf16.mxu1 %v5977_v39 }
 0x1fa   : > { %4715 = vmatprep.mubr.f32.mxu0 %v6668_v58  ;;  %5185 = vmatpush3.bf16.msra.mxu0 %v5182_v34  ;;  %v5194_v34 = vpack.c.bf16 %v1926_v53, %v1925_v45 }
 0x1fb   : > { %1567 = vmatmul.mubr.f32.gmra.mrb[48].mxu1 %v6830_v12  ;;  %5187 = vmatprep.subr.bf16.mxu0 %v5186_v52 }
 0x1fc   : > { %1571 = vmatprep.mubr.f32.mxu1 %v6833_v56  ;;  %5170 = vmatpush1.bf16.msra.mxu1 %v5169_v57  ;;  %v5202_v57 = vpack.c.bf16 %v1930_v10, %v1929_v40 }
 0x1fd   : > { %4716 = vmatmul.mubr.f32.gmra.mrb[46].mxu0 %v6673_v63  ;;  %5171 = vmatprep.subr.bf16.mxu1 %v5977_v39  ;;  %v5198_v39 = vpack.c.bf16 %v1928_v9, %v1927_v2 }
 0x1fe   : > { %4718 = vmatprep.mubr.f32.mxu0 %v6676_v3  ;;  %5189 = vmatpush3.bf16.msra.mxu0 %v5186_v52  ;;  %v6892_v52 = vld [vmem:[#allocation2 + $0x1e8] sm:$0xff] }
 0x1ff   : > { %1572 = vmatmul.mubr.f32.gmra.mrb[50].mxu1 %v6839_v22  ;;  %5191 = vmatprep.subr.bf16.mxu0 %v5190_v4 }
 0x200   : > { %1576 = vmatprep.mubr.f32.mxu1 %v6842_v23  ;;  %5173 = vmatpush1.bf16.msra.mxu1 %v5172_v54 }
 0x201   : > { %4719 = vmatmul.mubr.f32.gmra.mrb[48].mxu0 %v6681_v8 }
 0x202   : > { %4721 = vmatprep.mubr.f32.mxu0 %v6684_v11  ;;  %5193 = vmatpush3.bf16.msra.mxu0 %v5190_v4  ;;  %v1362_v4 = vld [vmem:[#allocation2 + $0x208] sm:$0xff] }
 0x203   : > { %1577 = vmatmul.mubr.f32.gmra.mrb[52].mxu1 %v6848_v41  ;;  %5195 = vmatprep.subr.bf16.mxu0 %v5194_v34 }
 0x204   : > { %1581 = vmatprep.mubr.f32.mxu1 %v6851_v42 }
 0x205   : > { %4722 = vmatmul.mubr.f32.gmra.mrb[50].mxu0 %v6689_v16 }
 0x206   : > { %4724 = vmatprep.mubr.f32.mxu0 %v6692_v21  ;;  %5197 = vmatpush3.bf16.msra.mxu0 %v5194_v34 }
 0x207   : > { %1582 = vmatmul.mubr.f32.gmra.mrb[54].mxu1 %v6857_v59  ;;  %5199 = vmatprep.subr.bf16.mxu0 %v5198_v39 }
 0x208   : > { %1586 = vmatprep.mubr.f32.mxu1 %v6892_v52 }
 0x209   : > { %4725 = vmatmul.mubr.f32.gmra.mrb[52].mxu0 %v6697_v25 }
 0x20a   : > { %4727 = vmatprep.mubr.f32.mxu0 %v6700_v30  ;;  %5201 = vmatpush3.bf16.msra.mxu0 %v5198_v39 }
 0x20b   : > { %1587 = vmatmul.mubr.f32.gmra.mrb[56].mxu1 %v6897_v18  ;;  %5203 = vmatprep.subr.bf16.mxu0 %v5202_v57 }
 0x20c   : > { %1591 = vmatprep.mubr.f32.mxu1 %v6900_v29 }
 0x20d   : > { %4728 = vmatmul.mubr.f32.gmra.mrb[54].mxu0 %v6704_v36 }
 0x20e   : > { %4730 = vmatprep.mubr.f32.mxu0 %v6707_v44  ;;  %5205 = vmatpush3.bf16.msra.mxu0 %v5202_v57 }
 0x20f   : > { %1592 = vmatmul.mubr.f32.gmra.mrb[58].mxu1 %v6905_v31 }
 0x210   : > { %1995 = vmatprep.mubr.f32.mxu1 %v6724_v5 }
 0x211   : > { %4731 = vmatmul.mubr.f32.gmra.mrb[56].mxu0 %v6711_v50 }
 0x212   : > { %4733 = vmatprep.mubr.f32.mxu0 %v1359_v32 }
 0x213   : > { %1996 = vmatmul.mubr.f32.vlgmr.msra.gmra.mrb[60].mxu1 %v6729_v14 }
 0x214   : > { %2000 = vmatprep.mubr.f32.mxu1 %v6731_v15 }
 0x215   : > { %4734 = vmatmul.mubr.f32.gmra.mrb[58].mxu0 %v1362_v4 }
 0x216   : > { %4768 = vmatprep.mubr.f32.mxu0 %v6652_v43  ;;  %v1858_v43 = vld [vmem:[#allocation2 + $0x220] sm:$0xff] }
 0x217   : > { %2001 = vmatmul.mubr.f32.gmra.mrb[62].mxu1 %v6736_v24 }
 0x218   : > { %2005 = vmatprep.mubr.f32.mxu1 %v6738_v26 }
 0x219   : > { %4769 = vmatmul.mubr.f32.vlgmr.msra.gmra.mrb[60].mxu0 %v6657_v48  ;;  %v1861_v48 = vld [vmem:[#allocation2 + $0x238] sm:$0xff] }
 0x21a   : > { %4771 = vmatprep.mubr.f32.mxu0 %v6660_v51  ;;  %v1857_v51 = vld [vmem:[#allocation2 + $0x218] sm:$0xff] }
 0x21b   : > { %2006 = vmatmul.mubr.f32.gmra.mrb[64].mxu1 %v6743_v35 }
 0x21c   : > { %2010 = vmatprep.mubr.f32.mxu1 %v6745_v37 }
 0x21d   : > { %4772 = vmatmul.mubr.f32.gmra.mrb[62].mxu0 %v6665_v55 }
 0x21e   : > { %4774 = vmatprep.mubr.f32.mxu0 %v6668_v58 }
 0x21f   : > { %2011 = vmatmul.mubr.f32.gmra.mrb[66].mxu1 %v6750_v49 }
 0x220   : > { %2015 = vmatprep.mubr.f32.mxu1 %v6752_v0 }
 0x221   : > { %4775 = vmatmul.mubr.f32.gmra.mrb[64].mxu0 %v6673_v63  ;;  %v1856_v63 = vld [vmem:[#allocation2 + $0x210] sm:$0xff] }
 0x222   : > { %4777 = vmatprep.mubr.f32.mxu0 %v6676_v3  ;;  %v1860_v3 = vld [vmem:[#allocation2 + $0x230] sm:$0xff] }
 0x223   : > { %2016 = vmatmul.mubr.f32.gmra.mrb[68].mxu1 %v6759_v60 }
 0x224   : > { %2020 = vmatprep.mubr.f32.mxu1 %v6761_v61 }
 0x225   : > { %4778 = vmatmul.mubr.f32.gmra.mrb[66].mxu0 %v6681_v8 }
 0x226   : > { %4780 = vmatprep.mubr.f32.mxu0 %v6684_v11 }
 0x227   : > { %2021 = vmatmul.mubr.f32.gmra.mrb[70].mxu1 %v6767_v6 }
 0x228   : > { %2025 = vmatprep.mubr.f32.mxu1 %v6770_v7 }
 0x229   : > { %4781 = vmatmul.mubr.f32.gmra.mrb[68].mxu0 %v6689_v16  ;;  %v1859_v16 = vld [vmem:[#allocation2 + $0x228] sm:$0xff] }
 0x22a   : > { %4783 = vmatprep.mubr.f32.mxu0 %v6692_v21 }
 0x22b   : > { %2026 = vmatmul.mubr.f32.gmra.mrb[72].mxu1 %v6776_v13 }
 0x22c   : > { %2030 = vmatprep.mubr.f32.mxu1 %v6779_v17 }
 0x22d   : > { %4784 = vmatmul.mubr.f32.gmra.mrb[70].mxu0 %v6697_v25 }
 0x22e   : > { %4786 = vmatprep.mubr.f32.mxu0 %v6700_v30 }
 0x22f   : > { %2031 = vmatmul.mubr.f32.gmra.mrb[74].mxu1 %v6785_v19 }
 0x230   : > { %2035 = vmatprep.mubr.f32.mxu1 %v6788_v20 }
 0x231   : > { %4787 = vmatmul.mubr.f32.gmra.mrb[72].mxu0 %v6704_v36 }
 0x232   : > { %4789 = vmatprep.mubr.f32.mxu0 %v6707_v44 }
 0x233   : > { %2036 = vmatmul.mubr.f32.gmra.mrb[76].mxu1 %v6794_v27 }
 0x234   : > { %2040 = vmatprep.mubr.f32.mxu1 %v6797_v28 }
 0x235   : > { %4790 = vmatmul.mubr.f32.gmra.mrb[74].mxu0 %v6711_v50 }
 0x236   : > { %4792 = vmatprep.mubr.f32.mxu0 %v1359_v32 }
 0x237   : > { %2041 = vmatmul.mubr.f32.gmra.mrb[78].mxu1 %v6803_v33 }
 0x238   : > { %2045 = vmatprep.mubr.f32.mxu1 %v6806_v38 }
 0x239   : > { %4793 = vmatmul.mubr.f32.gmra.mrb[76].mxu0 %v1362_v4 }
 0x23a   : > { %4795 = vmatprep.mubr.f32.mxu0 %v1858_v43 }
 0x23b   : > { %2046 = vmatmul.mubr.f32.gmra.mrb[80].mxu1 %v6812_v46 }
 0x23c   : > { %2050 = vmatprep.mubr.f32.mxu1 %v6815_v47 }
 0x23d   : > { %4796 = vmatmul.mubr.f32.gmra.mrb[78].mxu0 %v1861_v48 }
 0x23f   : > { %2051 = vmatmul.mubr.f32.gmra.mrb[82].mxu1 %v6821_v62 }
 0x240   : > { %2055 = vmatprep.mubr.f32.mxu1 %v6824_v1 }
 0x243   : > { %2056 = vmatmul.mubr.f32.gmra.mrb[84].mxu1 %v6830_v12 }
 0x244   : > { %2060 = vmatprep.mubr.f32.mxu1 %v6833_v56 }
 0x247   : > { %2061 = vmatmul.mubr.f32.gmra.mrb[86].mxu1 %v6839_v22 }
 0x248   : > { %2065 = vmatprep.mubr.f32.mxu1 %v6842_v23 }
 0x24b   : > { %2066 = vmatmul.mubr.f32.gmra.mrb[88].mxu1 %v6848_v41 }
 0x24c   : > { %2070 = vmatprep.mubr.f32.mxu1 %v6851_v42 }
 0x24f   : > { %2071 = vmatmul.mubr.f32.gmra.mrb[90].mxu1 %v6857_v59 }
 0x250   : > { %2075 = vmatprep.mubr.f32.mxu1 %v6892_v52 }
 0x253   : > { %2076 = vmatmul.mubr.f32.gmra.mrb[92].mxu1 %v6897_v18 }
 0x254   : > { %2080 = vmatprep.mubr.f32.mxu1 %v6900_v29 }
 0x256   : > { %v4646_v55 = vpop.f32.mrb[0].mxu1 }
 0x257   : > { %v1163_v58 = vpop.f32.mrb[1].mxu1  ;;  %2081 = vmatmul.mubr.f32.gmra.mrb[94].mxu1 %v6905_v31 }
 0x258   : > { %2085 = vmatprep.mubr.f32.mxu1 %v1857_v51 }
 0x25a   : > { %v4649_v8 = vpop.f32.mrb[2].mxu1 }
 0x25b   : > { %2086 = vmatmul.mubr.f32.gmra.mrb[96].mxu1 %v1856_v63  ;;  %v1173_v11 = vpop.f32.mrb[3].mxu1 }
 0x25c   : > { %2090 = vmatprep.mubr.f32.mxu1 %v1860_v3 }
 0x25e   : > { %v4652_v21 = vpop.f32.mrb[4].mxu1 }
 0x25f   : > { %2091 = vmatmul.mubr.f32.gmra.mrb[98].mxu1 %v1859_v16  ;;  %v1183_v25 = vpop.f32.mrb[5].mxu1 }
 0x262   : > { %v4655_v30 = vpop.f32.mrb[6].mxu1 }
 0x263   : > { %v1193_v36 = vpop.f32.mrb[7].mxu1 }
 0x266   : > { %v4658_v44 = vpop.f32.mrb[8].mxu1 }
 0x267   : > { %v1203_v50 = vpop.f32.mrb[9].mxu1 }
 0x26a   : > { %v4661_v5 = vpop.f32.mrb[10].mxu1 }
 0x26b   : > { %v1213_v14 = vpop.f32.mrb[11].mxu1 }
 0x26e   : > { %v4664_v15 = vpop.f32.mrb[12].mxu1 }
 0x26f   : > { %v1223_v24 = vpop.f32.mrb[13].mxu1 }
 0x272   : > { %v6963_v26 = vpop.f32.mrb[14].mxu1 }
 0x273   : > { %v1233_v35 = vpop.f32.mrb[15].mxu1 }
 0x274   : > { %v998_v37 = vpop.f32.mrb[0].mxu0 }
 0x275   : > { %v6965_v49 = vadd.f32 %v1163_v58, %v998_v37  ;;  %v1000_v0 = vpop.f32.mrb[1].mxu0 }
 0x276   : > { %v6967_v60 = vpop.f32.mrb[16].mxu1 }
 0x277   : > { %v6969_v61 = vpop.f32.mrb[17].mxu1 }
 0x278   : > { %v1003_v6 = vpop.f32.mrb[2].mxu0 }
 0x279   : > { %v6971_v7 = vadd.f32 %v4646_v55, %v1003_v6  ;;  %v1005_v13 = vpop.f32.mrb[3].mxu0 }
 0x27a   : > { %v6973_v17 = vpop.f32.mrb[18].mxu1 }
 0x27b   : > { %v6975_v19 = vpop.f32.mrb[19].mxu1 }
 0x27c   : > { %v1008_v20 = vpop.f32.mrb[4].mxu0 }
 0x27d   : > { %v6977_v27 = vadd.f32 %v1173_v11, %v1008_v20  ;;  %v1010_v28 = vpop.f32.mrb[5].mxu0 }
 0x280   : > { %v1013_v33 = vpop.f32.mrb[6].mxu0 }
 0x281   : > { %v6979_v38 = vadd.f32 %v4649_v8, %v1013_v33  ;;  %v1015_v46 = vpop.f32.mrb[7].mxu0 }
 0x284   : > { %v1018_v47 = vpop.f32.mrb[8].mxu0 }
 0x285   : > { %v6981_v62 = vadd.f32 %v1183_v25, %v1018_v47  ;;  %v1020_v1 = vpop.f32.mrb[9].mxu0 }
 0x288   : > { %v1023_v12 = vpop.f32.mrb[10].mxu0 }
 0x289   : > { %v6983_v56 = vadd.f32 %v4652_v21, %v1023_v12  ;;  %v1025_v22 = vpop.f32.mrb[11].mxu0 }
 0x28c   : > { %v1028_v23 = vpop.f32.mrb[12].mxu0 }
 0x28d   : > { %v6985_v41 = vadd.f32 %v1193_v36, %v1028_v23  ;;  %v1030_v42 = vpop.f32.mrb[13].mxu0 }
 0x290   : > { %v1033_v59 = vpop.f32.mrb[14].mxu0 }
 0x291   : > { %v6987_v45 = vadd.f32 %v4655_v30, %v1033_v59  ;;  %v1035_v53 = vpop.f32.mrb[15].mxu0 }
 0x294   : > { %v1038_v54 = vpop.f32.mrb[16].mxu0 }
 0x295   : > { %v6989_v34 = vadd.f32 %v1203_v50, %v1038_v54  ;;  %v1040_v2 = vpop.f32.mrb[17].mxu0 }
 0x296   : > { %v6991_v9 = vpop.f32.mrb[20].mxu1 }
 0x297   : > { %v1500_v39 = vpop.f32.mrb[21].mxu1 }
 0x298   : > { %v1043_v40 = vpop.f32.mrb[18].mxu0 }
 0x299   : > { %v6993_v10 = vadd.f32 %v4658_v44, %v1043_v40  ;;  %v1045_v52 = vpop.f32.mrb[19].mxu0 }
 0x29a   : > { %v1503_v57 = vpop.f32.mrb[22].mxu1 }
 0x29b   : > { %v1505_v18 = vpop.f32.mrb[23].mxu1 }
 0x29c   : > { %v1048_v29 = vpop.f32.mrb[20].mxu0 }
 0x29d   : > { %v6995_v31 = vadd.f32 %v1213_v14, %v1048_v29  ;;  %v1050_v32 = vpop.f32.mrb[21].mxu0 }
 0x29e   : > { %v6997_v4 = vpop.f32.mrb[24].mxu1 }
 0x29f   : > { %v1510_v43 = vpop.f32.mrb[25].mxu1 }
 0x2a0   : > { %v1053_v48 = vpop.f32.mrb[22].mxu0 }
 0x2a1   : > { %v6999_v51 = vadd.f32 %v4661_v5, %v1053_v48  ;;  %v1055_v55 = vpop.f32.mrb[23].mxu0 }
 0x2a2   : > { %v1513_v58 = vpop.f32.mrb[26].mxu1 }
 0x2a3   : > { %v1515_v63 = vpop.f32.mrb[27].mxu1 }
 0x2a4   : > { %v1058_v3 = vpop.f32.mrb[24].mxu0 }
 0x2a5   : > { %v7001_v8 = vadd.f32 %v1223_v24, %v1058_v3  ;;  %v1060_v11 = vpop.f32.mrb[25].mxu0 }
 0x2a6   : > { %v7003_v16 = vpop.f32.mrb[28].mxu1 }
 0x2a7   : > { %v1520_v21 = vpop.f32.mrb[29].mxu1 }
 0x2a8   : > { %v1063_v25 = vpop.f32.mrb[26].mxu0 }
 0x2a9   : > { %v7005_v30 = vadd.f32 %v4664_v15, %v1063_v25  ;;  %v1065_v36 = vpop.f32.mrb[27].mxu0 }
 0x2aa   : > { %v1523_v44 = vpop.f32.mrb[30].mxu1 }
 0x2ab   : > { %v1525_v50 = vpop.f32.mrb[31].mxu1 }
 0x2ac   : > { %v1068_v14 = vpop.f32.mrb[28].mxu0 }
 0x2ad   : > { %v7007_v37 = vadd.f32 %v1233_v35, %v1068_v14  ;;  %v1070_v5 = vpop.f32.mrb[29].mxu0 }
 0x2ae   : > { %v7009_v0 = vpop.f32.mrb[32].mxu1 }
 0x2af   : > { %v1530_v6 = vpop.f32.mrb[33].mxu1 }
 0x2b0   : > { %v1073_v13 = vpop.f32.mrb[30].mxu0 }
 0x2b1   : > { %v7012_v24 = vadd.f32 %v6963_v26, %v1073_v13  ;;  %v1075_v20 = vpop.f32.mrb[31].mxu0 }
 0x2b2   : > { %v1533_v28 = vpop.f32.mrb[34].mxu1 }
 0x2b3   : > { %v1535_v33 = vpop.f32.mrb[35].mxu1 }
 0x2b4   : > { %v1078_v46 = vpop.f32.mrb[32].mxu0 }
 0x2b5   : > { %v7015_v15 = vadd.f32 %v6969_v61, %v1078_v46  ;;  %v1080_v47 = vpop.f32.mrb[33].mxu0 }
 0x2b6   : > { %v7017_v1 = vpop.f32.mrb[36].mxu1 }
 0x2b7   : > { %v1540_v35 = vpop.f32.mrb[37].mxu1 }
 0x2b8   : > { %v1083_v12 = vpop.f32.mrb[34].mxu0 }
 0x2b9   : > { %v7020_v22 = vadd.f32 %v6967_v60, %v1083_v12  ;;  %v1085_v23 = vpop.f32.mrb[35].mxu0  ;;  %v7033_v60 = vld [vmem:[%s7802_s3] ss:$0 sm:$0xff] }
 0x2ba   : > { %v1543_v42 = vpop.f32.mrb[38].mxu1  ;;  %v1262_v55 = vadd.f32 %v7033_v60, %v6965_v49  ;;  %v1265_v36 = vadd.f32 %v7033_v60, %v6979_v38  ;;  %v1267_v20 = vadd.f32 %v7033_v60, %v6983_v56  ;;  %v1266_v38 = vadd.f32 %v7033_v60, %v6981_v62 }
 0x2bb   : > { %v1545_v59 = vpop.f32.mrb[39].mxu1  ;;  %v1269_v23 = vadd.f32 %v7033_v60, %v6987_v45  ;;  %v1268_v56 = vadd.f32 %v7033_v60, %v6985_v41  ;;  %v1270_v45 = vadd.f32 %v7033_v60, %v6989_v34 }
 0x2bc   : > { %v1088_v26 = vpop.f32.mrb[36].mxu0 }
 0x2bd   : > { %v7023_v53 = vadd.f32 %v6975_v19, %v1088_v26  ;;  %v1090_v54 = vpop.f32.mrb[37].mxu0  ;;  %v1263_v19 = vadd.f32 %v7033_v60, %v6971_v7  ;;  %v1264_v7 = vadd.f32 %v7033_v60, %v6977_v27 }
 0x2be   : > { %v7025_v2 = vpop.f32.mrb[40].mxu1 }
 0x2bf   : > { %v1550_v61 = vpop.f32.mrb[41].mxu1 }
 0x2c0   : > { %v1093_v39 = vpop.f32.mrb[38].mxu0 }
 0x2c1   : > { %v7028_v40 = vadd.f32 %v6973_v17, %v1093_v39  ;;  %v1095_v52 = vpop.f32.mrb[39].mxu0 }
 0x2c2   : > { %v1553_v18 = vpop.f32.mrb[42].mxu1  ;;  %v1271_v52 = vadd.f32 %v7033_v60, %v6993_v10  ;;  %v1272_v10 = vadd.f32 %v7033_v60, %v6995_v31 }
 0x2c3   : > { %v1555_v29 = vpop.f32.mrb[43].mxu1 }
 0x2c4   : > { %v4708_v32 = vpop.f32.mrb[40].mxu0 }
 0x2c5   : > { %v1669_v43 = vadd.f32 %v4708_v32, %v1503_v57  ;;  %v1663_v48 = vpop.f32.mrb[41].mxu0 }
 0x2c6   : > { %v1558_v63 = vpop.f32.mrb[44].mxu1  ;;  %v1664_v17 = vadd.f32 %v1663_v48, %v6991_v9 }
 0x2c7   : > { %v7040_v3 = vadd.f32 %v1669_v43, %v1263_v19  ;;  %v1560_v11 = vpop.f32.mrb[45].mxu1 }
 0x2c8   : > { %v7042_v21 = vadd.f32 %v1664_v17, %v1262_v55  ;;  %v4711_v25 = vpop.f32.mrb[42].mxu0  ;;  %v1273_v55 = vadd.f32 %v7033_v60, %v6999_v51  ;;  %v1274_v51 = vadd.f32 %v7033_v60, %v7001_v8 }
 0x2c9   : > { %v1679_v50 = vadd.f32 %v4711_v25, %v1513_v58  ;;  %v1673_v14 = vpop.f32.mrb[43].mxu0 }
 0x2ca   : > { %v1563_v57 = vpop.f32.mrb[46].mxu1  ;;  %v1674_v49 = vadd.f32 %v1673_v14, %v6997_v4  ;;  %v1275_v14 = vadd.f32 %v7033_v60, %v7005_v30  ;;  %v1276_v30 = vadd.f32 %v7033_v60, %v7007_v37 }
 0x2cb   : > { %v7049_v5 = vadd.f32 %v1679_v50, %v1265_v36  ;;  %v1565_v9 = vpop.f32.mrb[47].mxu1 }
 0x2cc   : > { %v7051_v6 = vadd.f32 %v1674_v49, %v1264_v7  ;;  %v4714_v13 = vpop.f32.mrb[44].mxu0 }
 0x2cd   : > { %v1689_v33 = vadd.f32 %v4714_v13, %v1523_v44  ;;  %v1683_v46 = vpop.f32.mrb[45].mxu0 }
 0x2ce   : > { %v1568_v58 = vpop.f32.mrb[48].mxu1  ;;  %v1684_v27 = vadd.f32 %v1683_v46, %v7003_v16 }
 0x2cf   : > { %v7058_v47 = vadd.f32 %v1689_v33, %v1267_v20  ;;  %v1570_v4 = vpop.f32.mrb[49].mxu1  ;;  %v1277_v33 = vadd.f32 %v7033_v60, %v7012_v24  ;;  %v1278_v24 = vadd.f32 %v7033_v60, %v7015_v15 }
 0x2d0   : > { %v7060_v35 = vadd.f32 %v1684_v27, %v1266_v38  ;;  %v4717_v12 = vpop.f32.mrb[46].mxu0 }
 0x2d1   : > { %v1699_v59 = vadd.f32 %v4717_v12, %v1533_v28  ;;  %v1693_v26 = vpop.f32.mrb[47].mxu0 }
 0x2d2   : > { %v1573_v44 = vpop.f32.mrb[50].mxu1  ;;  %v1694_v62 = vadd.f32 %v1693_v26, %v7009_v0 }
 0x2d3   : > { %v7067_v54 = vadd.f32 %v1699_v59, %v1269_v23  ;;  %v1575_v16 = vpop.f32.mrb[51].mxu1  ;;  %v1279_v23 = vadd.f32 %v7033_v60, %v7020_v22  ;;  %v1280_v22 = vadd.f32 %v7033_v60, %v7023_v53 }
 0x2d4   : > { %v7069_v61 = vadd.f32 %v1694_v62, %v1268_v56  ;;  %v4720_v39 = vpop.f32.mrb[48].mxu0 }
 0x2d5   : > { %v1709_v29 = vadd.f32 %v4720_v39, %v1543_v42  ;;  %v1703_v32 = vpop.f32.mrb[49].mxu0  ;;  %v1281_v39 = vadd.f32 %v7033_v60, %v7028_v40 }
 0x2d6   : > { %v1578_v28 = vpop.f32.mrb[52].mxu1  ;;  %v1704_v41 = vadd.f32 %v1703_v32, %v7017_v1 }
 0x2d7   : > { %v7076_v19 = vadd.f32 %v1709_v29, %v1271_v52  ;;  %v1580_v0 = vpop.f32.mrb[53].mxu1 }
 0x2d8   : > { %v7078_v43 = vadd.f32 %v1704_v41, %v1270_v45  ;;  %v4723_v48 = vpop.f32.mrb[50].mxu0 }
 0x2d9   : > { %v1719_v17 = vadd.f32 %v4723_v48, %v1553_v18  ;;  %v1713_v11 = vpop.f32.mrb[51].mxu0 }
 0x2da   : > { %v1583_v42 = vpop.f32.mrb[54].mxu1  ;;  %v1714_v34 = vadd.f32 %v1713_v11, %v7025_v2 }
 0x2db   : > { %v7085_v25 = vadd.f32 %v1719_v17, %v1273_v55  ;;  %v1585_v1 = vpop.f32.mrb[55].mxu1 }
 0x2dc   : > { %v7087_v36 = vadd.f32 %v1714_v34, %v1272_v10  ;;  %v4726_v50 = vpop.f32.mrb[52].mxu0 }
 0x2dd   : > { %v1729_v7 = vadd.f32 %v4726_v50, %v1563_v57  ;;  %v1723_v49 = vpop.f32.mrb[53].mxu0 }
 0x2de   : > { %v1588_v18 = vpop.f32.mrb[56].mxu1  ;;  %v1724_v9 = vadd.f32 %v1723_v49, %v1558_v63 }
 0x2df   : > { %v7093_v31 = vadd.f32 %v1729_v7, %v1275_v14  ;;  %v1590_v13 = vpop.f32.mrb[57].mxu1 }
 0x2e0   : > { %v7095_v2 = vadd.f32 %v1724_v9, %v1274_v51  ;;  %v4729_v20 = vpop.f32.mrb[54].mxu0 }
 0x2e1   : > { %v1739_v46 = vadd.f32 %v4729_v20, %v1573_v44  ;;  %v1733_v38 = vpop.f32.mrb[55].mxu0 }
 0x2e2   : > { %v1593_v57 = vpop.f32.mrb[58].mxu1  ;;  %v1734_v27 = vadd.f32 %v1733_v38, %v1568_v58 }
 0x2e3   : > { %v7101_v4 = vadd.f32 %v1739_v46, %v1277_v33  ;;  %v1595_v8 = vpop.f32.mrb[59].mxu1 }
 0x2e4   : > { %v7103_v63 = vadd.f32 %v1734_v27, %v1276_v30  ;;  %v4732_v12 = vpop.f32.mrb[56].mxu0 }
 0x2e5   : > { %v1749_v59 = vadd.f32 %v4732_v12, %v1583_v42  ;;  %v1743_v26 = vpop.f32.mrb[57].mxu0 }
 0x2e6   : > { %v1744_v56 = vadd.f32 %v1743_v26, %v1578_v28  ;;  %v1997_v44 = vpop.f32.mrb[60].mxu1 }
 0x2e7   : > { %v7109_v62 = vadd.f32 %v1749_v59, %v1279_v23  ;;  %v1999_v37 = vpop.f32.mrb[61].mxu1 }
 0x2e8   : > { %v7111_v58 = vadd.f32 %v1744_v56, %v1278_v24  ;;  %v4735_v16 = vpop.f32.mrb[58].mxu0 }
 0x2e9   : > { %v1759_v52 = vadd.f32 %v4735_v16, %v1593_v57  ;;  %v1753_v29 = vpop.f32.mrb[59].mxu0 }
 0x2ea   : > { %v1754_v32 = vadd.f32 %v1753_v29, %v1588_v18  ;;  %v2002_v45 = vpop.f32.mrb[62].mxu1 }
 0x2eb   : > { %v7117_v41 = vadd.f32 %v1759_v52, %v1281_v39  ;;  %v2004_v15 = vpop.f32.mrb[63].mxu1 }
 0x2ec   : > { %v7119_v28 = vadd.f32 %v1754_v32, %v1280_v22  ;;  %v4770_v0 = vpop.f32.mrb[60].mxu0 }
 0x2ed   : > { %v2168_v48 = vadd.f32 %v4770_v0, %v2002_v45  ;;  %v2162_v55 = vpop.f32.mrb[61].mxu0 }
 0x2ee   : > { %v2007_v17 = vpop.f32.mrb[64].mxu1  ;;  %v2163_v11 = vadd.f32 %v2162_v55, %v1997_v44 }
 0x2ef   : > { %v2262_v10 = vadd.f32 %v2168_v48, %v7040_v3  ;;  %v2009_v40 = vpop.f32.mrb[65].mxu1 }
 0x2f0   : > { %v2261_v42 = vadd.f32 %v2163_v11, %v7042_v21  ;;  %v4773_v34 = vpop.f32.mrb[62].mxu0 }
 0x2f1   : > { %v2322_v1 = vmax.f32 %v2262_v10, 0.0  ;;  %v2172_v53 = vpop.f32.mrb[63].mxu0 }
 0x2f2   : > { %v2321_v60 = vmax.f32 %v2261_v42, 0.0  ;;  %v2012_v50 = vpop.f32.mrb[66].mxu1  ;;  %v2173_v14 = vadd.f32 %v2172_v53, %v2007_v17 }
 0x2f3   : > { %v2382_v7 = vrot.slane %v2322_v1, 7  ;;  %2452 = vst [vmem:[#allocation3 + $0x20] sm:$0xff] %v2322_v1  ;;  %v2472_v49 = vrot.slane %v2322_v1, 1  ;;  %v2178_v51 = vadd.f32 %v4773_v34, %v2012_v50  ;;  %v2014_v18 = vpop.f32.mrb[67].mxu1 }
 0x2f4   : > { %v2381_v9 = vrot.slane %v2321_v60, 7  ;;  %2451 = vst [vmem:[#allocation3 + $0x8] sm:$0xff] %v2321_v60  ;;  %v2471_v13 = vrot.slane %v2321_v60, 1  ;;  %v2263_v20 = vadd.f32 %v2173_v14, %v7051_v6  ;;  %v4776_v3 = vpop.f32.mrb[64].mxu0 }
 0x2f5   : > { %2522 = vst [vmem:[#allocation3 + $0x28] sm:$0x7f] %v2472_v49  ;;  %v2264_v21 = vadd.f32 %v2178_v51, %v7049_v5  ;;  %v2182_v33 = vpop.f32.mrb[65].mxu0 }
 0x2f6   : > { %v2383_v46 = vsel %vm524_vm0, %v2381_v9, %v2382_v7  ;;  %2431 = vst [vmem:[#allocation3] sm:$0xfe] %v2381_v9  ;;  %v2473_v38 = vsel %vm598_vm1, %v2471_v13, %v2472_v49  ;;  %v2323_v30 = vmax.f32 %v2263_v20, 0.0  ;;  %v2017_v57 = vpop.f32.mrb[68].mxu1 }
 0x2f7   : > { %2432 = vst [vmem:[#allocation3 + $0x18] sm:$0xff] %v2383_v46  ;;  %2521 = vst [vmem:[#allocation3 + $0x10] sm:$0xff] %v2473_v38  ;;  %v2324_v27 = vmax.f32 %v2264_v21, 0.0  ;;  %v2183_v8 = vadd.f32 %v2182_v33, %v2017_v57  ;;  %v2019_v12 = vpop.f32.mrb[69].mxu1 }
 0x2f8   : > { %v2384_v23 = vrot.slane %v2323_v30, 7  ;;  %2453 = vst [vmem:[#allocation3 + $0x38] sm:$0xff] %v2323_v30  ;;  %v2474_v6 = vrot.slane %v2323_v30, 1  ;;  %v4779_v59 = vpop.f32.mrb[66].mxu0 }
 0x2f9   : > { %v2385_v26 = vrot.slane %v2324_v27, 7  ;;  %2454 = vst [vmem:[#allocation3 + $0x50] sm:$0xff] %v2324_v27  ;;  %v2475_v5 = vrot.slane %v2324_v27, 1  ;;  %v2265_v24 = vadd.f32 %v2183_v8, %v7060_v35  ;;  %v2192_v56 = vpop.f32.mrb[67].mxu0 }
 0x2fa   : > { %2433 = vst [vmem:[#allocation3 + $0x30] sm:$0xfe] %v2384_v23  ;;  %v2022_v44 = vpop.f32.mrb[70].mxu1 }
 0x2fb   : > { %2524 = vst [vmem:[#allocation3 + $0x58] sm:$0x7f] %v2475_v5  ;;  %v2386_v37 = vsel %vm524_vm0, %v2384_v23, %v2385_v26  ;;  %v2476_v16 = vsel %vm598_vm1, %v2474_v6, %v2475_v5  ;;  %v2325_v39 = vmax.f32 %v2265_v24, 0.0  ;;  %v2188_v52 = vadd.f32 %v4776_v3, %v2022_v44  ;;  %v2024_v29 = vpop.f32.mrb[71].mxu1 }
 0x2fc   : > { %2434 = vst [vmem:[#allocation3 + $0x48] sm:$0xff] %v2386_v37  ;;  %2523 = vst [vmem:[#allocation3 + $0x40] sm:$0xff] %v2476_v16  ;;  %v4782_v22 = vpop.f32.mrb[68].mxu0 }
 0x2fd   : > { %v2387_v32 = vrot.slane %v2325_v39, 7  ;;  %2455 = vst [vmem:[#allocation3 + $0x68] sm:$0xff] %v2325_v39  ;;  %v2266_v45 = vadd.f32 %v2188_v52, %v7058_v47  ;;  %v2202_v15 = vpop.f32.mrb[69].mxu0  ;;  %v2477_v11 = vrot.slane %v2325_v39, 1 }
 0x2fe   : > { %v2027_v35 = vpop.f32.mrb[72].mxu1 }
 0x2ff   : > { %2435 = vst [vmem:[#allocation3 + $0x60] sm:$0xfe] %v2387_v32  ;;  %v2326_v0 = vmax.f32 %v2266_v45, 0.0  ;;  %v2193_v48 = vadd.f32 %v2192_v56, %v2027_v35  ;;  %v2029_v55 = vpop.f32.mrb[73].mxu1 }
 0x300   : > { %v7131_v17 = vpop.f32.mrb[70].mxu0 }
 0x301   : > { %v2388_v10 = vrot.slane %v2326_v0, 7  ;;  %2456 = vst [vmem:[#allocation3 + $0x80] sm:$0xff] %v2326_v0  ;;  %v2478_v40 = vrot.slane %v2326_v0, 1  ;;  %v2267_v42 = vadd.f32 %v2193_v48, %v7069_v61  ;;  %v2212_v34 = vpop.f32.mrb[71].mxu0 }
 0x302   : > { %v2032_v1 = vpop.f32.mrb[74].mxu1 }
 0x303   : > { %v2389_v53 = vsel %vm524_vm0, %v2387_v32, %v2388_v10  ;;  %v2479_v47 = vsel %vm598_vm1, %v2477_v11, %v2478_v40  ;;  %2526 = vst [vmem:[#allocation3 + $0x88] sm:$0x7f] %v2478_v40  ;;  %v2327_v60 = vmax.f32 %v2267_v42, 0.0  ;;  %v2198_v50 = vadd.f32 %v4779_v59, %v2032_v1  ;;  %v2034_v14 = vpop.f32.mrb[75].mxu1 }
 0x304   : > { %2436 = vst [vmem:[#allocation3 + $0x78] sm:$0xff] %v2389_v53  ;;  %2525 = vst [vmem:[#allocation3 + $0x70] sm:$0xff] %v2479_v47  ;;  %v7136_v7 = vpop.f32.mrb[72].mxu0 }
 0x305   : > { %v2390_v49 = vrot.slane %v2327_v60, 7  ;;  %2457 = vst [vmem:[#allocation3 + $0x98] sm:$0xff] %v2327_v60  ;;  %v2268_v51 = vadd.f32 %v2198_v50, %v7067_v54  ;;  %v2222_v18 = vpop.f32.mrb[73].mxu0  ;;  %v2480_v21 = vrot.slane %v2327_v60, 1 }
 0x306   : > { %v2037_v61 = vpop.f32.mrb[76].mxu1 }
 0x307   : > { %2437 = vst [vmem:[#allocation3 + $0x90] sm:$0xfe] %v2390_v49  ;;  %v2328_v9 = vmax.f32 %v2268_v51, 0.0  ;;  %v2203_v13 = vadd.f32 %v2202_v15, %v2037_v61  ;;  %v2039_v20 = vpop.f32.mrb[77].mxu1 }
 0x308   : > { %v7139_v3 = vpop.f32.mrb[74].mxu0 }
 0x309   : > { %v2391_v33 = vrot.slane %v2328_v9, 7  ;;  %2458 = vst [vmem:[#allocation3 + $0xb0] sm:$0xff] %v2328_v9  ;;  %v2481_v46 = vrot.slane %v2328_v9, 1  ;;  %v2269_v38 = vadd.f32 %v2203_v13, %v7078_v43  ;;  %v7142_v30 = vpop.f32.mrb[75].mxu0 }
 0x30a   : > { %v2042_v57 = vpop.f32.mrb[78].mxu1 }
 0x30b   : > { %v2392_v27 = vsel %vm524_vm0, %v2390_v49, %v2391_v33  ;;  %v2482_v54 = vsel %vm598_vm1, %v2480_v21, %v2481_v46  ;;  %2528 = vst [vmem:[#allocation3 + $0xb8] sm:$0x7f] %v2481_v46  ;;  %v2329_v8 = vmax.f32 %v2269_v38, 0.0  ;;  %v2208_v12 = vadd.f32 %v4782_v22, %v2042_v57  ;;  %v2044_v23 = vpop.f32.mrb[79].mxu1 }
 0x30c   : > { %2438 = vst [vmem:[#allocation3 + $0xa8] sm:$0xff] %v2392_v27  ;;  %2527 = vst [vmem:[#allocation3 + $0xa0] sm:$0xff] %v2482_v54  ;;  %v7146_v6 = vpop.f32.mrb[76].mxu0 }
 0x30d   : > { %v2393_v59 = vrot.slane %v2329_v8, 7  ;;  %2459 = vst [vmem:[#allocation3 + $0xc8] sm:$0xff] %v2329_v8  ;;  %v2270_v26 = vadd.f32 %v2208_v12, %v7076_v19  ;;  %v7149_v43 = vpop.f32.mrb[77].mxu0  ;;  %v2483_v16 = vrot.slane %v2329_v8, 1 }
 0x30e   : > { %v2047_v5 = vpop.f32.mrb[80].mxu1 }
 0x30f   : > { %2439 = vst [vmem:[#allocation3 + $0xc0] sm:$0xfe] %v2393_v59  ;;  %v2330_v24 = vmax.f32 %v2270_v26, 0.0  ;;  %v2213_v56 = vadd.f32 %v2212_v34, %v2047_v5  ;;  %v2049_v44 = vpop.f32.mrb[81].mxu1 }
 0x310   : > { %v7151_v37 = vpop.f32.mrb[78].mxu0 }
 0x311   : > { %v2394_v39 = vrot.slane %v2330_v24, 7  ;;  %2460 = vst [vmem:[#allocation3 + $0xe0] sm:$0xff] %v2330_v24  ;;  %v2484_v52 = vrot.slane %v2330_v24, 1  ;;  %v2271_v29 = vadd.f32 %v2213_v56, %v7087_v36  ;;  %v7154_v22 = vpop.f32.mrb[79].mxu0 }
 0x312   : > { %v2052_v32 = vpop.f32.mrb[82].mxu1 }
 0x313   : > { %v2395_v19 = vsel %vm524_vm0, %v2393_v59, %v2394_v39  ;;  %v2485_v45 = vsel %vm598_vm1, %v2483_v16, %v2484_v52  ;;  %2530 = vst [vmem:[#allocation3 + $0xe8] sm:$0x7f] %v2484_v52  ;;  %v2331_v15 = vmax.f32 %v2271_v29, 0.0  ;;  %v2218_v35 = vadd.f32 %v7131_v17, %v2052_v32  ;;  %v2054_v0 = vpop.f32.mrb[83].mxu1 }
 0x314   : > { %2440 = vst [vmem:[#allocation3 + $0xd8] sm:$0xff] %v2395_v19  ;;  %2529 = vst [vmem:[#allocation3 + $0xd0] sm:$0xff] %v2485_v45 }
 0x315   : > { %v2396_v48 = vrot.slane %v2331_v15, 7  ;;  %2461 = vst [vmem:[#allocation3 + $0xf8] sm:$0xff] %v2331_v15  ;;  %v2272_v55 = vadd.f32 %v2218_v35, %v7085_v25  ;;  %v2486_v42 = vrot.slane %v2331_v15, 1 }
 0x316   : > { %v2057_v11 = vpop.f32.mrb[84].mxu1 }
 0x317   : > { %2441 = vst [vmem:[#allocation3 + $0xf0] sm:$0xfe] %v2396_v48  ;;  %v2332_v36 = vmax.f32 %v2272_v55, 0.0  ;;  %v2223_v10 = vadd.f32 %v2222_v18, %v2057_v11  ;;  %v2059_v40 = vpop.f32.mrb[85].mxu1 }
 0x319   : > { %v2397_v34 = vrot.slane %v2332_v36, 7  ;;  %2462 = vst [vmem:[#allocation3 + $0x110] sm:$0xff] %v2332_v36  ;;  %v2487_v1 = vrot.slane %v2332_v36, 1  ;;  %v2273_v53 = vadd.f32 %v2223_v10, %v7095_v2 }
 0x31a   : > { %v2062_v47 = vpop.f32.mrb[86].mxu1 }
 0x31b   : > { %v2398_v17 = vsel %vm524_vm0, %v2396_v48, %v2397_v34  ;;  %v2488_v60 = vsel %vm598_vm1, %v2486_v42, %v2487_v1  ;;  %2532 = vst [vmem:[#allocation3 + $0x118] sm:$0x7f] %v2487_v1  ;;  %v2333_v50 = vmax.f32 %v2273_v53, 0.0  ;;  %v2228_v25 = vadd.f32 %v7136_v7, %v2062_v47  ;;  %v2064_v14 = vpop.f32.mrb[87].mxu1 }
 0x31c   : > { %2442 = vst [vmem:[#allocation3 + $0x108] sm:$0xff] %v2398_v17  ;;  %2531 = vst [vmem:[#allocation3 + $0x100] sm:$0xff] %v2488_v60 }
 0x31d   : > { %v2399_v49 = vrot.slane %v2333_v50, 7  ;;  %2463 = vst [vmem:[#allocation3 + $0x128] sm:$0xff] %v2333_v50  ;;  %v2274_v51 = vadd.f32 %v2228_v25, %v7093_v31  ;;  %v2489_v13 = vrot.slane %v2333_v50, 1 }
 0x31e   : > { %v2067_v18 = vpop.f32.mrb[88].mxu1 }
 0x31f   : > { %2443 = vst [vmem:[#allocation3 + $0x120] sm:$0xfe] %v2399_v49  ;;  %v2334_v61 = vmax.f32 %v2274_v51, 0.0  ;;  %v2233_v2 = vadd.f32 %v7142_v30, %v2067_v18  ;;  %v2069_v9 = vpop.f32.mrb[89].mxu1 }
 0x321   : > { %v2400_v20 = vrot.slane %v2334_v61, 7  ;;  %2464 = vst [vmem:[#allocation3 + $0x140] sm:$0xff] %v2334_v61  ;;  %v2490_v21 = vrot.slane %v2334_v61, 1  ;;  %v2275_v33 = vadd.f32 %v2233_v2, %v7103_v63 }
 0x322   : > { %v2072_v7 = vpop.f32.mrb[90].mxu1 }
 0x323   : > { %v2401_v46 = vsel %vm524_vm0, %v2399_v49, %v2400_v20  ;;  %v2491_v38 = vsel %vm598_vm1, %v2489_v13, %v2490_v21  ;;  %2534 = vst [vmem:[#allocation3 + $0x148] sm:$0x7f] %v2490_v21  ;;  %v2335_v57 = vmax.f32 %v2275_v33, 0.0  ;;  %v2238_v31 = vadd.f32 %v7139_v3, %v2072_v7  ;;  %v2074_v27 = vpop.f32.mrb[91].mxu1 }
 0x324   : > { %2444 = vst [vmem:[#allocation3 + $0x138] sm:$0xff] %v2401_v46  ;;  %2533 = vst [vmem:[#allocation3 + $0x130] sm:$0xff] %v2491_v38 }
 0x325   : > { %v2402_v30 = vrot.slane %v2335_v57, 7  ;;  %2465 = vst [vmem:[#allocation3 + $0x158] sm:$0xff] %v2335_v57  ;;  %v2276_v54 = vadd.f32 %v2238_v31, %v7101_v4  ;;  %v2492_v59 = vrot.slane %v2335_v57, 1 }
 0x326   : > { %v2077_v8 = vpop.f32.mrb[92].mxu1 }
 0x327   : > { %2445 = vst [vmem:[#allocation3 + $0x150] sm:$0xfe] %v2402_v30  ;;  %v2336_v12 = vmax.f32 %v2276_v54, 0.0  ;;  %v2243_v63 = vadd.f32 %v7149_v43, %v2077_v8  ;;  %v2079_v23 = vpop.f32.mrb[93].mxu1 }
 0x329   : > { %v2403_v26 = vrot.slane %v2336_v12, 7  ;;  %2466 = vst [vmem:[#allocation3 + $0x170] sm:$0xff] %v2336_v12  ;;  %v2493_v5 = vrot.slane %v2336_v12, 1  ;;  %v2277_v24 = vadd.f32 %v2243_v63, %v7111_v58 }
 0x32a   : > { %v2082_v3 = vpop.f32.mrb[94].mxu1 }
 0x32b   : > { %v2404_v56 = vsel %vm524_vm0, %v2402_v30, %v2403_v26  ;;  %v2494_v44 = vsel %vm598_vm1, %v2492_v59, %v2493_v5  ;;  %2536 = vst [vmem:[#allocation3 + $0x178] sm:$0x7f] %v2493_v5  ;;  %v2337_v16 = vmax.f32 %v2277_v24, 0.0  ;;  %v2248_v4 = vadd.f32 %v7146_v6, %v2082_v3  ;;  %v2084_v39 = vpop.f32.mrb[95].mxu1 }
 0x32c   : > { %2446 = vst [vmem:[#allocation3 + $0x168] sm:$0xff] %v2404_v56  ;;  %2535 = vst [vmem:[#allocation3 + $0x160] sm:$0xff] %v2494_v44 }
 0x32d   : > { %v2405_v43 = vrot.slane %v2337_v16, 7  ;;  %2467 = vst [vmem:[#allocation3 + $0x188] sm:$0xff] %v2337_v16  ;;  %v2278_v52 = vadd.f32 %v2248_v4, %v7109_v62  ;;  %v2495_v45 = vrot.slane %v2337_v16, 1 }
 0x32e   : > { %v2087_v29 = vpop.f32.mrb[96].mxu1 }
 0x32f   : > { %2447 = vst [vmem:[#allocation3 + $0x180] sm:$0xfe] %v2405_v43  ;;  %v2338_v32 = vmax.f32 %v2278_v52, 0.0  ;;  %v2253_v58 = vadd.f32 %v7154_v22, %v2087_v29  ;;  %v2089_v19 = vpop.f32.mrb[97].mxu1 }
 0x331   : > { %v2406_v15 = vrot.slane %v2338_v32, 7  ;;  %2468 = vst [vmem:[#allocation3 + $0x1a0] sm:$0xff] %v2338_v32  ;;  %v2496_v35 = vrot.slane %v2338_v32, 1  ;;  %v2279_v0 = vadd.f32 %v2253_v58, %v7119_v28 }
 0x332   : > { %v2092_v6 = vpop.f32.mrb[98].mxu1 }
 0x333   : > { %v2407_v48 = vsel %vm524_vm0, %v2405_v43, %v2406_v15  ;;  %v2497_v55 = vsel %vm598_vm1, %v2495_v45, %v2496_v35  ;;  %2538 = vst [vmem:[#allocation3 + $0x1a8] sm:$0x7f] %v2496_v35  ;;  %v2339_v11 = vmax.f32 %v2279_v0, 0.0  ;;  %v2258_v62 = vadd.f32 %v7151_v37, %v2092_v6  ;;  %v2094_v36 = vpop.f32.mrb[99].mxu1 }
 0x334   : > { %2448 = vst [vmem:[#allocation3 + $0x198] sm:$0xff] %v2407_v48  ;;  %2537 = vst [vmem:[#allocation3 + $0x190] sm:$0xff] %v2497_v55  ;;  %v5978_v37 = vmov (!%p4150_p12), 0.0  }
 0x335   : > { %v2408_v22 = vrot.slane %v2339_v11, 7  ;;  %2469 = vst [vmem:[#allocation3 + $0x1b8] sm:$0xff] %v2339_v11  ;;  %v2280_v10 = vadd.f32 %v2258_v62, %v7117_v41  ;;  %v2498_v42 = vrot.slane %v2339_v11, 1  ;;  %2544 = vst [vmem:[#allocation3] sm:$0xff] (!%p4150_p12), %v5978_v37 }
 0x336   : > { %2543 = sbr.rel (%p4150_p12) target bundleno = 829 (0x33d), region = 88  ;;  %2545 = vst [vmem:[#allocation3 + $0x8] sm:$0xff] (!%p4150_p12), %v5978_v37  ;;  %2546 = vst [vmem:[#allocation3 + $0x10] sm:$0xff] (!%p4150_p12), %v5978_v37 }
 0x337   : > { %2449 = vst [vmem:[#allocation3 + $0x1b0] sm:$0xfe] %v2408_v22  ;;  %v2340_v40 = vmax.f32 %v2280_v10, 0.0  ;;  %2547 = vst [vmem:[#allocation3 + $0x18] sm:$0xff] (!%p4150_p12), %v5978_v37 }
 0x338   : > { %2548 = vst [vmem:[#allocation3 + $0x20] sm:$0xff] (!%p4150_p12), %v5978_v37  ;;  %2549 = vst [vmem:[#allocation3 + $0x28] sm:$0xff] (!%p4150_p12), %v5978_v37 }
 0x339   : > { %v2409_v28 = vrot.slane %v2340_v40, 7  ;;  %2470 = vst [vmem:[#allocation3 + $0x1d0] sm:$0xff] %v2340_v40  ;;  %v2499_v34 = vrot.slane %v2340_v40, 1 }
 0x33b   : > { %v2410_v1 = vsel %vm524_vm0, %v2408_v22, %v2409_v28  ;;  %v2500_v53 = vsel %vm598_vm1, %v2498_v42, %v2499_v34  ;;  %2540 = vst [vmem:[#allocation3 + $0x1d8] sm:$0x7f] %v2499_v34 }
 0x33c   : > { %2450 = vst [vmem:[#allocation3 + $0x1c8] sm:$0xff] %v2410_v1  ;;  %2539 = vst [vmem:[#allocation3 + $0x1c0] sm:$0xff] %v2500_v53 }
 0x33d PF: > { %2552 = sbr.rel (%p4152_p0) target bundleno = 836 (0x344), region = 92  ;;  %v5979_v41 = vmov (!%p4152_p0), 0.0  }
 0x33e   : > { %2554 = vst [vmem:[#allocation3 + $0x1b0] sm:$0xff] (!%p4152_p0), %v5979_v41  ;;  %2555 = vst [vmem:[#allocation3 + $0x1b8] sm:$0xff] (!%p4152_p0), %v5979_v41 }
 0x33f   : > { %2556 = vst [vmem:[#allocation3 + $0x1c0] sm:$0xff] (!%p4152_p0), %v5979_v41  ;;  %2557 = vst [vmem:[#allocation3 + $0x1c8] sm:$0xff] (!%p4152_p0), %v5979_v41 }
 0x340   : > { %2558 = vst [vmem:[#allocation3 + $0x1d0] sm:$0xff] (!%p4152_p0), %v5979_v41  ;;  %2559 = vst [vmem:[#allocation3 + $0x1d8] sm:$0xff] (!%p4152_p0), %v5979_v41 }
 0x344 PF: > { %v2663_v47 = vld [vmem:[#allocation14 + $0x80] sm:$0xff]  ;;  %v2664_v17 = vld [vmem:[#allocation14 + $0x88] sm:$0xff]  ;;  %v2665_v61 = vld [vmem:[#allocation14 + $0x90] sm:$0xff]  ;;  %s7805_s10 = sld [smem:[#allocation40_spill]]  ;;  %s7806_s6 = sld [smem:[#allocation25_spill]] }
 0x345   : > { %v3115_v60 = vld [vmem:[#allocation14 + $0x280] sm:$0xff]  ;;  %v5206_v50 = vpack.c.bf16 %v2664_v17, %v2663_v47  ;;  %v3116_v25 = vld [vmem:[#allocation14 + $0x288] sm:$0xff]  ;;  %v2666_v2 = vld [vmem:[#allocation14 + $0x98] sm:$0xff]  ;;  %s7807_s1 = sld [smem:[#allocation26_spill]]  ;;  %s3954_s11 = sshll.u32 %s6589_s15, 4  ;;  %s7617_s11 = int_to_ptr.vmem [resolvable:$true] %s3954_s11 }
 0x346   : > { %v2647_v14 = vld [vmem:[#allocation14] sm:$0xff]  ;;  %v2648_v49 = vld [vmem:[#allocation14 + $0x8] sm:$0xff]  ;;  %v5302_v51 = vpack.c.bf16 %v3116_v25, %v3115_v60  ;;  %v3117_v9 = vld [vmem:[#allocation14 + $0x290] sm:$0xff]  ;;  %v5210_v13 = vpack.c.bf16 %v2666_v2, %v2665_v61  ;;  %s7808_s26 = sld [smem:[#allocation41_spill]]  ;;  %s3938_s3 = scalar_lea.sflag [#allocation8], %s6425_s20 }
 0x347   : > { %v5208_v18 = vpack.c.bf16 %v2648_v49, %v2647_v14  ;;  %5207 = vmatprep.subr.bf16.mxu0 %v5206_v50  ;;  %v3118_v20 = vld [vmem:[#allocation14 + $0x298] sm:$0xff]  ;;  %v2649_v21 = vld [vmem:[#allocation14 + $0x10] sm:$0xff]  ;;  %v2667_v38 = vld [vmem:[#allocation14 + $0xa0] sm:$0xff]  ;;  %s5807_s0 = scalar_lea.vmem %s7617_s11, 2048  ;;  %p7810_p1 = scmp.ne.s32.totalorder %s7769_s17, 0 }
 0x348   : > { %v2650_v33 = vld [vmem:[#allocation14 + $0x18] sm:$0xff]  ;;  %5303 = vmatprep.subr.bf16.mxu1 %v5302_v51  ;;  %v5306_v7 = vpack.c.bf16 %v3118_v20, %v3117_v9  ;;  %v2668_v57 = vld [vmem:[#allocation14 + $0xa8] sm:$0xff]  ;;  %v3119_v31 = vld [vmem:[#allocation14 + $0x2a0] sm:$0xff]  ;;  %p5808_p13 = scmp.ne.s32.totalorder %s7617_s11, %s5807_s0  ;;  %s5980_s12 = smov [#allocation15]  }
 0x349   : > { %5209 = vmatpush3.bf16.msra.mxu0 %v5208_v18  ;;  %v5212_v46 = vpack.c.bf16 %v2650_v33, %v2649_v21  ;;  %5305 = vmatpush3.bf16.msra.mxu1 %v5302_v51  ;;  %v5214_v27 = vpack.c.bf16 %v2668_v57, %v2667_v38  ;;  %v3120_v30 = vld [vmem:[#allocation14 + $0x2a8] sm:$0xff]  ;;  %v2651_v54 = vld [vmem:[#allocation14 + $0x20] sm:$0xff]  ;;  %v2669_v63 = vld [vmem:[#allocation14 + $0xb0] sm:$0xff]  ;;  %s5811_s24 = sshll.u32 %s5980_s12, 4  ;;  %s5812_s24 = int_to_ptr.vmem [resolvable:$false] %s5811_s24 }
 0x34a   : > { %5211 = vmatprep.subr.bf16.mxu0 %v5210_v13  ;;  %v2652_v8 = vld [vmem:[#allocation14 + $0x28] sm:$0xff]  ;;  %5307 = vmatprep.subr.bf16.mxu1 %v5306_v7  ;;  %v5310_v12 = vpack.c.bf16 %v3120_v30, %v3119_v31  ;;  %v2670_v23 = vld [vmem:[#allocation14 + $0xb8] sm:$0xff]  ;;  %v3121_v59 = vld [vmem:[#allocation14 + $0x2b0] sm:$0xff]  ;;  %s4167_s16 = sshll.u32 %s7806_s6, 4  ;;  %p5809_p8 = pnand %p5808_p13, %p7810_p1 }
 0x34b   : > { %v3122_v26 = vld [vmem:[#allocation14 + $0x2b8] sm:$0xff]  ;;  %v5216_v5 = vpack.c.bf16 %v2652_v8, %v2651_v54  ;;  %v5218_v24 = vpack.c.bf16 %v2670_v23, %v2669_v63  ;;  %v2653_v3 = vld [vmem:[#allocation14 + $0x30] sm:$0xff]  ;;  %v2671_v16 = vld [vmem:[#allocation14 + $0xc0] sm:$0xff]  ;;  %s4160_s4 = sshll.u32 %s7807_s1, 5  ;;  %s5813_s25 = scalar_lea.vmem %s5812_s24, 4096 }
 0x34c   : > { %v2654_v56 = vld [vmem:[#allocation14 + $0x38] sm:$0xff]  ;;  %v5314_v44 = vpack.c.bf16 %v3122_v26, %v3121_v59  ;;  %v2672_v4 = vld [vmem:[#allocation14 + $0xc8] sm:$0xff]  ;;  %v3123_v39 = vld [vmem:[#allocation14 + $0x2c0] sm:$0xff]  ;;  %s3951_s21 = sadd.s32 %s4167_s16, %s4160_s4  ;;  %s7809_s19 = smov %s7808_s26 }
 0x34d   : > { %5213 = vmatpush3.bf16.msra.mxu0 %v5212_v46  ;;  %5309 = vmatpush3.bf16.msra.mxu1 %v5306_v7  ;;  %v3124_v43 = vld [vmem:[#allocation14 + $0x2c8] sm:$0xff]  ;;  %v5220_v52 = vpack.c.bf16 %v2654_v56, %v2653_v3  ;;  %v5222_v29 = vpack.c.bf16 %v2672_v4, %v2671_v16  ;;  %v2655_v32 = vld [vmem:[#allocation14 + $0x40] sm:$0xff]  ;;  %v2673_v45 = vld [vmem:[#allocation14 + $0xd0] sm:$0xff]  ;;  %s4161_s28 = sshll.u32 %s3951_s21, 7  ;;  %p5810_p5 = pneg %p5809_p8 }
 0x34e   : > { %5215 = vmatprep.subr.bf16.mxu0 %v5214_v27  ;;  %5311 = vmatprep.subr.bf16.mxu1 %v5310_v12  ;;  %v2656_v58 = vld [vmem:[#allocation14 + $0x48] sm:$0xff]  ;;  %v5318_v19 = vpack.c.bf16 %v3124_v43, %v3123_v39  ;;  %v2674_v15 = vld [vmem:[#allocation14 + $0xd8] sm:$0xff]  ;;  %v3125_v35 = vld [vmem:[#allocation14 + $0x2d0] sm:$0xff]  ;;  %s7615_s13 = scalar_lea.hbm %s7808_s26, %s4161_s28  ;;  %p5814_p6 = scmp.lt.s32.totalorder %s7617_s11, %s5812_s24 }
 0x34f   : > { %v3126_v0 = vld [vmem:[#allocation14 + $0x2d8] sm:$0xff]  ;;  %v5224_v6 = vpack.c.bf16 %v2656_v58, %v2655_v32  ;;  %v2584_v48 = vld [vmem:[#allocation3 + $0x8] sm:$0xff]  ;;  %v7189_v55 = vld [vmem:[#allocation3 + $0x40] sm:$0xff]  ;;  %v5226_v11 = vpack.c.bf16 %v2674_v15, %v2673_v45  ;;  %p5815_p9 = scmp.lt.s32.totalorder %s5813_s25, %s5807_s0 }
 0x350   : > { %v2657_v62 = vld [vmem:[#allocation14 + $0x50] sm:$0xff]  ;;  %v2658_v36 = vld [vmem:[#allocation14 + $0x58] sm:$0xff]  ;;  %v5322_v22 = vpack.c.bf16 %v3126_v0, %v3125_v35  ;;  %v2675_v10 = vld [vmem:[#allocation14 + $0xe0] sm:$0xff]  ;;  %2759 = vmatprep.mubr.f32.mxu0 %v2584_v48  ;;  %4886 = vmatprep.mubr.f32.mxu1 %v7189_v55 }
 0x351   : > { %5217 = vmatpush3.bf16.msra.mxu0 %v5216_v5  ;;  %5313 = vmatpush3.bf16.msra.mxu1 %v5310_v12  ;;  %v2676_v40 = vld [vmem:[#allocation14 + $0xe8] sm:$0xff]  ;;  %v3127_v42 = vld [vmem:[#allocation14 + $0x2e0] sm:$0xff]  ;;  %v5228_v34 = vpack.c.bf16 %v2658_v36, %v2657_v62  ;;  %v2677_v47 = vld [vmem:[#allocation14 + $0xf0] sm:$0xff]  ;;  %p5816_p11 = por %p5815_p9, %p5814_p6 }
 0x352   : > { %5219 = vmatprep.subr.bf16.mxu0 %v5218_v24  ;;  %5315 = vmatprep.subr.bf16.mxu1 %v5314_v44  ;;  %v3128_v28 = vld [vmem:[#allocation14 + $0x2e8] sm:$0xff]  ;;  %v5230_v1 = vpack.c.bf16 %v2676_v40, %v2675_v10  ;;  %v2659_v53 = vld [vmem:[#allocation14 + $0x60] sm:$0xff]  ;;  %v2678_v17 = vld [vmem:[#allocation14 + $0xf8] sm:$0xff] }
 0x353   : > { %v2660_v37 = vld [vmem:[#allocation14 + $0x68] sm:$0xff]  ;;  %v5326_v41 = vpack.c.bf16 %v3128_v28, %v3127_v42  ;;  %v3129_v60 = vld [vmem:[#allocation14 + $0x2f0] sm:$0xff]  ;;  %v3130_v50 = vld [vmem:[#allocation14 + $0x2f8] sm:$0xff]  ;;  %v5234_v14 = vpack.c.bf16 %v2678_v17, %v2677_v47  ;;  %p5817_p3 = pnand %p5816_p11, %p5810_p5 }
 0x354   : > { %v5232_v25 = vpack.c.bf16 %v2660_v37, %v2659_v53  ;;  %v2661_v49 = vld [vmem:[#allocation14 + $0x70] sm:$0xff]  ;;  %v2662_v51 = vld [vmem:[#allocation14 + $0x78] sm:$0xff]  ;;  %v5330_v18 = vpack.c.bf16 %v3130_v50, %v3129_v60  ;;  %v2679_v61 = vld [vmem:[#allocation14 + $0x100] sm:$0xff] }
 0x355   : > { %5221 = vmatpush3.bf16.msra.mxu0 %v5220_v52  ;;  %5317 = vmatpush3.bf16.msra.mxu1 %v5314_v44  ;;  %v2680_v2 = vld [vmem:[#allocation14 + $0x108] sm:$0xff]  ;;  %v3535_v9 = vld [vmem:[#allocation14 + $0x380] sm:$0xff]  ;;  %v5236_v20 = vpack.c.bf16 %v2662_v51, %v2661_v49  ;;  %v3537_v38 = vld [vmem:[#allocation14 + $0x390] sm:$0xff] }
 0x356   : > { %5223 = vmatprep.subr.bf16.mxu0 %v5222_v29  ;;  %5319 = vmatprep.subr.bf16.mxu1 %v5318_v19  ;;  %v3536_v13 = vld [vmem:[#allocation14 + $0x388] sm:$0xff]  ;;  %v5238_v21 = vpack.c.bf16 %v2680_v2, %v2679_v61  ;;  %v3519_v7 = vld [vmem:[#allocation14 + $0x300] sm:$0xff]  ;;  %v3538_v57 = vld [vmem:[#allocation14 + $0x398] sm:$0xff] }
 0x357   : > { %v5334_v33 = vpack.c.bf16 %v3536_v13, %v3535_v9  ;;  %v3520_v46 = vld [vmem:[#allocation14 + $0x308] sm:$0xff]  ;;  %v2583_v31 = vld [vmem:[#allocation3] sm:$0xff]  ;;  %v2681_v27 = vld [vmem:[#allocation14 + $0x110] sm:$0xff]  ;;  %v5338_v63 = vpack.c.bf16 %v3538_v57, %v3537_v38 }
 0x358   : > { %v2682_v30 = vld [vmem:[#allocation14 + $0x118] sm:$0xff]  ;;  %v5336_v8 = vpack.c.bf16 %v3520_v46, %v3519_v7  ;;  %v2587_v12 = vld [vmem:[#allocation3 + $0x20] sm:$0xff]  ;;  %v3521_v23 = vld [vmem:[#allocation14 + $0x310] sm:$0xff] }
 0x359   : > { %5225 = vmatpush3.bf16.msra.mxu0 %v5224_v6  ;;  %5321 = vmatpush3.bf16.msra.mxu1 %v5318_v19  ;;  %v7192_v54 = vld [vmem:[#allocation3 + $0x58] sm:$0xff]  ;;  %v7194_v26 = vld [vmem:[#allocation3 + $0x70] sm:$0xff]  ;;  %v5242_v5 = vpack.c.bf16 %v2682_v30, %v2681_v27  ;;  %v3539_v24 = vld [vmem:[#allocation14 + $0x3a0] sm:$0xff] }
 0x35a   : > { %5227 = vmatprep.subr.bf16.mxu0 %v5226_v11  ;;  %5323 = vmatprep.subr.bf16.mxu1 %v5322_v22  ;;  %v3522_v59 = vld [vmem:[#allocation14 + $0x318] sm:$0xff]  ;;  %v3540_v3 = vld [vmem:[#allocation14 + $0x3a8] sm:$0xff]  ;;  %v2683_v44 = vld [vmem:[#allocation14 + $0x120] sm:$0xff] }
 0x35b   : > { %v2586_v56 = vld [vmem:[#allocation3 + $0x18] sm:$0xff]  ;;  %v2684_v16 = vld [vmem:[#allocation14 + $0x128] sm:$0xff]  ;;  %v5340_v39 = vpack.c.bf16 %v3522_v59, %v3521_v23  ;;  %v7202_v52 = vld [vmem:[#allocation3 + $0xa0] sm:$0xff]  ;;  %v5342_v29 = vpack.c.bf16 %v3540_v3, %v3539_v24 }
 0x35c   : > { %v7197_v4 = vld [vmem:[#allocation3 + $0x88] sm:$0xff]  ;;  %v7199_v43 = vld [vmem:[#allocation3 + $0x38] sm:$0xff]  ;;  %v3523_v32 = vld [vmem:[#allocation14 + $0x320] sm:$0xff]  ;;  %v5246_v15 = vpack.c.bf16 %v2684_v16, %v2683_v44 }
 0x35d   : > { %5229 = vmatpush3.bf16.msra.mxu0 %v5228_v34  ;;  %5325 = vmatpush3.bf16.msra.mxu1 %v5322_v22  ;;  %v3524_v58 = vld [vmem:[#allocation14 + $0x328] sm:$0xff]  ;;  %v3541_v19 = vld [vmem:[#allocation14 + $0x3b0] sm:$0xff]  ;;  %v3542_v45 = vld [vmem:[#allocation14 + $0x3b8] sm:$0xff] }
 0x35e   : > { %5231 = vmatprep.subr.bf16.mxu0 %v5230_v1  ;;  %5327 = vmatprep.subr.bf16.mxu1 %v5326_v41  ;;  %v7206_v35 = vld [vmem:[#allocation3 + $0x30] sm:$0xff]  ;;  %v2686_v6 = vld [vmem:[#allocation14 + $0x138] sm:$0xff]  ;;  %v5344_v11 = vpack.c.bf16 %v3524_v58, %v3523_v32  ;;  %v5346_v22 = vpack.c.bf16 %v3542_v45, %v3541_v19  ;;  %v3543_v42 = vld [vmem:[#allocation14 + $0x3c0] sm:$0xff] }
 0x35f   : > { %v2685_v0 = vld [vmem:[#allocation14 + $0x130] sm:$0xff]  ;;  %v7209_v48 = vld [vmem:[#allocation3 + $0xb8] sm:$0xff]  ;;  %v3544_v28 = vld [vmem:[#allocation14 + $0x3c8] sm:$0xff] }
 0x360   : > { %v7211_v62 = vld [vmem:[#allocation3 + $0x50] sm:$0xff]  ;;  %v3526_v40 = vld [vmem:[#allocation14 + $0x338] sm:$0xff]  ;;  %v5250_v34 = vpack.c.bf16 %v2686_v6, %v2685_v0  ;;  %v7218_v1 = vld [vmem:[#allocation3 + $0x48] sm:$0xff]  ;;  %v5350_v50 = vpack.c.bf16 %v3544_v28, %v3543_v42 }
 0x361   : > { %5233 = vmatpush3.bf16.msra.mxu0 %v5232_v25  ;;  %5329 = vmatpush3.bf16.msra.mxu1 %v5326_v41  ;;  %v7213_v36 = vld [vmem:[#allocation3 + $0xd0] sm:$0xff]  ;;  %v2687_v53 = vld [vmem:[#allocation14 + $0x140] sm:$0xff]  ;;  %v2688_v37 = vld [vmem:[#allocation14 + $0x148] sm:$0xff] }
 0x362   : > { %5235 = vmatprep.subr.bf16.mxu0 %v5234_v14  ;;  %5331 = vmatprep.subr.bf16.mxu1 %v5330_v18  ;;  %v3525_v10 = vld [vmem:[#allocation14 + $0x330] sm:$0xff]  ;;  %v7221_v41 = vld [vmem:[#allocation3 + $0xe8] sm:$0xff]  ;;  %v7225_v60 = vld [vmem:[#allocation3 + $0x100] sm:$0xff] }
 0x363   : > { %v5348_v47 = vpack.c.bf16 %v3526_v40, %v3525_v10  ;;  %v7223_v17 = vld [vmem:[#allocation3 + $0x68] sm:$0xff]  ;;  %v3527_v25 = vld [vmem:[#allocation14 + $0x340] sm:$0xff]  ;;  %v3545_v49 = vld [vmem:[#allocation14 + $0x3d0] sm:$0xff] }
 0x364   : > { %v3528_v14 = vld [vmem:[#allocation14 + $0x348] sm:$0xff]  ;;  %v3546_v51 = vld [vmem:[#allocation14 + $0x3d8] sm:$0xff]  ;;  %v7230_v61 = vld [vmem:[#allocation3 + $0x60] sm:$0xff] }
 0x365   : > { %5237 = vmatpush3.bf16.msra.mxu0 %v5236_v20  ;;  %5333 = vmatpush3.bf16.msra.mxu1 %v5330_v18  ;;  %v5254_v18 = vpack.c.bf16 %v2688_v37, %v2687_v53  ;;  %v2689_v2 = vld [vmem:[#allocation14 + $0x150] sm:$0xff]  ;;  %v2690_v9 = vld [vmem:[#allocation14 + $0x158] sm:$0xff]  ;;  %v5352_v20 = vpack.c.bf16 %v3528_v14, %v3527_v25  ;;  %v5354_v7 = vpack.c.bf16 %v3546_v51, %v3545_v49  ;;  %v3547_v57 = vld [vmem:[#allocation14 + $0x3e0] sm:$0xff] }
 0x366   : > { %5239 = vmatprep.subr.bf16.mxu0 %v5238_v21  ;;  %5335 = vmatprep.subr.bf16.mxu1 %v5334_v33  ;;  %v7233_v13 = vld [vmem:[#allocation3 + $0x118] sm:$0xff]  ;;  %v7237_v33 = vld [vmem:[#allocation3 + $0x130] sm:$0xff]  ;;  %v5258_v27 = vpack.c.bf16 %v2690_v9, %v2689_v2  ;;  %v3531_v3 = vld [vmem:[#allocation14 + $0x360] sm:$0xff] }
 0x367   : > { %v3529_v46 = vld [vmem:[#allocation14 + $0x350] sm:$0xff]  ;;  %v3530_v38 = vld [vmem:[#allocation14 + $0x358] sm:$0xff]  ;;  %v3551_v40 = vld [vmem:[#allocation14 + $0x400] sm:$0xff] }
 0x368   : > { %2760 = vmatmul.mubr.f32.vlgmr.msra.gmra.mrb[80].mxu0 %v2583_v31  ;;  %4887 = vmatmul.mubr.f32.vlgmr.msra.gmra.mrb[100].mxu1 %v7192_v54  ;;  %v3548_v31 = vld [vmem:[#allocation14 + $0x3e8] sm:$0xff]  ;;  %v7242_v30 = vld [vmem:[#allocation3 + $0x78] sm:$0xff]  ;;  %v5356_v23 = vpack.c.bf16 %v3530_v38, %v3529_v46  ;;  %v3549_v44 = vld [vmem:[#allocation14 + $0x3f0] sm:$0xff] }
 0x369   : > { %5241 = vmatpush3.bf16.msra.mxu0 %v5238_v21  ;;  %5337 = vmatpush3.bf16.msra.mxu1 %v5336_v8  ;;  %v7235_v21 = vld [vmem:[#allocation3 + $0x80] sm:$0xff]  ;;  %v7247_v59 = vld [vmem:[#allocation3 + $0x98] sm:$0xff]  ;;  %v5358_v24 = vpack.c.bf16 %v3548_v31, %v3547_v57  ;;  %v2693_v32 = vld [vmem:[#allocation14 + $0x170] sm:$0xff] }
 0x36a   : > { %2764 = vmatprep.mubr.f32.mxu0 %v2587_v12  ;;  %4889 = vmatprep.mubr.f32.mxu1 %v7194_v26  ;;  %v2691_v8 = vld [vmem:[#allocation14 + $0x160] sm:$0xff]  ;;  %v2692_v12 = vld [vmem:[#allocation14 + $0x168] sm:$0xff]  ;;  %v3550_v16 = vld [vmem:[#allocation14 + $0x3f8] sm:$0xff] }
 0x36b   : > { %5339 = vmatprep.subr.bf16.mxu1 %v5338_v63  ;;  %5243 = vmatprep.subr.bf16.mxu0 %v5242_v5  ;;  %v7245_v63 = vld [vmem:[#allocation3 + $0x148] sm:$0xff]  ;;  %v2694_v58 = vld [vmem:[#allocation14 + $0x178] sm:$0xff]  ;;  %v7261_v0 = vld [vmem:[#allocation3 + $0x190] sm:$0xff]  ;;  %v5362_v6 = vpack.c.bf16 %v3550_v16, %v3549_v44 }
 0x36c   : > { %2765 = vmatmul.mubr.f32.gmra.mrb[82].mxu0 %v2586_v56  ;;  %4890 = vmatmul.mubr.f32.gmra.mrb[102].mxu1 %v7197_v4  ;;  %v3532_v56 = vld [vmem:[#allocation14 + $0x368] sm:$0xff]  ;;  %v7257_v19 = vld [vmem:[#allocation3 + $0x178] sm:$0xff]  ;;  %v5266_v10 = vpack.c.bf16 %v2694_v58, %v2693_v32  ;;  %v3553_v49 = vld [vmem:[#allocation14 + $0x410] sm:$0xff] }
 0x36d   : > { %2769 = vmatprep.mubr.f32.mxu0 %v7199_v43  ;;  %5341 = vmatpush3.bf16.msra.mxu1 %v5340_v39  ;;  %v5262_v39 = vpack.c.bf16 %v2692_v12, %v2691_v8  ;;  %v5360_v45 = vpack.c.bf16 %v3532_v56, %v3531_v3  ;;  %v3552_v42 = vld [vmem:[#allocation14 + $0x408] sm:$0xff]  ;;  %v3554_v51 = vld [vmem:[#allocation14 + $0x418] sm:$0xff]  ;;  %v7279_v2 = vld [vmem:[#allocation3 + $0xe0] sm:$0xff] }
 0x36e   : > { %4892 = vmatprep.mubr.f32.mxu1 %v7202_v52  ;;  %5343 = vmatprep.subr.bf16.mxu1 %v5342_v29  ;;  %v7254_v29 = vld [vmem:[#allocation3 + $0x90] sm:$0xff]  ;;  %v7266_v28 = vld [vmem:[#allocation3 + $0xa8] sm:$0xff]  ;;  %v5366_v25 = vpack.c.bf16 %v3552_v42, %v3551_v40  ;;  %v5370_v9 = vpack.c.bf16 %v3554_v51, %v3553_v49  ;;  %v7284_v46 = vld [vmem:[#allocation3 + $0xd8] sm:$0xff] }
 0x36f   : > { %5245 = vmatpush3.bf16.msra.mxu0 %v5242_v5  ;;  %v7249_v5 = vld [vmem:[#allocation3 + $0x160] sm:$0xff]  ;;  %v3100_v53 = vld [vmem:[#allocation14 + $0x208] sm:$0xff]  ;;  %v7287_v38 = vld [vmem:[#allocation3 + $0xf8] sm:$0xff] }
 0x370   : > { %2770 = vmatmul.mubr.f32.gmra.mrb[84].mxu0 %v7206_v35  ;;  %5247 = vmatprep.subr.bf16.mxu0 %v5246_v15  ;;  %v7269_v37 = vld [vmem:[#allocation3 + $0x1a8] sm:$0xff]  ;;  %v3557_v31 = vld [vmem:[#allocation14 + $0x430] sm:$0xff]  ;;  %v3562_v32 = vld [vmem:[#allocation14 + $0x458] sm:$0xff] }
 0x371   : > { %4893 = vmatmul.mubr.f32.gmra.mrb[104].mxu1 %v7209_v48  ;;  %2774 = vmatprep.mubr.f32.mxu0 %v7211_v62  ;;  %v7292_v8 = vld [vmem:[#allocation3 + $0xf0] sm:$0xff]  ;;  %v3560_v3 = vld [vmem:[#allocation14 + $0x448] sm:$0xff]  ;;  %v7308_v58 = vld [vmem:[#allocation3 + $0x120] sm:$0xff] }
 0x372   : > { %5345 = vmatpush3.bf16.msra.mxu1 %v5344_v11  ;;  %4895 = vmatprep.mubr.f32.mxu1 %v7213_v36  ;;  %v3533_v11 = vld [vmem:[#allocation14 + $0x370] sm:$0xff]  ;;  %v7300_v56 = vld [vmem:[#allocation3 + $0x108] sm:$0xff]  ;;  %v7319_v40 = vld [vmem:[#allocation3 + $0x158] sm:$0xff] }
 0x373   : > { %5347 = vmatprep.subr.bf16.mxu1 %v5346_v22  ;;  %5249 = vmatpush3.bf16.msra.mxu0 %v5246_v15  ;;  %v7259_v15 = vld [vmem:[#allocation3 + $0xb0] sm:$0xff]  ;;  %v3534_v22 = vld [vmem:[#allocation14 + $0x378] sm:$0xff]  ;;  %v7303_v44 = vld [vmem:[#allocation3 + $0x128] sm:$0xff] }
 0x374   : > { %2775 = vmatmul.mubr.f32.gmra.mrb[86].mxu0 %v7218_v1  ;;  %5251 = vmatprep.subr.bf16.mxu0 %v5250_v34  ;;  %v7295_v12 = vld [vmem:[#allocation3 + $0x110] sm:$0xff]  ;;  %v7332_v49 = vld [vmem:[#allocation3 + $0x168] sm:$0xff] }
 0x375   : > { %4896 = vmatmul.mubr.f32.gmra.mrb[106].mxu1 %v7221_v41  ;;  %2779 = vmatprep.mubr.f32.mxu0 %v7223_v17  ;;  %v2585_v51 = vld [vmem:[#allocation3 + $0x10] sm:$0xff] }
 0x376   : > { %5349 = vmatpush3.bf16.msra.mxu1 %v5348_v47  ;;  %4898 = vmatprep.mubr.f32.mxu1 %v7225_v60  ;;  %v5364_v47 = vpack.c.bf16 %v3534_v22, %v3533_v11  ;;  %v3563_v11 = vld [vmem:[#allocation14 + $0x460] sm:$0xff]  ;;  %v3564_v22 = vld [vmem:[#allocation14 + $0x468] sm:$0xff] }
 0x377   : > { %5351 = vmatprep.subr.bf16.mxu1 %v5350_v50  ;;  %5253 = vmatpush3.bf16.msra.mxu0 %v5250_v34  ;;  %v3099_v34 = vld [vmem:[#allocation14 + $0x200] sm:$0xff]  ;;  %v7271_v50 = vld [vmem:[#allocation3 + $0xc8] sm:$0xff]  ;;  %v5390_v42 = vpack.c.bf16 %v3564_v22, %v3563_v11 }
 0x378   : > { %2780 = vmatmul.mubr.f32.gmra.mrb[88].mxu0 %v7230_v61  ;;  %5255 = vmatprep.subr.bf16.mxu0 %v5254_v18  ;;  %v5270_v14 = vpack.c.bf16 %v3100_v53, %v3099_v34  ;;  %v3565_v34 = vld [vmem:[#allocation14 + $0x470] sm:$0xff]  ;;  %v3566_v53 = vld [vmem:[#allocation14 + $0x478] sm:$0xff]  ;;  %v3088_v11 = vld [vmem:[#allocation14 + $0x1a8] sm:$0xff] }
 0x379   : > { %4899 = vmatmul.mubr.f32.gmra.mrb[108].mxu1 %v7233_v13  ;;  %2784 = vmatprep.mubr.f32.mxu0 %v7235_v21 }
 0x37a   : > { %5353 = vmatpush3.bf16.msra.mxu1 %v5352_v20  ;;  %4901 = vmatprep.mubr.f32.mxu1 %v7237_v33  ;;  %v3555_v20 = vld [vmem:[#allocation14 + $0x420] sm:$0xff] }
 0x37b   : > { %5355 = vmatprep.subr.bf16.mxu1 %v5354_v7  ;;  %5257 = vmatpush3.bf16.msra.mxu0 %v5254_v18  ;;  %v7276_v18 = vld [vmem:[#allocation3 + $0xc0] sm:$0xff]  ;;  %v3556_v7 = vld [vmem:[#allocation14 + $0x428] sm:$0xff] }
 0x37c   : > { %2785 = vmatmul.mubr.f32.gmra.mrb[90].mxu0 %v7242_v30  ;;  %5259 = vmatprep.subr.bf16.mxu0 %v5258_v27  ;;  %v5374_v57 = vpack.c.bf16 %v3556_v7, %v3555_v20  ;;  %v3084_v20 = vld [vmem:[#allocation14 + $0x188] sm:$0xff]  ;;  %v3101_v7 = vld [vmem:[#allocation14 + $0x210] sm:$0xff] }
 0x37d   : > { %4902 = vmatmul.mubr.f32.gmra.mrb[110].mxu1 %v7245_v63  ;;  %2789 = vmatprep.mubr.f32.mxu0 %v7247_v59 }
 0x37e   : > { %5357 = vmatpush3.bf16.msra.mxu1 %v5356_v23  ;;  %4904 = vmatprep.mubr.f32.mxu1 %v7249_v5 }
 0x37f   : > { %5359 = vmatprep.subr.bf16.mxu1 %v5358_v24  ;;  %5261 = vmatpush3.bf16.msra.mxu0 %v5258_v27  ;;  %v3558_v27 = vld [vmem:[#allocation14 + $0x438] sm:$0xff]  ;;  %v3559_v24 = vld [vmem:[#allocation14 + $0x440] sm:$0xff] }
 0x380   : > { %2790 = vmatmul.mubr.f32.gmra.mrb[92].mxu0 %v7254_v29  ;;  %5263 = vmatprep.subr.bf16.mxu0 %v5262_v39  ;;  %v5378_v23 = vpack.c.bf16 %v3558_v27, %v3557_v31  ;;  %v5382_v16 = vpack.c.bf16 %v3560_v3, %v3559_v24  ;;  %v2588_v31 = vld [vmem:[#allocation3 + $0x28] sm:$0xff]  ;;  %v3086_v24 = vld [vmem:[#allocation14 + $0x198] sm:$0xff] }
 0x381   : > { %4905 = vmatmul.mubr.f32.gmra.mrb[112].mxu1 %v7257_v19  ;;  %2794 = vmatprep.mubr.f32.mxu0 %v7259_v15 }
 0x382   : > { %5361 = vmatpush3.bf16.msra.mxu1 %v5360_v45  ;;  %4907 = vmatprep.mubr.f32.mxu1 %v7261_v0  ;;  %v7311_v45 = vld [vmem:[#allocation3 + $0x140] sm:$0xff] }
 0x383   : > { %5363 = vmatprep.subr.bf16.mxu1 %v5362_v6  ;;  %5265 = vmatpush3.bf16.msra.mxu0 %v5262_v39  ;;  %v3561_v39 = vld [vmem:[#allocation14 + $0x450] sm:$0xff] }
 0x384   : > { %2795 = vmatmul.mubr.f32.gmra.mrb[94].mxu0 %v7266_v28  ;;  %5267 = vmatprep.subr.bf16.mxu0 %v5266_v10  ;;  %v5386_v6 = vpack.c.bf16 %v3562_v32, %v3561_v39  ;;  %v3104_v39 = vld [vmem:[#allocation14 + $0x228] sm:$0xff] }
 0x385   : > { %4908 = vmatmul.mubr.f32.gmra.mrb[114].mxu1 %v7269_v37  ;;  %2799 = vmatprep.mubr.f32.mxu0 %v7271_v50 }
 0x386   : > { %5365 = vmatpush3.bf16.msra.mxu1 %v5364_v47  ;;  %3631 = vmatprep.mubr.f32.mxu1 %v7223_v17  ;;  %v7324_v47 = vld [vmem:[#allocation3 + $0x150] sm:$0xff] }
 0x387   : > { %5269 = vmatpush3.bf16.msra.mxu0 %v5266_v10  ;;  %5367 = vmatprep.subr.bf16.mxu1 %v5366_v25  ;;  %v7316_v10 = vld [vmem:[#allocation3 + $0x138] sm:$0xff] }
 0x388   : > { %2800 = vmatmul.mubr.f32.gmra.mrb[96].mxu0 %v7276_v18  ;;  %5271 = vmatprep.subr.bf16.mxu0 %v5270_v14  ;;  %v5394_v14 = vpack.c.bf16 %v3566_v53, %v3565_v34  ;;  %v3106_v34 = vld [vmem:[#allocation14 + $0x238] sm:$0xff] }
 0x389   : > { %3632 = vmatmul.mubr.f32.vlgmr.msra.gmra.mrb[116].mxu1 %v7230_v61  ;;  %2804 = vmatprep.mubr.f32.mxu0 %v7279_v2 }
 0x38a   : > { %3636 = vmatprep.mubr.f32.mxu1 %v7235_v21  ;;  %5369 = vmatpush3.bf16.msra.mxu1 %v5366_v25  ;;  %v7327_v25 = vld [vmem:[#allocation3 + $0x170] sm:$0xff] }
 0x38b   : > { %5371 = vmatprep.subr.bf16.mxu1 %v5370_v9 }
 0x38c   : > { %2805 = vmatmul.mubr.f32.gmra.mrb[98].mxu0 %v7284_v46 }
 0x38d   : > { %3637 = vmatmul.mubr.f32.gmra.mrb[118].mxu1 %v7242_v30  ;;  %2809 = vmatprep.mubr.f32.mxu0 %v7287_v38 }
 0x38e   : > { %3641 = vmatprep.mubr.f32.mxu1 %v7247_v59  ;;  %5373 = vmatpush3.bf16.msra.mxu1 %v5370_v9  ;;  %v3083_v9 = vld [vmem:[#allocation14 + $0x180] sm:$0xff] }
 0x38f   : > { %5375 = vmatprep.subr.bf16.mxu1 %v5374_v57  ;;  %v5272_v27 = vpack.c.bf16 %v3084_v20, %v3083_v9  ;;  %v3107_v9 = vld [vmem:[#allocation14 + $0x240] sm:$0xff]  ;;  %v3108_v20 = vld [vmem:[#allocation14 + $0x248] sm:$0xff] }
 0x390   : > { %2810 = vmatmul.mubr.f32.gmra.mrb[100].mxu0 %v7292_v8 }
 0x391   : > { %3642 = vmatmul.mubr.f32.gmra.mrb[120].mxu1 %v7254_v29  ;;  %2814 = vmatprep.mubr.f32.mxu0 %v7295_v12 }
 0x392   : > { %3646 = vmatprep.mubr.f32.mxu1 %v7259_v15  ;;  %5377 = vmatpush3.bf16.msra.mxu1 %v5374_v57  ;;  %v3102_v57 = vld [vmem:[#allocation14 + $0x218] sm:$0xff] }
 0x393   : > { %5379 = vmatprep.subr.bf16.mxu1 %v5378_v23  ;;  %v5274_v3 = vpack.c.bf16 %v3102_v57, %v3101_v7  ;;  %v3091_v7 = vld [vmem:[#allocation14 + $0x1c0] sm:$0xff]  ;;  %v3092_v57 = vld [vmem:[#allocation14 + $0x1c8] sm:$0xff] }
 0x394   : > { %2815 = vmatmul.mubr.f32.gmra.mrb[102].mxu0 %v7300_v56 }
 0x395   : > { %3647 = vmatmul.mubr.f32.gmra.mrb[122].mxu1 %v7266_v28  ;;  %2819 = vmatprep.mubr.f32.mxu0 %v7303_v44 }
 0x396   : > { %3651 = vmatprep.mubr.f32.mxu1 %v7271_v50  ;;  %5381 = vmatpush3.bf16.msra.mxu1 %v5378_v23  ;;  %v3085_v23 = vld [vmem:[#allocation14 + $0x190] sm:$0xff] }
 0x397   : > { %5383 = vmatprep.subr.bf16.mxu1 %v5382_v16  ;;  %v5276_v32 = vpack.c.bf16 %v3086_v24, %v3085_v23  ;;  %v3109_v23 = vld [vmem:[#allocation14 + $0x250] sm:$0xff]  ;;  %v3110_v24 = vld [vmem:[#allocation14 + $0x258] sm:$0xff] }
 0x398   : > { %2820 = vmatmul.mubr.f32.gmra.mrb[104].mxu0 %v7308_v58 }
 0x399   : > { %3652 = vmatmul.mubr.f32.gmra.mrb[124].mxu1 %v7276_v18  ;;  %2824 = vmatprep.mubr.f32.mxu0 %v7311_v45 }
 0x39a   : > { %3656 = vmatprep.mubr.f32.mxu1 %v7279_v2  ;;  %5385 = vmatpush3.bf16.msra.mxu1 %v5382_v16  ;;  %v3103_v16 = vld [vmem:[#allocation14 + $0x220] sm:$0xff] }
 0x39b   : > { %5387 = vmatprep.subr.bf16.mxu1 %v5386_v6  ;;  %v5278_v22 = vpack.c.bf16 %v3104_v39, %v3103_v16  ;;  %v7355_v16 = vld [vmem:[#allocation3 + $0x180] sm:$0xff]  ;;  %v3093_v39 = vld [vmem:[#allocation14 + $0x1d0] sm:$0xff] }
 0x39c   : > { %2825 = vmatmul.mubr.f32.gmra.mrb[106].mxu0 %v7316_v10 }
 0x39d   : > { %3657 = vmatmul.mubr.f32.gmra.mrb[126].mxu1 %v7284_v46  ;;  %2829 = vmatprep.mubr.f32.mxu0 %v7319_v40 }
 0x39e   : > { %3661 = vmatprep.mubr.f32.mxu1 %v7287_v38  ;;  %5389 = vmatpush3.bf16.msra.mxu1 %v5386_v6  ;;  %v3087_v6 = vld [vmem:[#allocation14 + $0x1a0] sm:$0xff] }
 0x39f   : > { %5391 = vmatprep.subr.bf16.mxu1 %v5390_v42  ;;  %v5280_v53 = vpack.c.bf16 %v3088_v11, %v3087_v6  ;;  %v7357_v6 = vld [vmem:[#allocation3 + $0x1a0] sm:$0xff]  ;;  %v5290_v11 = vpack.c.bf16 %v3110_v24, %v3109_v23  ;;  %v3098_v23 = vld [vmem:[#allocation14 + $0x1f8] sm:$0xff]  ;;  %v3500_v24 = vld [vmem:[#allocation3 + $0x1d0] sm:$0xff] }
 0x3a0   : > { %2830 = vmatmul.mubr.f32.gmra.mrb[108].mxu0 %v7324_v47 }
 0x3a1   : > { %3662 = vmatmul.mubr.f32.gmra.mrb[128].mxu1 %v7292_v8  ;;  %2834 = vmatprep.mubr.f32.mxu0 %v7327_v25 }
 0x3a2   : > { %3666 = vmatprep.mubr.f32.mxu1 %v7295_v12  ;;  %5393 = vmatpush3.bf16.msra.mxu1 %v5390_v42  ;;  %v3105_v42 = vld [vmem:[#allocation14 + $0x230] sm:$0xff] }
 0x3a3   : > { %5395 = vmatprep.subr.bf16.mxu1 %v5394_v14 }
 0x3a4   : > { %2835 = vmatmul.mubr.f32.gmra.mrb[110].mxu0 %v7332_v49 }
 0x3a5   : > { %3667 = vmatmul.mubr.f32.gmra.mrb[130].mxu1 %v7300_v56  ;;  %4830 = vmatprep.mubr.f32.mxu0 %v2585_v51  ;;  %v5282_v51 = vpack.c.bf16 %v3106_v34, %v3105_v42  ;;  %v3112_v42 = vld [vmem:[#allocation14 + $0x268] sm:$0xff] }
 0x3a6   : > { %3671 = vmatprep.mubr.f32.mxu1 %v7303_v44  ;;  %5397 = vmatpush3.bf16.msra.mxu1 %v5394_v14  ;;  %v3089_v14 = vld [vmem:[#allocation14 + $0x1b0] sm:$0xff] }
 0x3a8   : > { %4831 = vmatmul.mubr.f32.vlgmr.msra.gmra.mrb[112].mxu0 %v2588_v31  ;;  %v7349_v31 = vld [vmem:[#allocation3 + $0x188] sm:$0xff] }
 0x3a9   : > { %3672 = vmatmul.mubr.f32.gmra.mrb[132].mxu1 %v7308_v58  ;;  %5273 = vmatpush3.bf16.msra.mxu0 %v5272_v27  ;;  %v5286_v27 = vpack.c.bf16 %v3108_v20, %v3107_v9  ;;  %v3113_v20 = vld [vmem:[#allocation14 + $0x270] sm:$0xff] }
 0x3aa   : > { %4833 = vmatprep.mubr.f32.mxu0 %v7189_v55  ;;  %3676 = vmatprep.mubr.f32.mxu1 %v7311_v45  ;;  %v3090_v55 = vld [vmem:[#allocation14 + $0x1b8] sm:$0xff] }
 0x3ab   : > { %5275 = vmatprep.subr.bf16.mxu0 %v5274_v3  ;;  %v5288_v3 = vpack.c.bf16 %v3092_v57, %v3091_v7  ;;  %v3496_v57 = vld [vmem:[#allocation3 + $0x1b0] sm:$0xff] }
 0x3ac   : > { %4834 = vmatmul.mubr.f32.gmra.mrb[114].mxu0 %v7192_v54  ;;  %v5284_v54 = vpack.c.bf16 %v3090_v55, %v3089_v14  ;;  %v3095_v14 = vld [vmem:[#allocation14 + $0x1e0] sm:$0xff]  ;;  %v3096_v55 = vld [vmem:[#allocation14 + $0x1e8] sm:$0xff] }
 0x3ad   : > { %3677 = vmatmul.mubr.f32.gmra.mrb[134].mxu1 %v7316_v10  ;;  %5277 = vmatpush3.bf16.msra.mxu0 %v5276_v32  ;;  %v3094_v32 = vld [vmem:[#allocation14 + $0x1d8] sm:$0xff]  ;;  %v5296_v7 = vpack.c.bf16 %v3096_v55, %v3095_v14 }
 0x3ae   : > { %4836 = vmatprep.mubr.f32.mxu0 %v7194_v26  ;;  %3681 = vmatprep.mubr.f32.mxu1 %v7319_v40  ;;  %v5292_v34 = vpack.c.bf16 %v3094_v32, %v3093_v39  ;;  %v3499_v32 = vld [vmem:[#allocation3 + $0x1c8] sm:$0xff] }
 0x3af   : > { %5279 = vmatprep.subr.bf16.mxu0 %v5278_v22  ;;  %v3111_v22 = vld [vmem:[#allocation14 + $0x260] sm:$0xff] }
 0x3b0   : > { %4837 = vmatmul.mubr.f32.gmra.mrb[116].mxu0 %v7197_v4  ;;  %v5294_v9 = vpack.c.bf16 %v3112_v42, %v3111_v22 }
 0x3b1   : > { %3682 = vmatmul.mubr.f32.gmra.mrb[136].mxu1 %v7324_v47  ;;  %5281 = vmatpush3.bf16.msra.mxu0 %v5280_v53  ;;  %v7363_v53 = vld [vmem:[#allocation3 + $0x198] sm:$0xff] }
 0x3b2   : > { %4839 = vmatprep.mubr.f32.mxu0 %v7202_v52  ;;  %3686 = vmatprep.mubr.f32.mxu1 %v7327_v25 }
 0x3b3   : > { %5283 = vmatprep.subr.bf16.mxu0 %v5282_v51  ;;  %v3497_v51 = vld [vmem:[#allocation3 + $0x1b8] sm:$0xff] }
 0x3b4   : > { %4840 = vmatmul.mubr.f32.gmra.mrb[118].mxu0 %v7209_v48 }
 0x3b5   : > { %3687 = vmatmul.mubr.f32.gmra.mrb[138].mxu1 %v7332_v49  ;;  %5285 = vmatpush3.bf16.msra.mxu0 %v5284_v54  ;;  %v3114_v54 = vld [vmem:[#allocation14 + $0x278] sm:$0xff] }
 0x3b6   : > { %4842 = vmatprep.mubr.f32.mxu0 %v7213_v36  ;;  %3691 = vmatprep.mubr.f32.mxu1 %v7349_v31 }
 0x3b7   : > { %5287 = vmatprep.subr.bf16.mxu0 %v5286_v27  ;;  %v3097_v27 = vld [vmem:[#allocation14 + $0x1f0] sm:$0xff] }
 0x3b8   : > { %4843 = vmatmul.mubr.f32.gmra.mrb[120].mxu0 %v7221_v41  ;;  %v5300_v39 = vpack.c.bf16 %v3098_v23, %v3097_v27 }
 0x3b9   : > { %3692 = vmatmul.mubr.f32.gmra.mrb[140].mxu1 %v7355_v16  ;;  %5289 = vmatpush3.bf16.msra.mxu0 %v5288_v3  ;;  %v5298_v3 = vpack.c.bf16 %v3114_v54, %v3113_v20 }
 0x3ba   : > { %4845 = vmatprep.mubr.f32.mxu0 %v7225_v60  ;;  %3696 = vmatprep.mubr.f32.mxu1 %v7357_v6 }
 0x3bb   : > { %5291 = vmatprep.subr.bf16.mxu0 %v5290_v11 }
 0x3bc   : > { %4846 = vmatmul.mubr.f32.gmra.mrb[122].mxu0 %v7233_v13 }
 0x3bd   : > { %3697 = vmatmul.mubr.f32.gmra.mrb[142].mxu1 %v7363_v53  ;;  %5293 = vmatpush3.bf16.msra.mxu0 %v5292_v34 }
 0x3be   : > { %4848 = vmatprep.mubr.f32.mxu0 %v7237_v33  ;;  %3701 = vmatprep.mubr.f32.mxu1 %v3497_v51 }
 0x3bf   : > { %5295 = vmatprep.subr.bf16.mxu0 %v5294_v9 }
 0x3c0   : > { %4849 = vmatmul.mubr.f32.gmra.mrb[124].mxu0 %v7245_v63 }
 0x3c1   : > { %3702 = vmatmul.mubr.f32.gmra.mrb[144].mxu1 %v3496_v57  ;;  %5297 = vmatpush3.bf16.msra.mxu0 %v5296_v7 }
 0x3c2   : > { %4851 = vmatprep.mubr.f32.mxu0 %v7249_v5  ;;  %3706 = vmatprep.mubr.f32.mxu1 %v3500_v24 }
 0x3c3   : > { %5299 = vmatprep.subr.bf16.mxu0 %v5298_v3 }
 0x3c4   : > { %4852 = vmatmul.mubr.f32.gmra.mrb[126].mxu0 %v7257_v19 }
 0x3c5   : > { %3707 = vmatmul.mubr.f32.gmra.mrb[146].mxu1 %v3499_v32  ;;  %5301 = vmatpush3.bf16.msra.mxu0 %v5300_v39 }
 0x3c6   : > { %3195 = vmatprep.mubr.f32.mxu0 %v7199_v43  ;;  %4942 = vmatprep.mubr.f32.mxu1 %v7194_v26  ;;  %v3498_v26 = vld [vmem:[#allocation3 + $0x1c0] sm:$0xff] }
 0x3c8   : > { %3196 = vmatmul.mubr.f32.vlgmr.msra.gmra.mrb[128].mxu0 %v7206_v35 }
 0x3c9   : > { %4943 = vmatmul.mubr.f32.vlgmr.msra.gmra.mrb[100].mxu1 %v7197_v4  ;;  %3200 = vmatprep.mubr.f32.mxu0 %v7211_v62  ;;  %v3501_v4 = vld [vmem:[#allocation3 + $0x1d8] sm:$0xff] }
 0x3ca   : > { %4945 = vmatprep.mubr.f32.mxu1 %v7202_v52 }
 0x3cc   : > { %3201 = vmatmul.mubr.f32.gmra.mrb[130].mxu0 %v7218_v1 }
 0x3cd   : > { %4946 = vmatmul.mubr.f32.gmra.mrb[102].mxu1 %v7209_v48  ;;  %3205 = vmatprep.mubr.f32.mxu0 %v7223_v17 }
 0x3ce   : > { %4948 = vmatprep.mubr.f32.mxu1 %v7213_v36 }
 0x3d0   : > { %3206 = vmatmul.mubr.f32.gmra.mrb[132].mxu0 %v7230_v61 }
 0x3d1   : > { %4949 = vmatmul.mubr.f32.gmra.mrb[104].mxu1 %v7221_v41  ;;  %3210 = vmatprep.mubr.f32.mxu0 %v7235_v21 }
 0x3d2   : > { %4951 = vmatprep.mubr.f32.mxu1 %v7225_v60 }
 0x3d4   : > { %3211 = vmatmul.mubr.f32.gmra.mrb[134].mxu0 %v7242_v30 }
 0x3d5   : > { %4952 = vmatmul.mubr.f32.gmra.mrb[106].mxu1 %v7233_v13  ;;  %3215 = vmatprep.mubr.f32.mxu0 %v7247_v59 }
 0x3d6   : > { %4954 = vmatprep.mubr.f32.mxu1 %v7237_v33 }
 0x3d8   : > { %3216 = vmatmul.mubr.f32.gmra.mrb[136].mxu0 %v7254_v29 }
 0x3d9   : > { %4955 = vmatmul.mubr.f32.gmra.mrb[108].mxu1 %v7245_v63  ;;  %3220 = vmatprep.mubr.f32.mxu0 %v7259_v15 }
 0x3da   : > { %4957 = vmatprep.mubr.f32.mxu1 %v7249_v5 }
 0x3dc   : > { %3221 = vmatmul.mubr.f32.gmra.mrb[138].mxu0 %v7266_v28 }
 0x3dd   : > { %4958 = vmatmul.mubr.f32.gmra.mrb[110].mxu1 %v7257_v19  ;;  %3225 = vmatprep.mubr.f32.mxu0 %v7271_v50 }
 0x3de   : > { %4960 = vmatprep.mubr.f32.mxu1 %v7261_v0 }
 0x3e0   : > { %3226 = vmatmul.mubr.f32.gmra.mrb[140].mxu0 %v7276_v18 }
 0x3e1   : > { %4961 = vmatmul.mubr.f32.gmra.mrb[112].mxu1 %v7269_v37  ;;  %3230 = vmatprep.mubr.f32.mxu0 %v7279_v2 }
 0x3e2   : > { %4963 = vmatprep.mubr.f32.mxu1 %v3498_v26 }
 0x3e4   : > { %3231 = vmatmul.mubr.f32.gmra.mrb[142].mxu0 %v7284_v46 }
 0x3e5   : > { %4964 = vmatmul.mubr.f32.gmra.mrb[114].mxu1 %v3501_v4  ;;  %3235 = vmatprep.mubr.f32.mxu0 %v7287_v38 }
 0x3e8   : > { %3236 = vmatmul.mubr.f32.gmra.mrb[144].mxu0 %v7292_v8 }
 0x3e9   : > { %3240 = vmatprep.mubr.f32.mxu0 %v7295_v12 }
 0x3ec   : > { %3241 = vmatmul.mubr.f32.gmra.mrb[146].mxu0 %v7300_v56 }
 0x3ed   : > { %3245 = vmatprep.mubr.f32.mxu0 %v7303_v44 }
 0x3f0   : > { %3246 = vmatmul.mubr.f32.gmra.mrb[148].mxu0 %v7308_v58 }
 0x3f1   : > { %3250 = vmatprep.mubr.f32.mxu0 %v7311_v45 }
 0x3f4   : > { %3251 = vmatmul.mubr.f32.gmra.mrb[150].mxu0 %v7316_v10 }
 0x3f5   : > { %3255 = vmatprep.mubr.f32.mxu0 %v7319_v40 }
 0x3f8   : > { %3256 = vmatmul.mubr.f32.gmra.mrb[152].mxu0 %v7324_v47 }
 0x3f9   : > { %3260 = vmatprep.mubr.f32.mxu0 %v7327_v25 }
 0x3fc   : > { %3261 = vmatmul.mubr.f32.gmra.mrb[154].mxu0 %v7332_v49 }
 0x3fd   : > { %3265 = vmatprep.mubr.f32.mxu0 %v7349_v31 }
 0x400   : > { %3266 = vmatmul.mubr.f32.gmra.mrb[156].mxu0 %v7355_v16 }
 0x401   : > { %3270 = vmatprep.mubr.f32.mxu0 %v7357_v6 }
 0x404   : > { %3271 = vmatmul.mubr.f32.gmra.mrb[158].mxu0 %v7363_v53 }
 0x43b   : > { %v4308_v43 = vpop.f32.mrb[80].mxu0 }
 0x43c   : > { %v4309_v52 = vpop.f32.mrb[81].mxu0 }
 0x43d   : > { %v7417_v35 = vadd.f32 %v4309_v52, %v4308_v43 }
 0x43f   : > { %v4311_v48 = vpop.f32.mrb[82].mxu0 }
 0x440   : > { %v4312_v62 = vpop.f32.mrb[83].mxu0 }
 0x441   : > { %v7419_v36 = vadd.f32 %v4312_v62, %v4311_v48 }
 0x443   : > { %v4314_v1 = vpop.f32.mrb[84].mxu0 }
 0x444   : > { %v4315_v41 = vpop.f32.mrb[85].mxu0 }
 0x445   : > { %v7421_v17 = vadd.f32 %v4315_v41, %v4314_v1  ;;  %v7464_v1 = vld [vmem:[%s7805_s10] ss:$0 sm:$0xff] }
 0x447   : > { %v4317_v60 = vpop.f32.mrb[86].mxu0 }
 0x448   : > { %v4318_v61 = vpop.f32.mrb[87].mxu0 }
 0x449   : > { %v7423_v13 = vadd.f32 %v4318_v61, %v4317_v60 }
 0x44b   : > { %v4320_v21 = vpop.f32.mrb[88].mxu0 }
 0x44c   : > { %v4321_v33 = vpop.f32.mrb[89].mxu0 }
 0x44d   : > { %v7425_v30 = vadd.f32 %v4321_v33, %v4320_v21  ;;  %v5398_v21 = vadd.f32 %v7419_v36, %v7464_v1  ;;  %v5413_v36 = vadd.f32 %v7421_v17, %v7464_v1 }
 0x44f   : > { %v4323_v63 = vpop.f32.mrb[90].mxu0 }
 0x450   : > { %v4324_v59 = vpop.f32.mrb[91].mxu0 }
 0x451   : > { %v7427_v5 = vadd.f32 %v4324_v59, %v4323_v63  ;;  %v5403_v59 = vadd.f32 %v7417_v35, %v7464_v1 }
 0x453   : > { %v4326_v29 = vpop.f32.mrb[92].mxu0 }
 0x454   : > { %v4327_v19 = vpop.f32.mrb[93].mxu0 }
 0x455   : > { %v7429_v15 = vadd.f32 %v4327_v19, %v4326_v29 }
 0x457   : > { %v4329_v0 = vpop.f32.mrb[94].mxu0 }
 0x458   : > { %v4330_v28 = vpop.f32.mrb[95].mxu0 }
 0x459   : > { %v7431_v37 = vadd.f32 %v4330_v28, %v4329_v0 }
 0x45b   : > { %v4332_v50 = vpop.f32.mrb[96].mxu0 }
 0x45c   : > { %v4333_v18 = vpop.f32.mrb[97].mxu0  ;;  %v4532_v2 = vpop.f32.mrb[116].mxu1 }
 0x45d   : > { %v7433_v46 = vadd.f32 %v4333_v18, %v4332_v50  ;;  %v4533_v38 = vpop.f32.mrb[117].mxu1  ;;  %v5408_v18 = vadd.f32 %v7423_v13, %v7464_v1  ;;  %v5423_v13 = vadd.f32 %v7425_v30, %v7464_v1 }
 0x45e   : > { %v7435_v8 = vadd.f32 %v4533_v38, %v4532_v2 }
 0x45f   : > { %v4335_v12 = vpop.f32.mrb[98].mxu0 }
 0x460   : > { %v4336_v56 = vpop.f32.mrb[99].mxu0  ;;  %v4535_v44 = vpop.f32.mrb[118].mxu1 }
 0x461   : > { %v7437_v58 = vadd.f32 %v4336_v56, %v4335_v12  ;;  %v4536_v45 = vpop.f32.mrb[119].mxu1 }
 0x462   : > { %v7439_v10 = vadd.f32 %v4536_v45, %v4535_v44 }
 0x463   : > { %v4338_v40 = vpop.f32.mrb[100].mxu0 }
 0x464   : > { %v4339_v47 = vpop.f32.mrb[101].mxu0  ;;  %v4538_v25 = vpop.f32.mrb[120].mxu1 }
 0x465   : > { %v7441_v49 = vadd.f32 %v4339_v47, %v4338_v40  ;;  %v4539_v31 = vpop.f32.mrb[121].mxu1  ;;  %v5418_v40 = vadd.f32 %v7427_v5, %v7464_v1  ;;  %v5433_v5 = vadd.f32 %v7429_v15, %v7464_v1 }
 0x466   : > { %v7443_v16 = vadd.f32 %v4539_v31, %v4538_v25 }
 0x467   : > { %v4341_v6 = vpop.f32.mrb[102].mxu0 }
 0x468   : > { %v4342_v11 = vpop.f32.mrb[103].mxu0  ;;  %v4541_v22 = vpop.f32.mrb[122].mxu1 }
 0x469   : > { %v7445_v42 = vadd.f32 %v4342_v11, %v4341_v6  ;;  %v4542_v34 = vpop.f32.mrb[123].mxu1 }
 0x46a   : > { %v7447_v53 = vadd.f32 %v4542_v34, %v4541_v22  ;;  %v5428_v34 = vadd.f32 %v7431_v37, %v7464_v1  ;;  %v5443_v37 = vadd.f32 %v7433_v46, %v7464_v1 }
 0x46b   : > { %v4344_v14 = vpop.f32.mrb[104].mxu0 }
 0x46c   : > { %v4345_v55 = vpop.f32.mrb[105].mxu0  ;;  %v4544_v51 = vpop.f32.mrb[124].mxu1 }
 0x46d   : > { %v7449_v9 = vadd.f32 %v4345_v55, %v4344_v14  ;;  %v4545_v20 = vpop.f32.mrb[125].mxu1 }
 0x46e   : > { %v7451_v54 = vadd.f32 %v4545_v20, %v4544_v51 }
 0x46f   : > { %v4347_v7 = vpop.f32.mrb[106].mxu0 }
 0x470   : > { %v4348_v57 = vpop.f32.mrb[107].mxu0  ;;  %v4547_v27 = vpop.f32.mrb[126].mxu1 }
 0x471   : > { %v7453_v23 = vadd.f32 %v4348_v57, %v4347_v7  ;;  %v4548_v24 = vpop.f32.mrb[127].mxu1 }
 0x472   : > { %v7455_v3 = vadd.f32 %v4548_v24, %v4547_v27  ;;  %v5438_v27 = vadd.f32 %v7437_v58, %v7464_v1  ;;  %v5453_v58 = vadd.f32 %v7441_v49, %v7464_v1 }
 0x473   : > { %v4350_v39 = vpop.f32.mrb[108].mxu0 }
 0x474   : > { %v4351_v32 = vpop.f32.mrb[109].mxu0  ;;  %v4550_v26 = vpop.f32.mrb[128].mxu1 }
 0x475   : > { %v7457_v4 = vadd.f32 %v4351_v32, %v4350_v39  ;;  %v4551_v43 = vpop.f32.mrb[129].mxu1 }
 0x476   : > { %v7459_v52 = vadd.f32 %v4551_v43, %v4550_v26 }
 0x477   : > { %v4353_v48 = vpop.f32.mrb[110].mxu0 }
 0x478   : > { %v4354_v62 = vpop.f32.mrb[111].mxu0  ;;  %v4553_v41 = vpop.f32.mrb[130].mxu1 }
 0x479   : > { %v7466_v60 = vadd.f32 %v4354_v62, %v4353_v48  ;;  %v4554_v61 = vpop.f32.mrb[131].mxu1  ;;  %v5448_v62 = vadd.f32 %v7445_v42, %v7464_v1  ;;  %v5463_v42 = vadd.f32 %v7449_v9, %v7464_v1 }
 0x47a   : > { %v7470_v33 = vadd.f32 %v4554_v61, %v4553_v41 }
 0x47b   : > { %v4832_v63 = vpop.f32.mrb[112].mxu0 }
 0x47c   : > { %v7474_v29 = vadd.f32 %v5398_v21, %v4832_v63  ;;  %v2906_v19 = vpop.f32.mrb[113].mxu0  ;;  %v4556_v0 = vpop.f32.mrb[132].mxu1 }
 0x47d   : > { %v7476_v28 = vadd.f32 %v5403_v59, %v2906_v19  ;;  %v4557_v50 = vpop.f32.mrb[133].mxu1 }
 0x47e   : > { %v7480_v2 = vadd.f32 %v4557_v50, %v4556_v0  ;;  %v5458_v0 = vadd.f32 %v7453_v23, %v7464_v1  ;;  %v5473_v23 = vadd.f32 %v7457_v4, %v7464_v1 }
 0x47f   : > { %v4835_v38 = vpop.f32.mrb[114].mxu0 }
 0x480   : > { %v7484_v12 = vadd.f32 %v5408_v18, %v4835_v38  ;;  %v2916_v56 = vpop.f32.mrb[115].mxu0  ;;  %v4559_v35 = vpop.f32.mrb[134].mxu1 }
 0x481   : > { %v7486_v44 = vadd.f32 %v5413_v36, %v2916_v56  ;;  %v4560_v45 = vpop.f32.mrb[135].mxu1 }
 0x482   : > { %v7490_v47 = vadd.f32 %v4560_v45, %v4559_v35  ;;  %v5468_v45 = vadd.f32 %v7466_v60, %v7464_v1 }
 0x483   : > { %v4838_v25 = vpop.f32.mrb[116].mxu0 }
 0x484   : > { %v7494_v31 = vadd.f32 %v5418_v40, %v4838_v25  ;;  %v2926_v6 = vpop.f32.mrb[117].mxu0  ;;  %v4562_v17 = vpop.f32.mrb[136].mxu1 }
 0x485   : > { %v7496_v11 = vadd.f32 %v5423_v13, %v2926_v6  ;;  %v4563_v22 = vpop.f32.mrb[137].mxu1 }
 0x486   : > { %v7500_v14 = vadd.f32 %v4563_v22, %v4562_v17 }
 0x487   : > { %v4841_v55 = vpop.f32.mrb[118].mxu0 }
 0x488   : > { %v7504_v51 = vadd.f32 %v5428_v34, %v4841_v55  ;;  %v2936_v20 = vpop.f32.mrb[119].mxu0  ;;  %v4565_v30 = vpop.f32.mrb[138].mxu1 }
 0x489   : > { %v7506_v7 = vadd.f32 %v5433_v5, %v2936_v20  ;;  %v4566_v57 = vpop.f32.mrb[139].mxu1 }
 0x48a   : > { %v7510_v24 = vadd.f32 %v4566_v57, %v4565_v30 }
 0x48b   : > { %v4844_v39 = vpop.f32.mrb[120].mxu0 }
 0x48c   : > { %v7514_v32 = vadd.f32 %v5438_v27, %v4844_v39  ;;  %v2946_v26 = vpop.f32.mrb[121].mxu0  ;;  %v4568_v15 = vpop.f32.mrb[140].mxu1 }
 0x48d   : > { %v7516_v43 = vadd.f32 %v5443_v37, %v2946_v26  ;;  %v4569_v48 = vpop.f32.mrb[141].mxu1 }
 0x48e   : > { %v7520_v41 = vadd.f32 %v4569_v48, %v4568_v15 }
 0x48f   : > { %v4847_v61 = vpop.f32.mrb[122].mxu0 }
 0x490   : > { %v7524_v21 = vadd.f32 %v5448_v62, %v4847_v61  ;;  %v2956_v63 = vpop.f32.mrb[123].mxu0  ;;  %v4571_v46 = vpop.f32.mrb[142].mxu1 }
 0x491   : > { %v7526_v59 = vadd.f32 %v5453_v58, %v2956_v63  ;;  %v4572_v19 = vpop.f32.mrb[143].mxu1 }
 0x492   : > { %v7530_v50 = vadd.f32 %v4572_v19, %v4571_v46 }
 0x493   : > { %v4850_v18 = vpop.f32.mrb[124].mxu0 }
 0x494   : > { %v7534_v38 = vadd.f32 %v5458_v0, %v4850_v18  ;;  %v2966_v36 = vpop.f32.mrb[125].mxu0  ;;  %v4574_v49 = vpop.f32.mrb[144].mxu1 }
 0x495   : > { %v7536_v56 = vadd.f32 %v5463_v42, %v2966_v36  ;;  %v4575_v35 = vpop.f32.mrb[145].mxu1 }
 0x496   : > { %v7540_v40 = vadd.f32 %v4575_v35, %v4574_v49 }
 0x497   : > { %v4853_v25 = vpop.f32.mrb[126].mxu0 }
 0x498   : > { %v7544_v13 = vadd.f32 %v5468_v45, %v4853_v25  ;;  %v2976_v6 = vpop.f32.mrb[127].mxu0  ;;  %v4577_v9 = vpop.f32.mrb[146].mxu1 }
 0x499   : > { %v7546_v17 = vadd.f32 %v5473_v23, %v2976_v6  ;;  %v4578_v22 = vpop.f32.mrb[147].mxu1 }
 0x49a   : > { %v7548_v34 = vadd.f32 %v4578_v22, %v4577_v9 }
 0x49b   : > { %v4420_v55 = vpop.f32.mrb[128].mxu0 }
 0x49c   : > { %v4944_v5 = vpop.f32.mrb[100].mxu1  ;;  %v4421_v20 = vpop.f32.mrb[129].mxu0 }
 0x49d   : > { %v4422_v30 = vadd.f32 %v4421_v20, %v4420_v55  ;;  %v3778_v60 = vpop.f32.mrb[101].mxu1 }
 0x49f   : > { %v5405_v57 = vadd.f32 %v7476_v28, %v4422_v30  ;;  %v4423_v27 = vpop.f32.mrb[130].mxu0 }
 0x4a0   : > { %v4947_v39 = vpop.f32.mrb[102].mxu1  ;;  %v4424_v4 = vpop.f32.mrb[131].mxu0 }
 0x4a1   : > { %v5406_v1 = vadd.f32 %v5405_v57, %v7435_v8  ;;  %v4425_v37 = vadd.f32 %v4424_v4, %v4423_v27  ;;  %v3788_v26 = vpop.f32.mrb[103].mxu1 }
 0x4a3   : > { %v5407_v15 = vadd.f32 %v5406_v1, %v3778_v60  ;;  %v5400_v48 = vadd.f32 %v7474_v29, %v4425_v37  ;;  %v4426_v62 = vpop.f32.mrb[132].mxu0 }
 0x4a4   : > { %v4950_v61 = vpop.f32.mrb[104].mxu1  ;;  %v4427_v58 = vpop.f32.mrb[133].mxu0 }
 0x4a5   : > { %v3905_v63 = vmax.f32 %v5407_v15, 0.0  ;;  %v5401_v46 = vadd.f32 %v5400_v48, %v7439_v10  ;;  %v4428_v19 = vadd.f32 %v4427_v58, %v4426_v62  ;;  %v3798_v28 = vpop.f32.mrb[105].mxu1 }
 0x4a7   : > { %3921 = vst [vmem:[%s6589_s15] sm:$0xff] %v3905_v63  ;;  %v5402_v0 = vadd.f32 %v5401_v46, %v4944_v5  ;;  %v5415_v18 = vadd.f32 %v7486_v44, %v4428_v19  ;;  %v4429_v42 = vpop.f32.mrb[134].mxu0 }
 0x4a8   : > { %v4953_v8 = vpop.f32.mrb[106].mxu1  ;;  %v4430_v36 = vpop.f32.mrb[135].mxu0 }
 0x4a9   : > { %v3906_v49 = vmax.f32 %v5402_v0, 0.0  ;;  %v5416_v29 = vadd.f32 %v5415_v18, %v7443_v16  ;;  %v4431_v35 = vadd.f32 %v4430_v36, %v4429_v42  ;;  %v3808_v45 = vpop.f32.mrb[107].mxu1 }
 0x4ab   : > { %3922 = vst [vmem:[%s6589_s15 + $0x8] sm:$0xff] %v3906_v49  ;;  %v5417_v25 = vadd.f32 %v5416_v29, %v3788_v26  ;;  %v5410_v23 = vadd.f32 %v7484_v12, %v4431_v35  ;;  %v4432_v10 = vpop.f32.mrb[136].mxu0 }
 0x4ac   : > { %v4956_v6 = vpop.f32.mrb[108].mxu1  ;;  %v4433_v9 = vpop.f32.mrb[137].mxu0 }
 0x4ad   : > { %v3907_v22 = vmax.f32 %v5417_v25, 0.0  ;;  %v5411_v44 = vadd.f32 %v5410_v23, %v7447_v53  ;;  %v4434_v55 = vadd.f32 %v4433_v9, %v4432_v10  ;;  %v3818_v5 = vpop.f32.mrb[109].mxu1 }
 0x4af   : > { %3923 = vst [vmem:[%s6589_s15 + $0x10] sm:$0xff] %v3907_v22  ;;  %v5412_v20 = vadd.f32 %v5411_v44, %v4947_v39  ;;  %v5425_v30 = vadd.f32 %v7496_v11, %v4434_v55  ;;  %v4435_v16 = vpop.f32.mrb[138].mxu0 }
 0x4b0   : > { %v7562_v60 = vpop.f32.mrb[110].mxu1  ;;  %v4436_v57 = vpop.f32.mrb[139].mxu0 }
 0x4b1   : > { %v3908_v27 = vmax.f32 %v5412_v20, 0.0  ;;  %v5426_v12 = vadd.f32 %v5425_v30, %v7451_v54  ;;  %v4437_v4 = vadd.f32 %v4436_v57, %v4435_v16  ;;  %v3828_v1 = vpop.f32.mrb[111].mxu1 }
 0x4b3   : > { %3924 = vst [vmem:[%s6589_s15 + $0x18] sm:$0xff] %v3908_v27  ;;  %v5427_v37 = vadd.f32 %v5426_v12, %v3798_v28  ;;  %v5420_v53 = vadd.f32 %v7494_v31, %v4437_v4  ;;  %v4438_v26 = vpop.f32.mrb[140].mxu0 }
 0x4b4   : > { %v7567_v15 = vpop.f32.mrb[112].mxu1  ;;  %v4439_v39 = vpop.f32.mrb[141].mxu0 }
 0x4b5   : > { %v3909_v11 = vmax.f32 %v5427_v37, 0.0  ;;  %v5421_v48 = vadd.f32 %v5420_v53, %v7455_v3  ;;  %v4440_v62 = vadd.f32 %v4439_v39, %v4438_v26  ;;  %v3838_v58 = vpop.f32.mrb[113].mxu1 }
 0x4b7   : > { %3925 = vst [vmem:[%s6589_s15 + $0x20] sm:$0xff] %v3909_v11  ;;  %v5422_v63 = vadd.f32 %v5421_v48, %v4950_v61  ;;  %v5435_v54 = vadd.f32 %v7506_v7, %v4440_v62  ;;  %v4441_v46 = vpop.f32.mrb[142].mxu0 }
 0x4b8   : > { %v7572_v19 = vpop.f32.mrb[114].mxu1  ;;  %v4442_v28 = vpop.f32.mrb[143].mxu0 }
 0x4b9   : > { %v3910_v31 = vmax.f32 %v5422_v63, 0.0  ;;  %v5436_v0 = vadd.f32 %v5435_v54, %v7459_v52  ;;  %v4443_v18 = vadd.f32 %v4442_v28, %v4441_v46  ;;  %v7575_v42 = vpop.f32.mrb[115].mxu1 }
 0x4bb   : > { %3926 = vst [vmem:[%s6589_s15 + $0x28] sm:$0xff] %v3910_v31  ;;  %v5437_v3 = vadd.f32 %v5436_v0, %v3808_v45  ;;  %v5430_v36 = vadd.f32 %v7504_v51, %v4443_v18  ;;  %v4444_v49 = vpop.f32.mrb[144].mxu0 }
 0x4bc   : > { %v4445_v61 = vpop.f32.mrb[145].mxu0 }
 0x4bd   : > { %v3911_v29 = vmax.f32 %v5437_v3, 0.0  ;;  %v5431_v7 = vadd.f32 %v5430_v36, %v7470_v33  ;;  %v4446_v35 = vadd.f32 %v4445_v61, %v4444_v49 }
 0x4bf   : > { %3927 = vst [vmem:[%s6589_s15 + $0x30] sm:$0xff] %v3911_v29  ;;  %v5432_v25 = vadd.f32 %v5431_v7, %v4953_v8  ;;  %v5445_v23 = vadd.f32 %v7516_v43, %v4446_v35  ;;  %v4447_v52 = vpop.f32.mrb[146].mxu0 }
 0x4c0   : > { %v4448_v10 = vpop.f32.mrb[147].mxu0 }
 0x4c1   : > { %v3912_v9 = vmax.f32 %v5432_v25, 0.0  ;;  %v5446_v22 = vadd.f32 %v5445_v23, %v7480_v2  ;;  %v4449_v44 = vadd.f32 %v4448_v10, %v4447_v52 }
 0x4c3   : > { %3928 = vst [vmem:[%s6589_s15 + $0x38] sm:$0xff] %v3912_v9  ;;  %v5447_v51 = vadd.f32 %v5446_v22, %v3818_v5  ;;  %v5440_v45 = vadd.f32 %v7514_v32, %v4449_v44  ;;  %v4450_v55 = vpop.f32.mrb[148].mxu0 }
 0x4c4   : > { %v4451_v20 = vpop.f32.mrb[149].mxu0 }
 0x4c5   : > { %v3913_v33 = vmax.f32 %v5447_v51, 0.0  ;;  %v5441_v30 = vadd.f32 %v5440_v45, %v7490_v47  ;;  %v4452_v16 = vadd.f32 %v4451_v20, %v4450_v55 }
 0x4c7   : > { %3929 = vst [vmem:[%s6589_s15 + $0x40] sm:$0xff] %v3913_v33  ;;  %v5442_v43 = vadd.f32 %v5441_v30, %v4956_v6  ;;  %v5455_v8 = vadd.f32 %v7526_v59, %v4452_v16  ;;  %v4453_v57 = vpop.f32.mrb[150].mxu0 }
 0x4c8   : > { %v4454_v27 = vpop.f32.mrb[151].mxu0 }
 0x4c9   : > { %v3914_v2 = vmax.f32 %v5442_v43, 0.0  ;;  %v5456_v12 = vadd.f32 %v5455_v8, %v7500_v14  ;;  %v4455_v4 = vadd.f32 %v4454_v27, %v4453_v57 }
 0x4cb   : > { %3930 = vst [vmem:[%s6589_s15 + $0x48] sm:$0xff] %v3914_v2  ;;  %v5457_v32 = vadd.f32 %v5456_v12, %v3828_v1  ;;  %v5450_v5 = vadd.f32 %v7524_v21, %v4455_v4  ;;  %v4456_v37 = vpop.f32.mrb[152].mxu0 }
 0x4cc   : > { %v4457_v53 = vpop.f32.mrb[153].mxu0 }
 0x4cd   : > { %v3915_v47 = vmax.f32 %v5457_v32, 0.0  ;;  %v5451_v26 = vadd.f32 %v5450_v5, %v7510_v24  ;;  %v4458_v39 = vadd.f32 %v4457_v53, %v4456_v37 }
 0x4cf   : > { %3931 = vst [vmem:[%s6589_s15 + $0x50] sm:$0xff] %v3915_v47  ;;  %v5452_v59 = vadd.f32 %v5451_v26, %v7562_v60  ;;  %v5465_v6 = vadd.f32 %v7536_v56, %v4458_v39  ;;  %v4459_v11 = vpop.f32.mrb[154].mxu0 }
 0x4d0   : > { %v4460_v14 = vpop.f32.mrb[155].mxu0 }
 0x4d1   : > { %v3916_v48 = vmax.f32 %v5452_v59, 0.0  ;;  %v5466_v1 = vadd.f32 %v5465_v6, %v7520_v41  ;;  %v4461_v21 = vadd.f32 %v4460_v14, %v4459_v11 }
 0x4d3   : > { %3932 = vst [vmem:[%s6589_s15 + $0x58] sm:$0xff] %v3916_v48  ;;  %v5467_v62 = vadd.f32 %v5466_v1, %v3838_v58  ;;  %v5460_v63 = vadd.f32 %v7534_v38, %v4461_v21  ;;  %v4462_v24 = vpop.f32.mrb[156].mxu0 }
 0x4d4   : > { %v4463_v54 = vpop.f32.mrb[157].mxu0 }
 0x4d5   : > { %v3917_v46 = vmax.f32 %v5467_v62, 0.0  ;;  %v5461_v60 = vadd.f32 %v5460_v63, %v7530_v50  ;;  %v4464_v28 = vadd.f32 %v4463_v54, %v4462_v24 }
 0x4d7   : > { %3933 = vst [vmem:[%s6589_s15 + $0x60] sm:$0xff] %v3917_v46  ;;  %v5462_v56 = vadd.f32 %v5461_v60, %v7567_v15  ;;  %v5475_v31 = vadd.f32 %v7546_v17, %v4464_v28  ;;  %v4465_v41 = vpop.f32.mrb[158].mxu0 }
 0x4d8   : > { %v4466_v58 = vpop.f32.mrb[159].mxu0 }
 0x4d9   : > { %v3918_v0 = vmax.f32 %v5462_v56, 0.0  ;;  %v5476_v38 = vadd.f32 %v5475_v31, %v7540_v40  ;;  %v4467_v18 = vadd.f32 %v4466_v58, %v4465_v41 }
 0x4db   : > { %3934 = vst [vmem:[%s6589_s15 + $0x68] sm:$0xff] %v3918_v0  ;;  %v5477_v50 = vadd.f32 %v5476_v38, %v7575_v42  ;;  %v5470_v15 = vadd.f32 %v7544_v13, %v4467_v18 }
 0x4dd   : > { %v3919_v3 = vmax.f32 %v5477_v50, 0.0  ;;  %v5471_v17 = vadd.f32 %v5470_v15, %v7548_v34 }
 0x4df   : > { %3935 = vst [vmem:[%s6589_s15 + $0x70] sm:$0xff] %v3919_v3  ;;  %v5472_v36 = vadd.f32 %v5471_v17, %v7572_v19 }
 0x4e1   : > { %v3920_v40 = vmax.f32 %v5472_v36, 0.0 }
 0x4e3   : > { %3936 = vst [vmem:[%s6589_s15 + $0x78] sm:$0xff] %v3920_v40 }
 0x4e4   : > { %5820 = shalt.err (!%p5817_p3)
}
 0x4e5   : > { %s5821_s15 = scalar_lea.hbm %s7615_s13, 2048  ;;  %s5825_s1 = scalar_lea.hbm %s7809_s19, 8192 }
 0x4e6   : > { %p5822_p7 = scmp.ne.s32.totalorder %s7615_s13, %s5821_s15  ;;  %p5826_p12 = scmp.lt.u32.totalorder %s7615_s13, %s7809_s19 }
 0x4e7   : > { %p5827_p2 = scmp.lt.u32.totalorder %s5825_s1, %s5821_s15  ;;  %p5829_p13 = scmp.lt.u32.totalorder %s5821_s15, %s7615_s13 }
 0x4e8   : > { %p5823_p4 = pnand %p5822_p7, %p7810_p1 }
 0x4e9   : > { %p5828_p0 = por %p5827_p2, %p5826_p12 }
 0x4ea   : > { %p5824_p10 = pneg %p5823_p4 }
 0x4eb   : > { %p5830_p8 = por %p5829_p13, %p5828_p0 }
 0x4ed   : > { %p5831_p5 = pnand %p5830_p8, %p5824_p10 }
 0x4ef   : > { %5834 = shalt.err (!%p5831_p5)
}
 0x4f0   : > { %s5981_s21 = smov 128   ;;  %s5982_s28 = smov 8  }
 0x4f1   : > { %5508 = dma.vmem_to_hbm [thread:$0]  (%p7810_p1), %s7617_s11, 2048, %s7615_s13, %s3938_s3, %s5981_s21, %s5981_s21, %s5982_s28  }
 0x4f2 PF: > { %p5536_p6 = scmp.ge.s32.totalorder %s5965_s14, 2  ;;  %s3969_s5 = sand.u32 1, %s5937_s30  }
 0x4f3   : > { %p7811_p9 = scmp.ne.s32.totalorder %s7772_s2, 0  ;;  %s3970_s18 = scalar_lea.sflag [#allocation8], %s3969_s5 }
 0x4f5   : > { %p5528_p11 = pnand %p5536_p6, %p7811_p9 }
 0x4f7   : > { %5908 = dma.done.wait (!%p5528_p11), %s3970_s18, 2048  }
 0x4f8   : > { %5910 = vsyncadd (!%p5528_p11), %s3970_s18, 4294965248  ;;  %s27_s14 = sadd.s32 1, %s5965_s14   ;;  %s7813_s24 = sld [smem:[#allocation22_spill]] }
 0x4f9   : > { %p7649_p3 = scmp.ge.s32.totalorder %s27_s14, 6   ;;  %s7814_s25 = sld [smem:[#allocation23_spill]] }
 0x4fa   : > { %s7815_s17 = sld [smem:[#allocation24_spill]]  ;;  %s7816_s20 = smov %s6183_s27 }
 0x4fb   : > { %s7817_s10 = sld [smem:[#allocation27_spill]]  ;;  %s7818_s11 = sld [smem:[#allocation28_spill]] }
 0x4fc   : > { %s7819_s12 = sld [smem:[#allocation30_spill]]  ;;  %s7820_s13 = sld [smem:[#allocation31_spill]] }
 0x4fd   : > { %s7822_s26 = smov %s7844_s22  ;;  %s7824_s28 = smov %s5933_s29 }
 0x4fe   : > { %s7825_s29 = smov %s7816_s20  ;;  %s7826_s30 = smov %s5941_s8 }
 0x4ff   : > { %s7827_s8 = smov %s5945_s9  ;;  %s7828_s9 = smov %s6274_s23 }
 0x500   : > { %s7823_s27 = smov %s7815_s17  ;;  %26 = sbr.rel (!%p7649_p3) target bundleno = 22 (0x16), region = 160 }
 0x507   :  { %3975 = vsyncpa [#allocation7], 1 }
 0x508   :  { %3977 = vsyncpa [#allocation7 + $0x1], 1 }
 0x509   :  { %3978 = vsyncpa [#allocation10], 1 }
 0x50a   :  { %3980 = vsyncpa [#allocation10 + $0x1], 1 }
 0x50b   :  { %3981 = vsyncpa [#allocation13], 1 }
 0x50c   :  { %3982 = vsyncpa [#allocation8], 1 }
 0x50d   :  { %3984 = vsyncpa [#allocation8 + $0x1], 1 }

</bundles_post_ra>
